<compile_context>
chip_gen: v7x
topology: tpu7x:2x2x1
jax: 0.10.0
libtpu: 0.0.40
codegen_flags: <defaults>
</compile_context>

<pallas_src>
import math
import numpy as np
import jax
import jax.numpy as jnp
from jax import lax
from jax.experimental import pallas as pl
from jax.experimental.pallas import tpu as pltpu


def _round_up(x, m):
    return ((x + m - 1) // m) * m


# ----------------------------------------------------------------------------
# Glue: build the sparse conv weight matrix (mirrors get_sparse_conv_weights_matrix)
# ----------------------------------------------------------------------------
def build_conv_weight_matrix(conv_weights, bias, in_feature, stride=1, padding=0):
    """conv_weights: (c_out, c_in, k, k) numpy; bias: (c_out,) numpy.
    in_feature: (c_in, H, W). Returns (c_out*OH*OW, c_in*H*W + 1) float32."""
    c_out, c_in, k, _ = conv_weights.shape
    _, H, W = in_feature
    OH = math.floor((H - k + 2 * padding) / stride + 1)
    OW = math.floor((W - k + 2 * padding) / stride + 1)
    Hp, Wp = H + 2 * padding, W + 2 * padding

    # mask of non-padding positions in the padded image (== pad_image of ones)
    mask = np.zeros((Hp, Wp), dtype=bool)
    mask[padding:padding + H, padding:padding + W] = True
    mask = mask.reshape(-1)

    rows = []
    for c in range(c_out):
        line = []
        for ci in range(c_in):
            ker = conv_weights[c, ci]
            km = np.zeros((OH * OW, Hp * Wp), dtype=np.float32)
            for i in range(OH):
                for j in range(OW):
                    for ii in range(k):
                        for jj in range(k):
                            km[i * OW + j,
                               i * Wp * stride + stride * j + ii * Wp + jj] = ker[ii, jj]
            line.append(km[:, mask])                       # dense_weights
        line_m = np.concatenate(line, axis=1)
        bias_col = np.ones((OH * OW, 1), dtype=np.float32) * bias[c]
        rows.append(np.concatenate([line_m, bias_col], axis=1))
    return np.concatenate(rows, axis=0).astype(np.float32)


# ----------------------------------------------------------------------------
# Pallas kernel: exact DeepPoly pos/neg resolve of the affine matrix against
# an interval box.
#   wt_ref : (tk, tm)            tile of W^T
#   lu_ref : (k_tiles, 2, tk)    VMEM-resident: slab k holds [l_k ; u_k]
#                                (bias entry is 1 in both l and u)
#   out_ref: (2, tm)             row 0 = lb, row 1 = ub (lane-dense)
#   lb/ub accumulators: (1, tm) f32 scratch across the K grid axis
# ----------------------------------------------------------------------------
def dpconv_resolve_kernel(wt_ref, lu_ref, out_ref, lb_acc_ref, ub_acc_ref):
    k = pl.program_id(1)

    @pl.when(k == 0)
    def _init():
        lb_acc_ref[...] = jnp.zeros_like(lb_acc_ref)
        ub_acc_ref[...] = jnp.zeros_like(ub_acc_ref)

    wt = wt_ref[...]                           # (tk, tm)
    wt_pos = jnp.maximum(wt, 0.0)              # W+^T  (VPU; MXU slack hides it)
    wt_neg = jnp.minimum(wt, 0.0)              # W-^T

    lu = lu_ref[k]                             # (2, tk): row 0 = l, row 1 = u
    # (2, tk) @ (tk, tm) -> (2, tm): rows are [l @ W+, u @ W+] and [l @ W-, u @ W-]
    p = jnp.dot(lu, wt_pos, preferred_element_type=jnp.float32)
    n = jnp.dot(lu, wt_neg, preferred_element_type=jnp.float32)

    lb_acc_ref[...] += p[0:1, :] + n[1:2, :]   # W+ @ l + W- @ u
    ub_acc_ref[...] += p[1:2, :] + n[0:1, :]   # W+ @ u + W- @ l

    @pl.when(k == pl.num_programs(1) - 1)
    def _finalize():
        out_ref[0:1, :] = lb_acc_ref[...]      # lane-dense row stores
        out_ref[1:2, :] = ub_acc_ref[...]


# ----------------------------------------------------------------------------
# Per-layer resolver: caches the padded/transposed W layout and the compiled
# pallas_call; forward() only builds the tiny (l, u) operand per call.
# ----------------------------------------------------------------------------
class DPConvResolver:
    def __init__(self, weight_mtrx, *, tm=2048, tk=1024,
                 vmem_limit_bytes=48 * 1024 * 1024):
        weight_mtrx = jnp.asarray(weight_mtrx, jnp.float32)
        N, Kp1 = weight_mtrx.shape

        # --- tile sizing (multiples of 128, clamped to padded problem size) ---
        n_full = _round_up(N, 128)
        tm = max(128, min(_round_up(tm, 128), n_full))
        # Megacore: guarantee >= 2 tiles on the 'parallel' row axis when possible
        # so both v7x TensorCores get work.
        if n_full // tm < 2 and n_full >= 256:
            tm = _round_up((n_full + 1) // 2, 128)
        tk = max(128, min(_round_up(tk, 128), _round_up(Kp1, 128)))
        n_pad = _round_up(N, tm)
        k_pad = _round_up(Kp1, tk)
        k_tiles = k_pad // tk

        self.weight_mtrx = weight_mtrx
        self.N, self.Kp1 = N, Kp1
        self.tm, self.tk = tm, tk
        self.n_pad, self.k_pad, self.k_tiles = n_pad, k_pad, k_tiles

        # One-time layout pass: zero-pad + transpose W.  Cached on device and
        # amortized over every subsequent resolve() against this layer.
        self.w_t = jnp.pad(weight_mtrx,
                           ((0, n_pad - N), (0, k_pad - Kp1))).T  # (k_pad, n_pad)
        self.w_t = jax.block_until_ready(self.w_t)

        grid = (n_pad // tm, k_tiles)
        call = pl.pallas_call(
            dpconv_resolve_kernel,
            out_shape=jax.ShapeDtypeStruct((2, n_pad), jnp.float32),
            grid_spec=pltpu.PrefetchScalarGridSpec(
                num_scalar_prefetch=0,
                grid=grid,
                in_specs=[
                    # Streamed W^T tiles (the only large operand).
                    pl.BlockSpec((tk, tm), lambda i, k: (k, i)),
                    # (l, u) vectors fully VMEM-resident (constant block index).
                    pl.BlockSpec((k_tiles, 2, tk), lambda i, k: (0, 0, 0)),
                ],
                out_specs=pl.BlockSpec((2, tm), lambda i, k: (0, i)),
                scratch_shapes=[pltpu.VMEM((1, tm), jnp.float32),
                                pltpu.VMEM((1, tm), jnp.float32)],
            ),
            compiler_params=pltpu.CompilerParams(
                dimension_semantics=("parallel", "arbitrary"),
                vmem_limit_bytes=vmem_limit_bytes),
        )

        def _resolve(w_t, l0, u0):
            one = jnp.ones((1,), jnp.float32)
            # Append 1 to both l and u so the bias column contributes exactly
            # the bias to lb and ub under the pos/neg split.
            l = jnp.concatenate([l0.astype(jnp.float32), one])
            u = jnp.concatenate([u0.astype(jnp.float32), one])
            pad = k_pad - Kp1
            l_p = jnp.pad(l, (0, pad)).reshape(k_tiles, tk)
            u_p = jnp.pad(u, (0, pad)).reshape(k_tiles, tk)
            lu3 = jnp.stack([l_p, u_p], axis=1)            # (k_tiles, 2, tk)
            out = call(w_t, lu3)
            return out[0, :N], out[1, :N]

        self._resolve = jax.jit(_resolve)

    def forward(self, l0, u0):
        """DPConv.forward for a DeepPoly element with layers == 1.
        Returns (lb, ub, slb, sub); slb = sub = weightMtrx (pure assignment)."""
        lb, ub = self._resolve(self.w_t, l0, u0)
        return lb, ub, self.weight_mtrx, self.weight_mtrx


def dpconv_forward(weight_mtrx, l0, u0, **kw):
    """One-shot convenience wrapper (prefer DPConvResolver for repeated use)."""
    return DPConvResolver(weight_mtrx, **kw).forward(l0, u0)


# ----------------------------------------------------------------------------
# Main
# ----------------------------------------------------------------------------
if __name__ == "__main__":
    # Conv2d(in_channels=3, out_channels=4, kernel_size=3, stride=1, padding=1)
    c_in, c_out, k, stride, padding = 3, 4, 3, 1, 1
    H = W = 16
    in_feature = c_in * H * W                     # 768

    key = jax.random.PRNGKey(0)
    kwt, kbs, kxx = jax.random.split(key, 3)
    fan_in = c_in * k * k
    conv_w = (jax.random.normal(kwt, (c_out, c_in, k, k), jnp.float32)
              * (1.0 / math.sqrt(fan_in)))
    conv_b = jax.random.normal(kbs, (c_out,), jnp.float32) * 0.1

    # Build the affine matrix (glue, mirrors get_sparse_conv_weights_matrix)
    W_mtrx_np = build_conv_weight_matrix(np.asarray(conv_w), np.asarray(conv_b),
                                         (c_in, H, W), stride=stride, padding=padding)
    W_mtrx = jnp.asarray(W_mtrx_np)               # (1024, 769)

    # Concrete input interval box (DeepPoly layer 0)
    x0 = jax.random.normal(kxx, (in_feature,), jnp.float32)
    eps = 0.1
    l0 = x0 - eps
    u0 = x0 + eps

    # Instance 1: default (large) tiles; row axis auto-split for megacore.
    layer = DPConvResolver(W_mtrx)
    lb, ub, slb, sub = layer.forward(l0, u0)
    # Second resolve against a wider box reuses cached W^T + compiled kernel.
    lb_w, ub_w, _, _ = layer.forward(l0 - 0.05, u0 + 0.05)

    # Instance 2: small tiles -> exercises the (row tiles x K-reduction) grid.
    lb2, ub2, _, _ = dpconv_forward(W_mtrx, l0, u0, tm=256, tk=256)

    lb, ub, lb_w, ub_w, lb2, ub2 = jax.block_until_ready((lb, ub, lb_w, ub_w, lb2, ub2))

    # --- correctness checks ---
    # 1) kernel vs host float64 DeepPoly resolve reference (pos/neg split form)
    W64 = np.asarray(W_mtrx_np, dtype=np.float64)
    Wc64, Wb64 = W64[:, :-1], W64[:, -1]
    l64 = np.asarray(l0, dtype=np.float64)
    u64 = np.asarray(u0, dtype=np.float64)
    pos, neg = np.maximum(Wc64, 0.0), np.minimum(Wc64, 0.0)
    lb_ref = pos @ l64 + neg @ u64 + Wb64
    ub_ref = pos @ u64 + neg @ l64 + Wb64
    np.testing.assert_allclose(np.asarray(lb), lb_ref, rtol=1e-4, atol=1e-4)
    np.testing.assert_allclose(np.asarray(ub), ub_ref, rtol=1e-4, atol=1e-4)
    np.testing.assert_allclose(np.asarray(lb2), lb_ref, rtol=1e-4, atol=1e-4)
    np.testing.assert_allclose(np.asarray(ub2), ub_ref, rtol=1e-4, atol=1e-4)

    # 2) a wider box must only widen the bounds
    assert bool(jnp.all(lb_w <= lb + 1e-5)) and bool(jnp.all(ub_w >= ub - 1e-5))

    # 3) the affine matrix really is the conv: W @ [x;1] == conv2d(x) + b
    x_img = x0.reshape(1, c_in, H, W)
    conv_out = lax.conv_general_dilated(
        x_img, conv_w, window_strides=(stride, stride),
        padding=[(padding, padding), (padding, padding)],
        dimension_numbers=("NCHW", "OIHW", "NCHW"))
    conv_out = conv_out[0] + conv_b[:, None, None]
    affine_out = W_mtrx[:, :-1] @ x0 + W_mtrx[:, -1]
    np.testing.assert_allclose(np.asarray(affine_out),
                               np.asarray(conv_out).reshape(-1), rtol=1e-4, atol=1e-4)

    assert bool(jnp.all(lb <= ub))
    assert bool(jnp.all(slb == W_mtrx)) and bool(jnp.all(sub == W_mtrx))
    print("KERNEL_OK")
</pallas_src>

<mosaic_0001>
module attributes {stable_mosaic.version = 11 : i64} {
  func.func @dpconv_resolve_kernel(%arg0: i32, %arg1: i32, %arg2: memref<896x512xf32, #tpu.memory_space<vmem>>, %arg3: memref<1x2x896xf32, #tpu.memory_space<vmem>>, %arg4: memref<2x512xf32, #tpu.memory_space<vmem>>, %arg5: memref<1x512xf32, #tpu.memory_space<vmem>>, %arg6: memref<1x512xf32, #tpu.memory_space<vmem>>) attributes {dimension_semantics = [#tpu.dimension_semantics<parallel>, #tpu.dimension_semantics<arbitrary>], iteration_bounds = array<i64: 2, 1>, scalar_prefetch = 0 : i64, scratch_operands = 2 : i64, tpu.core_type = #tpu.core_type<tc>, window_params = [{transform_indices = @transform_0, window_bounds = array<i64: 896, 512>}, {pipeline_mode = #tpu.pipeline_mode<synchronous>, transform_indices = @transform_1, window_bounds = array<i64: 1, 2, 896>}, {transform_indices = @transform_2, window_bounds = array<i64: 2, 512>}]} {
    %c0_i32 = arith.constant 0 : i32
    %0 = arith.cmpi eq, %arg1, %c0_i32 : i32
    %1 = arith.extui %0 : i1 to i32
    %c0_i32_0 = arith.constant 0 : i32
    %2 = arith.cmpi ne, %1, %c0_i32_0 : i32
    scf.if %2 {
      %cst_17 = arith.constant 0.000000e+00 : f32
      %28 = vector.broadcast %cst_17 : f32 to vector<1x512xf32>
      %c0_18 = arith.constant 0 : index
      %c0_19 = arith.constant 0 : index
      %29 = vector.load %arg5[%c0_18, %c0_19] : memref<1x512xf32, #tpu.memory_space<vmem>>, vector<1x512xf32>
      tpu.vector_store %arg5[%c0_18, %c0_19], %28 {strides = array<i32>} : memref<1x512xf32, #tpu.memory_space<vmem>>, vector<1x512xf32>,
      %cst_20 = arith.constant 0.000000e+00 : f32
      %30 = vector.broadcast %cst_20 : f32 to vector<1x512xf32>
      %c0_21 = arith.constant 0 : index
      %c0_22 = arith.constant 0 : index
      %31 = vector.load %arg6[%c0_21, %c0_22] : memref<1x512xf32, #tpu.memory_space<vmem>>, vector<1x512xf32>
      tpu.vector_store %arg6[%c0_21, %c0_22], %30 {strides = array<i32>} : memref<1x512xf32, #tpu.memory_space<vmem>>, vector<1x512xf32>,
    } else {
    }
    %c0 = arith.constant 0 : index
    %c0_1 = arith.constant 0 : index
    %3 = vector.load %arg2[%c0, %c0_1] : memref<896x512xf32, #tpu.memory_space<vmem>>, vector<896x512xf32>
    %cst = arith.constant 0.000000e+00 : f32
    %4 = vector.broadcast %cst : f32 to vector<896x512xf32>
    %5 = arith.maximumf %3, %4 : vector<896x512xf32>
    %cst_2 = arith.constant 0.000000e+00 : f32
    %6 = vector.broadcast %cst_2 : f32 to vector<896x512xf32>
    %7 = arith.minimumf %3, %6 : vector<896x512xf32>
    %8 = arith.index_cast %arg1 : i32 to index
    %c0_3 = arith.constant 0 : index
    %c0_4 = arith.constant 0 : index
    %9 = vector.load %arg3[%8, %c0_3, %c0_4] : memref<1x2x896xf32, #tpu.memory_space<vmem>>, vector<1x2x896xf32>
    %10 = vector.shape_cast %9 : vector<1x2x896xf32> to vector<2x896xf32>
    %cst_5 = arith.constant dense<0.000000e+00> : vector<2x512xf32>
    %11 = tpu.matmul %10, %5, %cst_5 {dimension_numbers = #tpu.dot_dimension_numbers<[1], [0], [0], [1], [0, 0, 1, 1], [], []>} : vector<2x896xf32>, vector<896x512xf32>, vector<2x512xf32> -> vector<2x512xf32>
    %cst_6 = arith.constant dense<0.000000e+00> : vector<2x512xf32>
    %12 = tpu.matmul %10, %7, %cst_6 {dimension_numbers = #tpu.dot_dimension_numbers<[1], [0], [0], [1], [0, 0, 1, 1], [], []>} : vector<2x896xf32>, vector<896x512xf32>, vector<2x512xf32> -> vector<2x512xf32>
    %c0_7 = arith.constant 0 : index
    %c0_8 = arith.constant 0 : index
    %13 = vector.load %arg5[%c0_7, %c0_8] : memref<1x512xf32, #tpu.memory_space<vmem>>, vector<1x512xf32>
    %14 = vector.extract_strided_slice %11 {offsets = [0, 0], sizes = [1, 512], strides = [1, 1]} : vector<2x512xf32> to vector<1x512xf32>
    %15 = vector.extract_strided_slice %12 {offsets = [1, 0], sizes = [1, 512], strides = [1, 1]} : vector<2x512xf32> to vector<1x512xf32>
    %16 = arith.addf %14, %15 : vector<1x512xf32>
    %17 = arith.addf %13, %16 : vector<1x512xf32>
    %c0_9 = arith.constant 0 : index
    %c0_10 = arith.constant 0 : index
    %18 = vector.load %arg5[%c0_9, %c0_10] : memref<1x512xf32, #tpu.memory_space<vmem>>, vector<1x512xf32>
    tpu.vector_store %arg5[%c0_9, %c0_10], %17 {strides = array<i32>} : memref<1x512xf32, #tpu.memory_space<vmem>>, vector<1x512xf32>,
    %c0_11 = arith.constant 0 : index
    %c0_12 = arith.constant 0 : index
    %19 = vector.load %arg6[%c0_11, %c0_12] : memref<1x512xf32, #tpu.memory_space<vmem>>, vector<1x512xf32>
    %20 = vector.extract_strided_slice %11 {offsets = [1, 0], sizes = [1, 512], strides = [1, 1]} : vector<2x512xf32> to vector<1x512xf32>
    %21 = vector.extract_strided_slice %12 {offsets = [0, 0], sizes = [1, 512], strides = [1, 1]} : vector<2x512xf32> to vector<1x512xf32>
    %22 = arith.addf %20, %21 : vector<1x512xf32>
    %23 = arith.addf %19, %22 : vector<1x512xf32>
    %c0_13 = arith.constant 0 : index
    %c0_14 = arith.constant 0 : index
    %24 = vector.load %arg6[%c0_13, %c0_14] : memref<1x512xf32, #tpu.memory_space<vmem>>, vector<1x512xf32>
    tpu.vector_store %arg6[%c0_13, %c0_14], %23 {strides = array<i32>} : memref<1x512xf32, #tpu.memory_space<vmem>>, vector<1x512xf32>,
    %c0_i32_15 = arith.constant 0 : i32
    %25 = arith.cmpi eq, %arg1, %c0_i32_15 : i32
    %26 = arith.extui %25 : i1 to i32
    %c0_i32_16 = arith.constant 0 : i32
    %27 = arith.cmpi ne, %26, %c0_i32_16 : i32
    scf.if %27 {
      %c0_17 = arith.constant 0 : index
      %c0_18 = arith.constant 0 : index
      %28 = vector.load %arg5[%c0_17, %c0_18] : memref<1x512xf32, #tpu.memory_space<vmem>>, vector<1x512xf32>
      %c0_19 = arith.constant 0 : index
      %c0_20 = arith.constant 0 : index
      %29 = vector.load %arg4[%c0_19, %c0_20] : memref<2x512xf32, #tpu.memory_space<vmem>>, vector<1x512xf32>
      tpu.vector_store %arg4[%c0_19, %c0_20], %28 {strides = array<i32>} : memref<2x512xf32, #tpu.memory_space<vmem>>, vector<1x512xf32>,
      %c0_21 = arith.constant 0 : index
      %c0_22 = arith.constant 0 : index
      %30 = vector.load %arg6[%c0_21, %c0_22] : memref<1x512xf32, #tpu.memory_space<vmem>>, vector<1x512xf32>
      %c1 = arith.constant 1 : index
      %c0_23 = arith.constant 0 : index
      %31 = vector.load %arg4[%c1, %c0_23] : memref<2x512xf32, #tpu.memory_space<vmem>>, vector<1x512xf32>
      tpu.vector_store %arg4[%c1, %c0_23], %30 {strides = array<i32>} : memref<2x512xf32, #tpu.memory_space<vmem>>, vector<1x512xf32>,
    } else {
    }
    return
  }
  func.func @transform_0(%arg0: i32, %arg1: i32) -> (i32, i32) {
    %c0_i32 = arith.constant 0 : i32
    return %arg1, %arg0 : i32, i32
  }
  func.func @transform_1(%arg0: i32, %arg1: i32) -> (i32, i32, i32) {
    %c0_i32 = arith.constant 0 : i32
    %c0_i32_0 = arith.constant 0 : i32
    %c0_i32_1 = arith.constant 0 : i32
    %c0_i32_2 = arith.constant 0 : i32
    return %c0_i32, %c0_i32_0, %c0_i32_1 : i32, i32, i32
  }
  func.func @transform_2(%arg0: i32, %arg1: i32) -> (i32, i32) {
    %c0_i32 = arith.constant 0 : i32
    %c0_i32_0 = arith.constant 0 : i32
    return %c0_i32, %arg0 : i32, i32
  }
}

</mosaic_0001>

<bundles_post_ra>
// kernel: _resolve.1
= control target key start
LH: loop header
LB: loop body
LE: loop exit
PB: predicated region body
PF: predicated region fallthrough
CT: control target
= control target key end

     0   :  { %7 = vsyncpa [#allocation5], 0  ;;  %s6021_s0 = inlined_call_operand.hbm [shape: f32[896,1024], index: 0, kind: input, shape index: {}]   ;;  %s6022_s1 = inlined_call_operand.vmem [shape: f32[1,2,896], index: 1, kind: input, shape index: {}]   ;;  %s6023_s2 = inlined_call_operand.vmem [shape: f32[2,1024], index: 2, kind: output, shape index: {}]  }
   0x1   :  { %9 = vsyncpa [#allocation5 + $0x1], 0  ;;  %s4455_s9 = smov 0   ;;  %s4457_s10 = smov 0  }
   0x2   :  { %s4459_s11 = smov 0   ;;  %s4461_s12 = smov 0  }
   0x3   :  { %s4463_s13 = smov 0   ;;  %s4465_s14 = smov 0  }
   0x4 LB: > { %s2906_s15 = sadd.s32 4294967295, %s4431_s14   ;;  %s27_s16 = sadd.s32 1, %s4427_s13  ;;  %s4431_s14 = sphi %s4465_s14, %s15_s14   ;;  %s4427_s13 = sphi %s4463_s13, %s6257_s13   ;;  %s4423_s12 = sphi %s4461_s12, %s6256_s12   ;;  %s4419_s11 = sphi %s4459_s11, %s6255_s11   ;;  %s4415_s10 = sphi %s4457_s10, %s6254_s10   ;;  %s4411_s9 = sphi %s4455_s9, %s6253_s9  }
   0x5   : > { %p29_p0 = scmp.ge.s32.totalorder %s27_s16, 2  ;;  %s36_s17 = sadd.s32 1, %s4419_s11 }
   0x6   : > { %p43_p1 = scmp.ne.s32.totalorder %s4419_s11, %s4415_s10  ;;  %p44_p2 = scmp.eq.s32.totalorder %s4431_s14, 0 }
   0x7   : > { %s6259_s16 = smov (%p29_p0, %s27_s16), 0  ;;  %p49_p4 = scmp.ne.s32.totalorder %s4415_s10, %s4411_s9 }
   0x8   : > { %p45_p3 = por %p44_p2, %p43_p1  ;;  %s32_s18 = ssub.s32 %s4427_s13, %s6259_s16 }
   0x9   : > { %p50_p5 = scmp.eq.s32.totalorder %s2906_s15, 0  ;;  %p34_p6 = scmp.eq.s32.totalorder %s32_s18, 0 }
   0xa   : > { %p3847_p8 = scmp.lt.s32.totalorder %s4431_s14, 2  ;;  %s123_s21 = sand.u32 1, %s4419_s11  }
   0xb   : > { %p4494_p7 = por %p50_p5, %p49_p4  ;;  %s2918_s22 = sshll.u32 %s4427_s13, 9 }
   0xc   : > { %s4500_s20 = scalar_select %p34_p6, %s4419_s11, %s36_s17  }
   0xd   : > { %s3839_s23 = smul.u32 3584, %s123_s21  ;;  %s4507_s26 = scalar_lea.hbm %s6021_s0, %s2918_s22 }
   0xe   : > { %p4509_p9 = pnand %p3847_p8, %p45_p3  ;;  %s4516_s30 = scalar_lea.sflag [#allocation5], %s123_s21 }
   0xf   : > { %s127_s28 = scalar_lea.vmem [#allocation4], %s3839_s23  ;;  %s4351_s3 = scalar_lea.hbm %s4507_s26, 57344 }
  0x10   : > { %s137_s29 = sshll.u32 %s127_s28, 4  ;;  %p4352_p11 = scmp.ne.s32.totalorder %s4507_s26, %s4351_s3  ;;  %s4513_s29 = int_to_ptr.vmem [resolvable:$true] %s137_s29 }
  0x11   : > { %p4353_p12 = pneg %p4509_p9  ;;  %s4356_s6 = scalar_lea.hbm %s6021_s0, 114688 }
  0x12   : > { %p4357_p1 = scmp.lt.u32.totalorder %s4507_s26, %s6021_s0  ;;  %p4358_p2 = scmp.lt.u32.totalorder %s4356_s6, %s4351_s3 }
  0x13   : > { %p4354_p13 = pnand %p4353_p12, %p4352_p11  ;;  %p4360_p4 = scmp.lt.u32.totalorder %s4351_s3, %s4507_s26 }
  0x14   : > { %p4359_p3 = por %p4358_p2, %p4357_p1 }
  0x15   : > { %p4355_p0 = pneg %p4354_p13 }
  0x16   : > { %p4361_p5 = por %p4360_p4, %p4359_p3 }
  0x18   : > { %p4362_p6 = pnand %p4361_p5, %p4355_p0 }
  0x1a   : > { %4365 = shalt.err (!%p4362_p6)
}
  0x1b   : > { %s4366_s9 = scalar_lea.vmem %s4513_s29, 57344  ;;  %s4433_s15 = smov [#allocation4]  }
  0x1c   : > { %p4367_p8 = scmp.ne.s32.totalorder %s4513_s29, %s4366_s9  ;;  %s4371_s17 = sshll.u32 %s4433_s15, 4  ;;  %s4372_s17 = int_to_ptr.vmem [resolvable:$false] %s4371_s17 }
  0x1d   : > { %s4373_s18 = scalar_lea.vmem %s4372_s17, 114688  ;;  %p4374_p10 = scmp.lt.s32.totalorder %s4513_s29, %s4372_s17 }
  0x1e   : > { %p4369_p11 = pnand %p4367_p8, %p4353_p12  ;;  %p4375_p1 = scmp.lt.s32.totalorder %s4373_s18, %s4366_s9 }
  0x20   : > { %p4370_p13 = pneg %p4369_p11  ;;  %p4376_p2 = por %p4375_p1, %p4374_p10 }
  0x22   : > { %p4377_p3 = pnand %p4376_p2, %p4370_p13 }
  0x24   : > { %4380 = shalt.err (!%p4377_p3)
}
  0x25   : > { %s4434_s21 = smov 1024   ;;  %s4435_s22 = smov 512  }
  0x26   : > { %s4436_s23 = smov 32   ;;  %p145_p12 = scmp.lt.s32.totalorder %s4431_s14, 3 }
  0x27   : > { %3846 = dma.hbm_to_vmem [thread:$0]  (!%p4509_p9), %s4507_s26, 57344, %s4513_s29, %s4516_s30, %s4434_s21, %s4435_s22, %s4436_s23  }
  0x28   : > { %p6082_p0 = scmp.ge.s32.totalorder %s4431_s14, 1 }
  0x2a   : > { %p146_p4 = pnand %p6082_p0, %p145_p12 }
  0x2c   : > { %149 = sbr.rel (%p146_p4) target bundleno = 759 (0x2f7), region = 28 }
  0x33   : > { %s151_s24 = sand.u32 1, %s4415_s10  }
  0x34   : > { %s3840_s25 = smul.u32 3584, %s151_s24  ;;  %s152_s28 = scalar_lea.sflag [#allocation5], %s151_s24 }
  0x36   : > { %s4548_s3 = scalar_lea.vmem [#allocation4], %s3840_s25 }
  0x37   : > { %4406 = dma.done.wait (%p4494_p7), %s152_s28, 57344  }
  0x38   : > { %4408 = vsyncadd (%p4494_p7), %s152_s28, 4294909952  ;;  %v195_v0 = vld [vmem:[%s4548_s3 + $0x8] sm:$0xff]  ;;  %v197_v2 = vld [vmem:[%s4548_s3 + $0x18] sm:$0xff]  ;;  %s2913_s30 = sshll.u32 %s4423_s12, 2 }
  0x39   : > { %v199_v1 = vld [vmem:[%s4548_s3 + $0x28] sm:$0xff]  ;;  %v643_v3 = vmax.f32 %v195_v0, 0.0  ;;  %v201_v5 = vld [vmem:[%s4548_s3 + $0x38] sm:$0xff]  ;;  %v194_v6 = vld [vmem:[%s4548_s3] sm:$0xff]  ;;  %v645_v7 = vmax.f32 %v197_v2, 0.0  ;;  %p179_p7 = scmp.lt.s32.totalorder %s2913_s30, 7 }
  0x3a   : > { %v647_v4 = vmax.f32 %v199_v1, 0.0  ;;  %v649_v8 = vmax.f32 %v201_v5, 0.0  ;;  %v198_v9 = vld [vmem:[%s4548_s3 + $0x20] sm:$0xff]  ;;  %v196_v10 = vld [vmem:[%s4548_s3 + $0x10] sm:$0xff]  ;;  %v642_v12 = vmax.f32 %v194_v6, 0.0  ;;  %v203_v15 = vld [vmem:[%s4548_s3 + $0x48] sm:$0xff] }
  0x3b   : > { %v646_v13 = vmax.f32 %v198_v9, 0.0  ;;  %v200_v14 = vld [vmem:[%s4548_s3 + $0x30] sm:$0xff]  ;;  %v207_v16 = vld [vmem:[%s4548_s3 + $0x68] sm:$0xff]  ;;  %v644_v18 = vmax.f32 %v196_v10, 0.0  ;;  %v205_v20 = vld [vmem:[%s4548_s3 + $0x58] sm:$0xff]  ;;  %v651_v24 = vmax.f32 %v203_v15, 0.0 }
  0x3c   : > { %v2919_v11 = vpack.c.bf16 %v647_v4, %v643_v3  ;;  %v3143_v17 = vpack.c.bf16 %v649_v8, %v645_v7  ;;  %v648_v19 = vmax.f32 %v200_v14, 0.0  ;;  %v209_v21 = vld [vmem:[%s4548_s3 + $0x78] sm:$0xff]  ;;  %v202_v22 = vld [vmem:[%s4548_s3 + $0x40] sm:$0xff]  ;;  %v204_v26 = vld [vmem:[%s4548_s3 + $0x50] sm:$0xff]  ;;  %v655_v29 = vmax.f32 %v207_v16, 0.0  ;;  %s6261_s30 = smov (!%p179_p7, %s2913_s30), 7 }
  0x3d   : > { %v2921_v23 = vpack.c.bf16 %v646_v13, %v642_v12  ;;  %v206_v25 = vld [vmem:[%s4548_s3 + $0x60] sm:$0xff]  ;;  %v208_v27 = vld [vmem:[%s4548_s3 + $0x70] sm:$0xff]  ;;  %v653_v30 = vmax.f32 %v205_v20, 0.0  ;;  %v657_v31 = vmax.f32 %v209_v21, 0.0  ;;  %v211_v32 = vld [vmem:[%s4548_s3 + $0x88] sm:$0xff]  ;;  %v650_v33 = vmax.f32 %v202_v22, 0.0 }
  0x3e   : > { %2920 = vmatprep.subr.bf16.mxu0 %v2919_v11  ;;  %3144 = vmatprep.subr.bf16.mxu1 %v3143_v17  ;;  %v3145_v28 = vpack.c.bf16 %v648_v19, %v644_v18  ;;  %v654_v34 = vmax.f32 %v206_v25, 0.0  ;;  %v215_v35 = vld [vmem:[%s4548_s3 + $0xa8] sm:$0xff]  ;;  %v213_v36 = vld [vmem:[%s4548_s3 + $0x98] sm:$0xff]  ;;  %v2923_v38 = vpack.c.bf16 %v655_v29, %v651_v24  ;;  %v652_v40 = vmax.f32 %v204_v26, 0.0  ;;  %v210_v42 = vld [vmem:[%s4548_s3 + $0x80] sm:$0xff]  ;;  %s2914_s4 = sshll.u32 %s6261_s30, 1 }
  0x3f   : > { %2922 = vmatpush1.bf16.msra.mxu0 %v2921_v23  ;;  %v217_v37 = vld [vmem:[%s4548_s3 + $0xb8] sm:$0xff]  ;;  %v3147_v39 = vpack.c.bf16 %v657_v31, %v653_v30  ;;  %v656_v41 = vmax.f32 %v208_v27, 0.0  ;;  %v214_v43 = vld [vmem:[%s4548_s3 + $0xa0] sm:$0xff]  ;;  %v659_v45 = vmax.f32 %v211_v32, 0.0  ;;  %v212_v46 = vld [vmem:[%s4548_s3 + $0x90] sm:$0xff]  ;;  %v663_v49 = vmax.f32 %v215_v35, 0.0  ;;  %s182_s6 = scalar_lea.vmem %s6023_s2, %s2914_s4 }
  0x40   : > { %3146 = vmatpush1.bf16.msra.mxu1 %v3145_v28  ;;  %v2925_v44 = vpack.c.bf16 %v654_v34, %v650_v33  ;;  %v216_v47 = vld [vmem:[%s4548_s3 + $0xb0] sm:$0xff]  ;;  %2924 = vmatprep.subr.bf16.mxu0 %v2923_v38  ;;  %v661_v50 = vmax.f32 %v213_v36, 0.0  ;;  %v665_v51 = vmax.f32 %v217_v37, 0.0  ;;  %v219_v52 = vld [vmem:[%s4548_s3 + $0xc8] sm:$0xff]  ;;  %v658_v53 = vmax.f32 %v210_v42, 0.0  ;;  %v221_v56 = vld [vmem:[%s4548_s3 + $0xd8] sm:$0xff] }
  0x41   : > { %3148 = vmatprep.subr.bf16.mxu1 %v3147_v39  ;;  %v3149_v48 = vpack.c.bf16 %v656_v41, %v652_v40  ;;  %v662_v54 = vmax.f32 %v214_v43, 0.0  ;;  %v223_v55 = vld [vmem:[%s4548_s3 + $0xe8] sm:$0xff]  ;;  %v225_v57 = vld [vmem:[%s4548_s3 + $0xf8] sm:$0xff]  ;;  %v2927_v58 = vpack.c.bf16 %v663_v49, %v659_v45  ;;  %v660_v60 = vmax.f32 %v212_v46, 0.0  ;;  %v218_v62 = vld [vmem:[%s4548_s3 + $0xc0] sm:$0xff] }
  0x42   : > { %v3151_v59 = vpack.c.bf16 %v665_v51, %v661_v50  ;;  %v664_v61 = vmax.f32 %v216_v47, 0.0  ;;  %v222_v63 = vld [vmem:[%s4548_s3 + $0xe0] sm:$0xff]  ;;  %v667_v1 = vmax.f32 %v219_v52, 0.0  ;;  %v220_v2 = vld [vmem:[%s4548_s3 + $0xd0] sm:$0xff]  ;;  %v671_v5 = vmax.f32 %v223_v55, 0.0  ;;  %v227_v8 = vld [vmem:[%s4548_s3 + $0x108] sm:$0xff] }
  0x43   : > { %2926 = vmatpush1.bf16.msra.mxu0 %v2925_v44  ;;  %v2929_v0 = vpack.c.bf16 %v662_v54, %v658_v53  ;;  %v224_v3 = vld [vmem:[%s4548_s3 + $0xf0] sm:$0xff]  ;;  %v669_v6 = vmax.f32 %v221_v56, 0.0  ;;  %v673_v7 = vmax.f32 %v225_v57, 0.0  ;;  %v666_v9 = vmax.f32 %v218_v62, 0.0  ;;  %v231_v11 = vld [vmem:[%s4548_s3 + $0x128] sm:$0xff]  ;;  %v229_v12 = vld [vmem:[%s4548_s3 + $0x118] sm:$0xff] }
  0x44   : > { %3150 = vmatpush1.bf16.msra.mxu1 %v3149_v48  ;;  %2928 = vmatprep.subr.bf16.mxu0 %v2927_v58  ;;  %v3153_v4 = vpack.c.bf16 %v664_v61, %v660_v60  ;;  %v670_v10 = vmax.f32 %v222_v63, 0.0  ;;  %v233_v13 = vld [vmem:[%s4548_s3 + $0x138] sm:$0xff]  ;;  %v2931_v14 = vpack.c.bf16 %v671_v5, %v667_v1  ;;  %v668_v16 = vmax.f32 %v220_v2, 0.0  ;;  %v226_v18 = vld [vmem:[%s4548_s3 + $0x100] sm:$0xff]  ;;  %v228_v22 = vld [vmem:[%s4548_s3 + $0x110] sm:$0xff] }
  0x45   : > { %3152 = vmatprep.subr.bf16.mxu1 %v3151_v59  ;;  %v3155_v15 = vpack.c.bf16 %v673_v7, %v669_v6  ;;  %v672_v17 = vmax.f32 %v224_v3, 0.0  ;;  %v230_v19 = vld [vmem:[%s4548_s3 + $0x120] sm:$0xff]  ;;  %v675_v21 = vmax.f32 %v227_v8, 0.0  ;;  %v232_v23 = vld [vmem:[%s4548_s3 + $0x130] sm:$0xff]  ;;  %v679_v25 = vmax.f32 %v231_v11, 0.0  ;;  %v235_v28 = vld [vmem:[%s4548_s3 + $0x148] sm:$0xff] }
  0x46   : > { %v2933_v20 = vpack.c.bf16 %v670_v10, %v666_v9  ;;  %v677_v26 = vmax.f32 %v229_v12, 0.0  ;;  %v681_v27 = vmax.f32 %v233_v13, 0.0  ;;  %v674_v29 = vmax.f32 %v226_v18, 0.0  ;;  %v239_v31 = vld [vmem:[%s4548_s3 + $0x168] sm:$0xff]  ;;  %v237_v32 = vld [vmem:[%s4548_s3 + $0x158] sm:$0xff]  ;;  %v234_v38 = vld [vmem:[%s4548_s3 + $0x140] sm:$0xff] }
  0x47   : > { %2930 = vmatpush1.bf16.msra.mxu0 %v2929_v0  ;;  %v3157_v24 = vpack.c.bf16 %v672_v17, %v668_v16  ;;  %v678_v30 = vmax.f32 %v230_v19, 0.0  ;;  %v241_v33 = vld [vmem:[%s4548_s3 + $0x178] sm:$0xff]  ;;  %v2935_v34 = vpack.c.bf16 %v679_v25, %v675_v21  ;;  %v676_v36 = vmax.f32 %v228_v22, 0.0  ;;  %v238_v39 = vld [vmem:[%s4548_s3 + $0x160] sm:$0xff]  ;;  %v236_v42 = vld [vmem:[%s4548_s3 + $0x150] sm:$0xff] }
  0x48   : > { %3154 = vmatpush1.bf16.msra.mxu1 %v3153_v4  ;;  %2932 = vmatprep.subr.bf16.mxu0 %v2931_v14  ;;  %v3159_v35 = vpack.c.bf16 %v681_v27, %v677_v26  ;;  %v680_v37 = vmax.f32 %v232_v23, 0.0  ;;  %v683_v41 = vmax.f32 %v235_v28, 0.0  ;;  %v240_v43 = vld [vmem:[%s4548_s3 + $0x170] sm:$0xff]  ;;  %v687_v45 = vmax.f32 %v239_v31, 0.0  ;;  %v243_v48 = vld [vmem:[%s4548_s3 + $0x188] sm:$0xff]  ;;  %v245_v52 = vld [vmem:[%s4548_s3 + $0x198] sm:$0xff] }
  0x49   : > { %3156 = vmatprep.subr.bf16.mxu1 %v3155_v15  ;;  %v2937_v40 = vpack.c.bf16 %v678_v30, %v674_v29  ;;  %v685_v46 = vmax.f32 %v237_v32, 0.0  ;;  %v689_v47 = vmax.f32 %v241_v33, 0.0  ;;  %v682_v49 = vmax.f32 %v234_v38, 0.0  ;;  %v247_v51 = vld [vmem:[%s4548_s3 + $0x1a8] sm:$0xff]  ;;  %v249_v53 = vld [vmem:[%s4548_s3 + $0x1b8] sm:$0xff]  ;;  %v242_v58 = vld [vmem:[%s4548_s3 + $0x180] sm:$0xff] }
  0x4a   : > { %v3161_v44 = vpack.c.bf16 %v680_v37, %v676_v36  ;;  %v686_v50 = vmax.f32 %v238_v39, 0.0  ;;  %v2939_v54 = vpack.c.bf16 %v687_v45, %v683_v41  ;;  %v684_v56 = vmax.f32 %v236_v42, 0.0  ;;  %v246_v59 = vld [vmem:[%s4548_s3 + $0x1a0] sm:$0xff]  ;;  %v244_v62 = vld [vmem:[%s4548_s3 + $0x190] sm:$0xff]  ;;  %v251_v4 = vld [vmem:[%s4548_s3 + $0x1c8] sm:$0xff] }
  0x4b   : > { %2934 = vmatpush1.bf16.msra.mxu0 %v2933_v20  ;;  %v3163_v55 = vpack.c.bf16 %v689_v47, %v685_v46  ;;  %v688_v57 = vmax.f32 %v240_v43, 0.0  ;;  %v691_v61 = vmax.f32 %v243_v48, 0.0  ;;  %v248_v63 = vld [vmem:[%s4548_s3 + $0x1b0] sm:$0xff]  ;;  %v695_v1 = vmax.f32 %v247_v51, 0.0  ;;  %v255_v7 = vld [vmem:[%s4548_s3 + $0x1e8] sm:$0xff]  ;;  %v253_v8 = vld [vmem:[%s4548_s3 + $0x1d8] sm:$0xff] }
  0x4c   : > { %3158 = vmatpush1.bf16.msra.mxu1 %v3157_v24  ;;  %2936 = vmatprep.subr.bf16.mxu0 %v2935_v34  ;;  %v2941_v60 = vpack.c.bf16 %v686_v50, %v682_v49  ;;  %v693_v2 = vmax.f32 %v245_v52, 0.0  ;;  %v697_v3 = vmax.f32 %v249_v53, 0.0  ;;  %v690_v5 = vmax.f32 %v242_v58, 0.0  ;;  %v257_v9 = vld [vmem:[%s4548_s3 + $0x1f8] sm:$0xff]  ;;  %v250_v14 = vld [vmem:[%s4548_s3 + $0x1c0] sm:$0xff]  ;;  %v252_v18 = vld [vmem:[%s4548_s3 + $0x1d0] sm:$0xff] }
  0x4d   : > { %3160 = vmatprep.subr.bf16.mxu1 %v3159_v35  ;;  %v3165_v0 = vpack.c.bf16 %v688_v57, %v684_v56  ;;  %v694_v6 = vmax.f32 %v246_v59, 0.0  ;;  %v2943_v10 = vpack.c.bf16 %v695_v1, %v691_v61  ;;  %v692_v12 = vmax.f32 %v244_v62, 0.0  ;;  %v254_v15 = vld [vmem:[%s4548_s3 + $0x1e0] sm:$0xff]  ;;  %v256_v19 = vld [vmem:[%s4548_s3 + $0x1f0] sm:$0xff]  ;;  %v259_v24 = vld [vmem:[%s4548_s3 + $0x208] sm:$0xff] }
  0x4e   : > { %v3167_v11 = vpack.c.bf16 %v697_v3, %v693_v2  ;;  %v696_v13 = vmax.f32 %v248_v63, 0.0  ;;  %v699_v17 = vmax.f32 %v251_v4, 0.0  ;;  %v703_v21 = vmax.f32 %v255_v7, 0.0  ;;  %v263_v27 = vld [vmem:[%s4548_s3 + $0x228] sm:$0xff]  ;;  %v261_v28 = vld [vmem:[%s4548_s3 + $0x218] sm:$0xff]  ;;  %v258_v34 = vld [vmem:[%s4548_s3 + $0x200] sm:$0xff] }
  0x4f   : > { %2938 = vmatpush1.bf16.msra.mxu0 %v2937_v40  ;;  %v2945_v16 = vpack.c.bf16 %v694_v6, %v690_v5  ;;  %v701_v22 = vmax.f32 %v253_v8, 0.0  ;;  %v705_v23 = vmax.f32 %v257_v9, 0.0  ;;  %v698_v25 = vmax.f32 %v250_v14, 0.0  ;;  %v265_v29 = vld [vmem:[%s4548_s3 + $0x238] sm:$0xff]  ;;  %v262_v35 = vld [vmem:[%s4548_s3 + $0x220] sm:$0xff]  ;;  %v260_v38 = vld [vmem:[%s4548_s3 + $0x210] sm:$0xff] }
  0x50   : > { %3162 = vmatpush1.bf16.msra.mxu1 %v3161_v44  ;;  %2940 = vmatprep.subr.bf16.mxu0 %v2939_v54  ;;  %v3169_v20 = vpack.c.bf16 %v696_v13, %v692_v12  ;;  %v702_v26 = vmax.f32 %v254_v15, 0.0  ;;  %v2947_v30 = vpack.c.bf16 %v703_v21, %v699_v17  ;;  %v700_v32 = vmax.f32 %v252_v18, 0.0  ;;  %v264_v39 = vld [vmem:[%s4548_s3 + $0x230] sm:$0xff]  ;;  %v267_v44 = vld [vmem:[%s4548_s3 + $0x248] sm:$0xff]  ;;  %v269_v48 = vld [vmem:[%s4548_s3 + $0x258] sm:$0xff] }
  0x51   : > { %3164 = vmatprep.subr.bf16.mxu1 %v3163_v55  ;;  %v3171_v31 = vpack.c.bf16 %v705_v23, %v701_v22  ;;  %v704_v33 = vmax.f32 %v256_v19, 0.0  ;;  %v707_v37 = vmax.f32 %v259_v24, 0.0  ;;  %v711_v41 = vmax.f32 %v263_v27, 0.0  ;;  %v271_v47 = vld [vmem:[%s4548_s3 + $0x268] sm:$0xff]  ;;  %v273_v49 = vld [vmem:[%s4548_s3 + $0x278] sm:$0xff]  ;;  %v266_v54 = vld [vmem:[%s4548_s3 + $0x240] sm:$0xff] }
  0x52   : > { %v2949_v36 = vpack.c.bf16 %v702_v26, %v698_v25  ;;  %v709_v42 = vmax.f32 %v261_v28, 0.0  ;;  %v713_v43 = vmax.f32 %v265_v29, 0.0  ;;  %v706_v45 = vmax.f32 %v258_v34, 0.0  ;;  %v270_v55 = vld [vmem:[%s4548_s3 + $0x260] sm:$0xff]  ;;  %v268_v58 = vld [vmem:[%s4548_s3 + $0x250] sm:$0xff]  ;;  %v279_v3 = vld [vmem:[%s4548_s3 + $0x2a8] sm:$0xff] }
  0x53   : > { %2942 = vmatpush1.bf16.msra.mxu0 %v2941_v60  ;;  %v3173_v40 = vpack.c.bf16 %v704_v33, %v700_v32  ;;  %v710_v46 = vmax.f32 %v262_v35, 0.0  ;;  %v2951_v50 = vpack.c.bf16 %v711_v41, %v707_v37  ;;  %v708_v52 = vmax.f32 %v260_v38, 0.0  ;;  %v272_v59 = vld [vmem:[%s4548_s3 + $0x270] sm:$0xff]  ;;  %v277_v4 = vld [vmem:[%s4548_s3 + $0x298] sm:$0xff]  ;;  %v287_v23 = vld [vmem:[%s4548_s3 + $0x2e8] sm:$0xff] }
  0x54   : > { %3166 = vmatpush1.bf16.msra.mxu1 %v3165_v0  ;;  %2944 = vmatprep.subr.bf16.mxu0 %v2943_v10  ;;  %v3175_v51 = vpack.c.bf16 %v713_v43, %v709_v42  ;;  %v712_v53 = vmax.f32 %v264_v39, 0.0  ;;  %v715_v57 = vmax.f32 %v267_v44, 0.0  ;;  %v719_v61 = vmax.f32 %v271_v47, 0.0  ;;  %v275_v0 = vld [vmem:[%s4548_s3 + $0x288] sm:$0xff]  ;;  %v281_v5 = vld [vmem:[%s4548_s3 + $0x2b8] sm:$0xff]  ;;  %v274_v10 = vld [vmem:[%s4548_s3 + $0x280] sm:$0xff] }
  0x55   : > { %3168 = vmatprep.subr.bf16.mxu1 %v3167_v11  ;;  %v2953_v56 = vpack.c.bf16 %v710_v46, %v706_v45  ;;  %v717_v62 = vmax.f32 %v269_v48, 0.0  ;;  %v721_v63 = vmax.f32 %v273_v49, 0.0  ;;  %v714_v1 = vmax.f32 %v266_v54, 0.0  ;;  %v278_v11 = vld [vmem:[%s4548_s3 + $0x2a0] sm:$0xff]  ;;  %v276_v14 = vld [vmem:[%s4548_s3 + $0x290] sm:$0xff]  ;;  %v285_v24 = vld [vmem:[%s4548_s3 + $0x2d8] sm:$0xff] }
  0x56   : > { %v3177_v60 = vpack.c.bf16 %v712_v53, %v708_v52  ;;  %v718_v2 = vmax.f32 %v270_v55, 0.0  ;;  %v2955_v6 = vpack.c.bf16 %v719_v61, %v715_v57  ;;  %v716_v8 = vmax.f32 %v268_v58, 0.0  ;;  %v280_v15 = vld [vmem:[%s4548_s3 + $0x2b0] sm:$0xff]  ;;  %v289_v25 = vld [vmem:[%s4548_s3 + $0x2f8] sm:$0xff]  ;;  %v295_v43 = vld [vmem:[%s4548_s3 + $0x328] sm:$0xff] }
  0x57   : > { %2946 = vmatpush1.bf16.msra.mxu0 %v2945_v16  ;;  %v3179_v7 = vpack.c.bf16 %v721_v63, %v717_v62  ;;  %v720_v9 = vmax.f32 %v272_v59, 0.0  ;;  %v723_v13 = vmax.f32 %v275_v0, 0.0  ;;  %v727_v17 = vmax.f32 %v279_v3, 0.0  ;;  %v284_v34 = vld [vmem:[%s4548_s3 + $0x2d0] sm:$0xff]  ;;  %v293_v44 = vld [vmem:[%s4548_s3 + $0x318] sm:$0xff]  ;;  %v303_v63 = vld [vmem:[%s4548_s3 + $0x368] sm:$0xff] }
  0x58   : > { %3170 = vmatpush1.bf16.msra.mxu1 %v3169_v20  ;;  %2948 = vmatprep.subr.bf16.mxu0 %v2947_v30  ;;  %v2957_v12 = vpack.c.bf16 %v718_v2, %v714_v1  ;;  %v725_v18 = vmax.f32 %v277_v4, 0.0  ;;  %v729_v19 = vmax.f32 %v281_v5, 0.0  ;;  %v283_v20 = vld [vmem:[%s4548_s3 + $0x2c8] sm:$0xff]  ;;  %v722_v21 = vmax.f32 %v274_v10, 0.0  ;;  %v282_v30 = vld [vmem:[%s4548_s3 + $0x2c0] sm:$0xff]  ;;  %v288_v35 = vld [vmem:[%s4548_s3 + $0x2f0] sm:$0xff] }
  0x59   : > { %3172 = vmatprep.subr.bf16.mxu1 %v3171_v31  ;;  %v3181_v16 = vpack.c.bf16 %v720_v9, %v716_v8  ;;  %v726_v22 = vmax.f32 %v278_v11, 0.0  ;;  %v2959_v26 = vpack.c.bf16 %v727_v17, %v723_v13  ;;  %v724_v28 = vmax.f32 %v276_v14, 0.0  ;;  %v286_v31 = vld [vmem:[%s4548_s3 + $0x2e0] sm:$0xff]  ;;  %v297_v45 = vld [vmem:[%s4548_s3 + $0x338] sm:$0xff]  ;;  %v292_v54 = vld [vmem:[%s4548_s3 + $0x310] sm:$0xff] }
  0x5a   : > { %v3183_v27 = vpack.c.bf16 %v729_v19, %v725_v18  ;;  %v728_v29 = vmax.f32 %v280_v15, 0.0  ;;  %v731_v33 = vmax.f32 %v283_v20, 0.0  ;;  %v735_v37 = vmax.f32 %v287_v23, 0.0  ;;  %v296_v55 = vld [vmem:[%s4548_s3 + $0x330] sm:$0xff]  ;;  %v301_v0 = vld [vmem:[%s4548_s3 + $0x358] sm:$0xff]  ;;  %v307_v19 = vld [vmem:[%s4548_s3 + $0x388] sm:$0xff] }
  0x5b   : > { %2950 = vmatpush1.bf16.msra.mxu0 %v2949_v36  ;;  %v2961_v32 = vpack.c.bf16 %v726_v22, %v722_v21  ;;  %v733_v38 = vmax.f32 %v285_v24, 0.0  ;;  %v737_v39 = vmax.f32 %v289_v25, 0.0  ;;  %v730_v41 = vmax.f32 %v282_v30, 0.0  ;;  %v305_v1 = vld [vmem:[%s4548_s3 + $0x378] sm:$0xff]  ;;  %v300_v10 = vld [vmem:[%s4548_s3 + $0x350] sm:$0xff]  ;;  %v311_v22 = vld [vmem:[%s4548_s3 + $0x3a8] sm:$0xff] }
  0x5c   : > { %3174 = vmatpush1.bf16.msra.mxu1 %v3173_v40  ;;  %2952 = vmatprep.subr.bf16.mxu0 %v2951_v50  ;;  %v3185_v36 = vpack.c.bf16 %v728_v29, %v724_v28  ;;  %v291_v40 = vld [vmem:[%s4548_s3 + $0x308] sm:$0xff]  ;;  %v734_v42 = vmax.f32 %v286_v31, 0.0  ;;  %v2963_v46 = vpack.c.bf16 %v735_v37, %v731_v33  ;;  %v732_v48 = vmax.f32 %v284_v34, 0.0  ;;  %v290_v50 = vld [vmem:[%s4548_s3 + $0x300] sm:$0xff]  ;;  %v304_v11 = vld [vmem:[%s4548_s3 + $0x370] sm:$0xff] }
  0x5d   : > { %3176 = vmatprep.subr.bf16.mxu1 %v3175_v51  ;;  %v3187_v47 = vpack.c.bf16 %v737_v39, %v733_v38  ;;  %v736_v49 = vmax.f32 %v288_v35, 0.0  ;;  %v294_v51 = vld [vmem:[%s4548_s3 + $0x320] sm:$0xff]  ;;  %v739_v53 = vmax.f32 %v291_v40, 0.0  ;;  %v743_v57 = vmax.f32 %v295_v43, 0.0  ;;  %v309_v23 = vld [vmem:[%s4548_s3 + $0x398] sm:$0xff]  ;;  %v308_v33 = vld [vmem:[%s4548_s3 + $0x390] sm:$0xff] }
  0x5e   : > { %v2965_v52 = vpack.c.bf16 %v734_v42, %v730_v41  ;;  %v741_v58 = vmax.f32 %v293_v44, 0.0  ;;  %v745_v59 = vmax.f32 %v297_v45, 0.0  ;;  %v738_v61 = vmax.f32 %v290_v50, 0.0  ;;  %v313_v24 = vld [vmem:[%s4548_s3 + $0x3b8] sm:$0xff]  ;;  %v306_v29 = vld [vmem:[%s4548_s3 + $0x380] sm:$0xff]  ;;  %v312_v34 = vld [vmem:[%s4548_s3 + $0x3b0] sm:$0xff] }
  0x5f   : > { %2954 = vmatpush1.bf16.msra.mxu0 %v2953_v56  ;;  %v3189_v56 = vpack.c.bf16 %v736_v49, %v732_v48  ;;  %v742_v62 = vmax.f32 %v294_v51, 0.0  ;;  %v2967_v2 = vpack.c.bf16 %v743_v57, %v739_v53  ;;  %v740_v4 = vmax.f32 %v292_v54, 0.0  ;;  %v310_v30 = vld [vmem:[%s4548_s3 + $0x3a0] sm:$0xff]  ;;  %v315_v41 = vld [vmem:[%s4548_s3 + $0x3c8] sm:$0xff]  ;;  %v317_v45 = vld [vmem:[%s4548_s3 + $0x3d8] sm:$0xff] }
  0x60   : > { %3178 = vmatpush1.bf16.msra.mxu1 %v3177_v60  ;;  %2956 = vmatprep.subr.bf16.mxu0 %v2955_v6  ;;  %v299_v60 = vld [vmem:[%s4548_s3 + $0x348] sm:$0xff]  ;;  %v3191_v3 = vpack.c.bf16 %v745_v59, %v741_v58  ;;  %v744_v5 = vmax.f32 %v296_v55, 0.0  ;;  %v298_v6 = vld [vmem:[%s4548_s3 + $0x340] sm:$0xff]  ;;  %v4437_v13 = vmov 1983009808   ;;  %v749_v17 = vmax.f32 %v301_v0, 0.0 }
  0x61   : > { %3180 = vmatprep.subr.bf16.mxu1 %v3179_v7  ;;  %v302_v7 = vld [vmem:[%s4548_s3 + $0x360] sm:$0xff]  ;;  %v2969_v8 = vpack.c.bf16 %v742_v62, %v738_v61  ;;  %v747_v9 = vmax.f32 %v299_v60, 0.0  ;;  %v1547_v14 = vunpack.c.l.s4 %v4437_v13  ;;  %v753_v18 = vmax.f32 %v305_v1, 0.0  ;;  %v319_v44 = vld [vmem:[%s4548_s3 + $0x3e8] sm:$0xff]  ;;  %v316_v55 = vld [vmem:[%s4548_s3 + $0x3d0] sm:$0xff] }
  0x62   : > { %v3193_v15 = vpack.c.bf16 %v744_v5, %v740_v4  ;;  %v746_v20 = vmax.f32 %v298_v6, 0.0  ;;  %v750_v21 = vmax.f32 %v302_v7, 0.0  ;;  %v752_v28 = vmax.f32 %v304_v11, 0.0  ;;  %v314_v51 = vld [vmem:[%s4548_s3 + $0x3c0] sm:$0xff]  ;;  %v4691_v62 = vld [vmem:[%s6022_s1] sm:$0xff]  ;;  %v323_v1 = vld [vmem:[%s4548_s3 + $0x408] sm:$0xff] }
  0x63   : > { %2958 = vmatpush1.bf16.msra.mxu0 %v2957_v12  ;;  %v6024_v12 = vlaneseq  ;;  %v1548_v35 = vunpack.c.0.s8 %v1547_v14  ;;  %v759_v38 = vmax.f32 %v311_v22, 0.0  ;;  %v757_v39 = vmax.f32 %v309_v23, 0.0  ;;  %v324_v14 = vld [vmem:[%s4548_s3 + $0x410] sm:$0xff]  ;;  %v333_v22 = vld [vmem:[%s4548_s3 + $0x458] sm:$0xff] }
  0x64   : > { %3182 = vmatpush1.bf16.msra.mxu1 %v3181_v16  ;;  %2960 = vmatprep.subr.bf16.mxu0 %v2959_v26  ;;  %v751_v16 = vmax.f32 %v303_v63, 0.0  ;;  %v3195_v26 = vpack.c.bf16 %v753_v18, %v749_v17  ;;  %v2973_v31 = vpack.c.bf16 %v750_v21, %v746_v20  ;;  %v761_v40 = vmax.f32 %v313_v24, 0.0  ;;  %v335_v21 = vld [vmem:[%s4548_s3 + $0x468] sm:$0xff] }
  0x65   : > { %3184 = vmatprep.subr.bf16.mxu1 %v3183_v27  ;;  %v748_v27 = vmax.f32 %v300_v10, 0.0  ;;  %v754_v42 = vmax.f32 %v306_v29, 0.0  ;;  %v758_v43 = vmax.f32 %v310_v30, 0.0  ;;  %v756_v49 = vmax.f32 %v308_v33, 0.0  ;;  %v326_v10 = vld [vmem:[%s4548_s3 + $0x420] sm:$0xff] }
  0x66   : > { %v2971_v25 = vpack.c.bf16 %v751_v16, %v747_v9  ;;  %v3199_v48 = vpack.c.bf16 %v761_v40, %v757_v39  ;;  %v760_v50 = vmax.f32 %v312_v34, 0.0  ;;  %v763_v54 = vmax.f32 %v315_v41, 0.0  ;;  %v322_v9 = vld [vmem:[%s4548_s3 + $0x400] sm:$0xff]  ;;  %v331_v16 = vld [vmem:[%s4548_s3 + $0x448] sm:$0xff]  ;;  %v332_v34 = vld [vmem:[%s4548_s3 + $0x450] sm:$0xff] }
  0x67   : > { %2962 = vmatpush1.bf16.msra.mxu0 %v2961_v32  ;;  %v755_v32 = vmax.f32 %v307_v19, 0.0  ;;  %v3197_v37 = vpack.c.bf16 %v752_v28, %v748_v27  ;;  %v2977_v53 = vpack.c.bf16 %v758_v43, %v754_v42  ;;  %v767_v59 = vmax.f32 %v319_v44, 0.0  ;;  %v337_v27 = vld [vmem:[%s4548_s3 + $0x478] sm:$0xff]  ;;  %v330_v28 = vld [vmem:[%s4548_s3 + $0x440] sm:$0xff]  ;;  %v343_v42 = vld [vmem:[%s4548_s3 + $0x4a8] sm:$0xff] }
  0x68   : > { %3186 = vmatpush1.bf16.msra.mxu1 %v3185_v36  ;;  %2964 = vmatprep.subr.bf16.mxu0 %v2963_v46  ;;  %v4675_v36 = vshrl.u32 %v6024_v12, 7  ;;  %v321_v46 = vld [vmem:[%s4548_s3 + $0x3f8] sm:$0xff]  ;;  %v3201_v58 = vpack.c.bf16 %v760_v50, %v756_v49  ;;  %v765_v60 = vmax.f32 %v317_v45, 0.0  ;;  %v762_v63 = vmax.f32 %v314_v51, 0.0  ;;  %v334_v29 = vld [vmem:[%s4548_s3 + $0x460] sm:$0xff]  ;;  %v491_v12 = vld [vmem:[%s4548_s3 + $0x948] sm:$0xff] }
  0x69   : > { %3188 = vmatprep.subr.bf16.mxu1 %v3187_v47  ;;  %v2975_v47 = vpack.c.bf16 %v759_v38, %v755_v32  ;;  %v769_v61 = vmax.f32 %v321_v46, 0.0  ;;  %v2979_v4 = vpack.c.bf16 %v767_v59, %v763_v54  ;;  %v764_v6 = vmax.f32 %v316_v55, 0.0  ;;  %v341_v43 = vld [vmem:[%s4548_s3 + $0x498] sm:$0xff]  ;;  %v338_v49 = vld [vmem:[%s4548_s3 + $0x480] sm:$0xff]  ;;  %v340_v55 = vld [vmem:[%s4548_s3 + $0x490] sm:$0xff] }
  0x6a   : > { %6083 = vst [vmem:[#allocation7_spill] sm:$0xff] %v4675_v36  ;;  %v4686_v57 = vsub.s32 %v1548_v35, %v4675_v36  ;;  %v771_v18 = vmax.f32 %v323_v1, 0.0  ;;  %v779_v33 = vmax.f32 %v331_v16, 0.0  ;;  %v336_v35 = vld [vmem:[%s4548_s3 + $0x470] sm:$0xff]  ;;  %v783_v40 = vmax.f32 %v335_v21, 0.0  ;;  %v342_v50 = vld [vmem:[%s4548_s3 + $0x4a0] sm:$0xff] }
  0x6b   : > { %2966 = vmatpush1.bf16.msra.mxu0 %v2965_v52  ;;  %v318_v52 = vld [vmem:[%s4548_s3 + $0x3e0] sm:$0xff]  ;;  %v3203_v5 = vpack.c.bf16 %v769_v61, %v765_v60  ;;  %v781_v41 = vmax.f32 %v333_v22, 0.0  ;;  %v785_v45 = vmax.f32 %v337_v27, 0.0  ;;  %v778_v46 = vmax.f32 %v330_v28, 0.0  ;;  %v349_v1 = vld [vmem:[%s4548_s3 + $0x4d8] sm:$0xff]  ;;  %v352_v16 = vld [vmem:[%s4548_s3 + $0x4f0] sm:$0xff] }
  0x6c   : > { %3190 = vmatpush1.bf16.msra.mxu1 %v3189_v56  ;;  %2968 = vmatprep.subr.bf16.mxu0 %v2967_v2  ;;  %v320_v56 = vld [vmem:[%s4548_s3 + $0x3f0] sm:$0xff]  ;;  %6084 = vst [vmem:[#allocation8_spill] sm:$0xff] %v4686_v57  ;;  %v766_v0 = vmax.f32 %v318_v52, 0.0  ;;  %v327_v2 = vld [vmem:[%s4548_s3 + $0x428] sm:$0xff]  ;;  %v4701_v13 = vrot.slane %v4691_v62, %v4686_v57  ;;  %v2987_v51 = vpack.c.bf16 %v783_v40, %v779_v33  ;;  %v780_v52 = vmax.f32 %v332_v34, 0.0 }
  0x6d   : > { %3192 = vmatprep.subr.bf16.mxu1 %v3191_v3  ;;  %v325_v3 = vld [vmem:[%s4548_s3 + $0x418] sm:$0xff]  ;;  %v768_v7 = vmax.f32 %v320_v56, 0.0  ;;  %v775_v19 = vmax.f32 %v327_v2, 0.0  ;;  %v344_v56 = vld [vmem:[%s4548_s3 + $0x4b0] sm:$0xff]  ;;  %v3211_v59 = vpack.c.bf16 %v785_v45, %v781_v41  ;;  %v791_v61 = vmax.f32 %v343_v42, 0.0  ;;  %v359_v22 = vld [vmem:[%s4548_s3 + $0x528] sm:$0xff] }
  0x6e   : > { %v2981_v11 = vpack.c.bf16 %v766_v0, %v762_v63  ;;  %6085 = vst [vmem:[#allocation9_spill] sm:$0xff] %v4701_v13  ;;  %v773_v20 = vmax.f32 %v325_v3, 0.0  ;;  %v4710_v23 = vcombine.high %v4701_v13, %v4701_v13  ;;  %v789_v63 = vmax.f32 %v341_v43, 0.0  ;;  %v351_v0 = vld [vmem:[%s4548_s3 + $0x4e8] sm:$0xff]  ;;  %v356_v41 = vld [vmem:[%s4548_s3 + $0x510] sm:$0xff] }
  0x6f   : > { %2970 = vmatpush1.bf16.msra.mxu0 %v2969_v8  ;;  %v329_v8 = vld [vmem:[%s4548_s3 + $0x438] sm:$0xff]  ;;  %v3205_v17 = vpack.c.bf16 %v768_v7, %v764_v6  ;;  %v2983_v30 = vpack.c.bf16 %v775_v19, %v771_v18  ;;  %v346_v7 = vld [vmem:[%s4548_s3 + $0x4c0] sm:$0xff]  ;;  %v797_v21 = vmax.f32 %v349_v1, 0.0  ;;  %v800_v34 = vmax.f32 %v352_v16, 0.0  ;;  %v360_v42 = vld [vmem:[%s4548_s3 + $0x530] sm:$0xff] }
  0x70   : > { %3194 = vmatpush1.bf16.msra.mxu1 %v3193_v15  ;;  %2972 = vmatprep.subr.bf16.mxu0 %v2971_v25  ;;  %v328_v15 = vld [vmem:[%s4548_s3 + $0x430] sm:$0xff]  ;;  %6086 = vst [vmem:[#allocation10_spill] sm:$0xff] %v4710_v23  ;;  %v777_v24 = vmax.f32 %v329_v8, 0.0  ;;  %v770_v25 = vmax.f32 %v322_v9, 0.0  ;;  %v353_v6 = vld [vmem:[%s4548_s3 + $0x4f8] sm:$0xff]  ;;  %v350_v8 = vld [vmem:[%s4548_s3 + $0x4e0] sm:$0xff] }
  0x71   : > { %3196 = vmatprep.subr.bf16.mxu1 %v3195_v26  ;;  %v774_v26 = vmax.f32 %v326_v10, 0.0  ;;  %v776_v32 = vmax.f32 %v328_v15, 0.0  ;;  %1649 = vmatprep.mubr.f32.mxu0 %v4710_v23  ;;  %v788_v10 = vmax.f32 %v340_v55, 0.0  ;;  %v348_v15 = vld [vmem:[%s4548_s3 + $0x4d0] sm:$0xff]  ;;  %v794_v27 = vmax.f32 %v346_v7, 0.0  ;;  %v367_v43 = vld [vmem:[%s4548_s3 + $0x568] sm:$0xff] }
  0x72   : > { %1933 = vmatprep.mubr.f32.mxu1 %v4710_v23  ;;  %v3207_v38 = vpack.c.bf16 %v777_v24, %v773_v20  ;;  %v799_v20 = vmax.f32 %v351_v0, 0.0  ;;  %v357_v24 = vld [vmem:[%s4548_s3 + $0x518] sm:$0xff]  ;;  %v798_v28 = vmax.f32 %v350_v8, 0.0  ;;  %v796_v33 = vmax.f32 %v348_v15, 0.0  ;;  %v364_v1 = vld [vmem:[%s4548_s3 + $0x550] sm:$0xff] }
  0x73   : > { %2974 = vmatpush1.bf16.msra.mxu0 %v2973_v31  ;;  %v772_v31 = vmax.f32 %v324_v14, 0.0  ;;  %v2985_v39 = vpack.c.bf16 %v774_v26, %v770_v25  ;;  %v801_v26 = vmax.f32 %v353_v6, 0.0  ;;  %v805_v40 = vmax.f32 %v357_v24, 0.0  ;;  %v373_v6 = vld [vmem:[%s4548_s3 + $0x598] sm:$0xff]  ;;  %v372_v24 = vld [vmem:[%s4548_s3 + $0x590] sm:$0xff] }
  0x74   : > { %3198 = vmatpush1.bf16.msra.mxu1 %v3197_v37  ;;  %2976 = vmatprep.subr.bf16.mxu0 %v2975_v47  ;;  %v339_v37 = vld [vmem:[%s4548_s3 + $0x488] sm:$0xff]  ;;  %v782_v47 = vmax.f32 %v334_v29, 0.0  ;;  %v361_v29 = vld [vmem:[%s4548_s3 + $0x538] sm:$0xff]  ;;  %v804_v55 = vmax.f32 %v356_v41, 0.0  ;;  %v812_v16 = vmax.f32 %v364_v1, 0.0  ;;  %v484_v36 = vld [vmem:[%s4548_s3 + $0x910] sm:$0xff] }
  0x75   : > { %3200 = vmatprep.subr.bf16.mxu1 %v3199_v48  ;;  %v3209_v44 = vpack.c.bf16 %v776_v32, %v772_v31  ;;  %v345_v48 = vld [vmem:[%s4548_s3 + $0x4b8] sm:$0xff]  ;;  %v787_v54 = vmax.f32 %v339_v37, 0.0  ;;  %v358_v31 = vld [vmem:[%s4548_s3 + $0x520] sm:$0xff]  ;;  %v363_v37 = vld [vmem:[%s4548_s3 + $0x548] sm:$0xff]  ;;  %v809_v45 = vmax.f32 %v361_v29, 0.0 }
  0x76   : > { %v2989_v60 = vpack.c.bf16 %v782_v47, %v778_v46  ;;  %v793_v3 = vmax.f32 %v345_v48, 0.0  ;;  %v806_v47 = vmax.f32 %v358_v31, 0.0  ;;  %v365_v48 = vld [vmem:[%s4548_s3 + $0x558] sm:$0xff]  ;;  %v391_v41 = vld [vmem:[%s4548_s3 + $0x628] sm:$0xff]  ;;  %v492_v23 = vld [vmem:[%s4548_s3 + $0x950] sm:$0xff] }
  0x77   : > { %2978 = vmatpush1.bf16.msra.mxu0 %v2977_v53  ;;  %v784_v53 = vmax.f32 %v336_v35, 0.0  ;;  %v2991_v9 = vpack.c.bf16 %v791_v61, %v787_v54  ;;  %v3221_v54 = vpack.c.bf16 %v800_v34, %v796_v33  ;;  %v3223_v61 = vpack.c.bf16 %v809_v45, %v805_v40  ;;  %v377_v7 = vld [vmem:[%s4548_s3 + $0x5b8] sm:$0xff]  ;;  %v378_v34 = vld [vmem:[%s4548_s3 + $0x5c0] sm:$0xff]  ;;  %v387_v40 = vld [vmem:[%s4548_s3 + $0x608] sm:$0xff] }
  0x78   : > { %3202 = vmatpush1.bf16.msra.mxu1 %v3201_v58  ;;  %2980 = vmatprep.subr.bf16.mxu0 %v2979_v4  ;;  %v347_v58 = vld [vmem:[%s4548_s3 + $0x4c8] sm:$0xff]  ;;  %v786_v4 = vmax.f32 %v338_v49, 0.0  ;;  %v3215_v18 = vpack.c.bf16 %v793_v3, %v789_v63  ;;  %v369_v49 = vld [vmem:[%s4548_s3 + $0x578] sm:$0xff]  ;;  %v813_v63 = vmax.f32 %v365_v48, 0.0  ;;  %v380_v45 = vld [vmem:[%s4548_s3 + $0x5d0] sm:$0xff]  ;;  %v826_v48 = vmax.f32 %v378_v34, 0.0 }
  0x79   : > { %3204 = vmatprep.subr.bf16.mxu1 %v3203_v5  ;;  %v3213_v2 = vpack.c.bf16 %v784_v53, %v780_v52  ;;  %v790_v5 = vmax.f32 %v342_v50, 0.0  ;;  %v795_v14 = vmax.f32 %v347_v58, 0.0  ;;  %v362_v52 = vld [vmem:[%s4548_s3 + $0x540] sm:$0xff]  ;;  %v815_v58 = vmax.f32 %v367_v43, 0.0  ;;  %v381_v29 = vld [vmem:[%s4548_s3 + $0x5d8] sm:$0xff] }
  0x7a   : > { %v366_v53 = vld [vmem:[%s4548_s3 + $0x560] sm:$0xff]  ;;  %v817_v0 = vmax.f32 %v369_v49, 0.0  ;;  %v829_v43 = vmax.f32 %v381_v29, 0.0 }
  0x7b   : > { %2982 = vmatpush1.bf16.msra.mxu0 %v2981_v11  ;;  %v792_v11 = vmax.f32 %v344_v56, 0.0  ;;  %v2993_v19 = vpack.c.bf16 %v790_v5, %v786_v4  ;;  %v2995_v32 = vpack.c.bf16 %v799_v20, %v795_v14  ;;  %v808_v56 = vmax.f32 %v360_v42, 0.0  ;;  %v374_v14 = vld [vmem:[%s4548_s3 + $0x5a0] sm:$0xff] }
  0x7c   : > { %3206 = vmatpush1.bf16.msra.mxu1 %v3205_v17  ;;  %2984 = vmatprep.subr.bf16.mxu0 %v2983_v30  ;;  %v355_v17 = vld [vmem:[%s4548_s3 + $0x508] sm:$0xff]  ;;  %v354_v30 = vld [vmem:[%s4548_s3 + $0x500] sm:$0xff]  ;;  %v810_v4 = vmax.f32 %v362_v52, 0.0  ;;  %v814_v5 = vmax.f32 %v366_v53, 0.0  ;;  %v3227_v20 = vpack.c.bf16 %v817_v0, %v813_v63  ;;  %v835_v53 = vmax.f32 %v387_v40, 0.0 }
  0x7d   : > { %3208 = vmatprep.subr.bf16.mxu1 %v3207_v38  ;;  %v3217_v25 = vpack.c.bf16 %v792_v11, %v788_v10  ;;  %v803_v35 = vmax.f32 %v355_v17, 0.0  ;;  %v3219_v38 = vpack.c.bf16 %v801_v26, %v797_v21  ;;  %v802_v46 = vmax.f32 %v354_v30, 0.0  ;;  %v370_v11 = vld [vmem:[%s4548_s3 + $0x580] sm:$0xff]  ;;  %v385_v30 = vld [vmem:[%s4548_s3 + $0x5f8] sm:$0xff]  ;;  %v399_v63 = vld [vmem:[%s4548_s3 + $0x668] sm:$0xff] }
  0x7e   : > { %1650 = vmatmul.mubr.f32.vlgmr.msra.gmra.mrb[0].mxu0 %v4701_v13  ;;  %v3225_v15 = vpack.c.bf16 %v808_v56, %v804_v55  ;;  %v821_v21 = vmax.f32 %v373_v6, 0.0  ;;  %v3005_v26 = vpack.c.bf16 %v814_v5, %v810_v4  ;;  %v386_v55 = vld [vmem:[%s4548_s3 + $0x600] sm:$0xff]  ;;  %v392_v4 = vld [vmem:[%s4548_s3 + $0x630] sm:$0xff] }
  0x7f   : > { %2986 = vmatpush1.bf16.msra.mxu0 %v2985_v39  ;;  %1934 = vmatmul.mubr.f32.vlgmr.msra.gmra.mrb[0].mxu1 %v4701_v13  ;;  %v807_v39 = vmax.f32 %v359_v22, 0.0  ;;  %v3001_v3 = vpack.c.bf16 %v806_v47, %v802_v46  ;;  %v825_v22 = vmax.f32 %v377_v7, 0.0  ;;  %v384_v46 = vld [vmem:[%s4548_s3 + $0x5f0] sm:$0xff]  ;;  %v390_v56 = vld [vmem:[%s4548_s3 + $0x620] sm:$0xff]  ;;  %v834_v6 = vmax.f32 %v386_v55, 0.0  ;;  %v499_v13 = vld [vmem:[%s4548_s3 + $0x988] sm:$0xff] }
  0x80   : > { %3210 = vmatpush1.bf16.msra.mxu1 %v3209_v44  ;;  %2988 = vmatprep.subr.bf16.mxu0 %v2987_v51  ;;  %v2997_v44 = vpack.c.bf16 %v798_v28, %v794_v27  ;;  %v811_v51 = vmax.f32 %v363_v37, 0.0  ;;  %v818_v27 = vmax.f32 %v370_v11, 0.0  ;;  %v822_v28 = vmax.f32 %v374_v14, 0.0 }
  0x81   : > { %3212 = vmatprep.subr.bf16.mxu1 %v3211_v59  ;;  %v2999_v50 = vpack.c.bf16 %v807_v39, %v803_v35  ;;  %v371_v59 = vld [vmem:[%s4548_s3 + $0x588] sm:$0xff]  ;;  %v382_v35 = vld [vmem:[%s4548_s3 + $0x5e0] sm:$0xff]  ;;  %v3231_v42 = vpack.c.bf16 %v825_v22, %v821_v21  ;;  %v838_v7 = vmax.f32 %v390_v56, 0.0  ;;  %v847_v14 = vmax.f32 %v399_v63, 0.0 }
  0x82   : > { %v3003_v8 = vpack.c.bf16 %v815_v58, %v811_v51  ;;  %v3009_v47 = vpack.c.bf16 %v822_v28, %v818_v27  ;;  %v830_v49 = vmax.f32 %v382_v35, 0.0  ;;  %v393_v51 = vld [vmem:[%s4548_s3 + $0x638] sm:$0xff]  ;;  %v407_v21 = vld [vmem:[%s4548_s3 + $0x6a8] sm:$0xff]  ;;  %v400_v27 = vld [vmem:[%s4548_s3 + $0x670] sm:$0xff] }
  0x83   : > { %2990 = vmatpush1.bf16.msra.mxu0 %v2989_v60  ;;  %v375_v60 = vld [vmem:[%s4548_s3 + $0x5a8] sm:$0xff]  ;;  %v3017_v28 = vpack.c.bf16 %v838_v7, %v834_v6  ;;  %v855_v35 = vmax.f32 %v407_v21, 0.0  ;;  %v416_v6 = vld [vmem:[%s4548_s3 + $0x6f0] sm:$0xff] }
  0x84   : > { %2992 = vmatprep.subr.bf16.mxu0 %v2991_v9  ;;  %3214 = vmatpush1.bf16.msra.mxu1 %v3213_v2  ;;  %v368_v2 = vld [vmem:[%s4548_s3 + $0x570] sm:$0xff]  ;;  %v819_v9 = vmax.f32 %v371_v59, 0.0  ;;  %v823_v10 = vmax.f32 %v375_v60, 0.0  ;;  %v828_v59 = vmax.f32 %v380_v45, 0.0  ;;  %v832_v60 = vmax.f32 %v384_v46, 0.0 }
  0x85   : > { %3216 = vmatprep.subr.bf16.mxu1 %v3215_v18  ;;  %v816_v17 = vmax.f32 %v368_v2, 0.0  ;;  %v379_v18 = vld [vmem:[%s4548_s3 + $0x5c8] sm:$0xff]  ;;  %v841_v2 = vmax.f32 %v393_v51, 0.0  ;;  %v3013_v5 = vpack.c.bf16 %v830_v49, %v826_v48  ;;  %v408_v48 = vld [vmem:[%s4548_s3 + $0x6b0] sm:$0xff]  ;;  %v864_v21 = vmax.f32 %v416_v6, 0.0 }
  0x86   : > { %v3007_v31 = vpack.c.bf16 %v823_v10, %v819_v9  ;;  %v401_v9 = vld [vmem:[%s4548_s3 + $0x678] sm:$0xff]  ;;  %v856_v63 = vmax.f32 %v408_v48, 0.0 }
  0x87   : > { %2994 = vmatpush1.bf16.msra.mxu0 %v2993_v19  ;;  %v383_v19 = vld [vmem:[%s4548_s3 + $0x5e8] sm:$0xff]  ;;  %v3229_v37 = vpack.c.bf16 %v816_v17, %v812_v16  ;;  %v398_v16 = vld [vmem:[%s4548_s3 + $0x660] sm:$0xff]  ;;  %v3237_v17 = vpack.c.bf16 %v832_v60, %v828_v59 }
  0x88   : > { %2996 = vmatprep.subr.bf16.mxu0 %v2995_v32  ;;  %3218 = vmatpush1.bf16.msra.mxu1 %v3217_v25  ;;  %v376_v25 = vld [vmem:[%s4548_s3 + $0x5b0] sm:$0xff]  ;;  %v827_v32 = vmax.f32 %v379_v18, 0.0  ;;  %v831_v33 = vmax.f32 %v383_v19, 0.0  ;;  %v840_v19 = vmax.f32 %v392_v4, 0.0  ;;  %v414_v59 = vld [vmem:[%s4548_s3 + $0x6e0] sm:$0xff] }
  0x89   : > { %3220 = vmatprep.subr.bf16.mxu1 %v3219_v38  ;;  %v820_v38 = vmax.f32 %v372_v24, 0.0  ;;  %v824_v39 = vmax.f32 %v376_v25, 0.0  ;;  %v849_v25 = vmax.f32 %v401_v9, 0.0  ;;  %v862_v9 = vmax.f32 %v414_v59, 0.0  ;;  %v428_v59 = vld [vmem:[%s4548_s3 + $0x750] sm:$0xff] }
  0x8a   : > { %v3011_v52 = vpack.c.bf16 %v831_v33, %v827_v32  ;;  %v409_v32 = vld [vmem:[%s4548_s3 + $0x6b8] sm:$0xff] }
  0x8b   : > { %2998 = vmatpush1.bf16.msra.mxu0 %v2997_v44  ;;  %v833_v44 = vmax.f32 %v385_v30, 0.0  ;;  %v3233_v58 = vpack.c.bf16 %v824_v39, %v820_v38  ;;  %v846_v30 = vmax.f32 %v398_v16, 0.0  ;;  %v406_v38 = vld [vmem:[%s4548_s3 + $0x6a0] sm:$0xff]  ;;  %v857_v46 = vmax.f32 %v409_v32, 0.0  ;;  %v4816_v32 = vld [vmem:[%s4548_s3 + $0x28] sm:$0xff] }
  0x8c   : > { %3000 = vmatprep.subr.bf16.mxu0 %v2999_v50  ;;  %3222 = vmatpush1.bf16.msra.mxu1 %v3221_v54  ;;  %v389_v50 = vld [vmem:[%s4548_s3 + $0x618] sm:$0xff]  ;;  %v839_v54 = vmax.f32 %v391_v41, 0.0  ;;  %v848_v41 = vmax.f32 %v400_v27, 0.0  ;;  %v854_v51 = vmax.f32 %v406_v38, 0.0 }
  0x8d   : > { %3224 = vmatprep.subr.bf16.mxu1 %v3223_v61  ;;  %v395_v61 = vld [vmem:[%s4548_s3 + $0x648] sm:$0xff]  ;;  %v3235_v0 = vpack.c.bf16 %v833_v44, %v829_v43  ;;  %v837_v1 = vmax.f32 %v389_v50, 0.0  ;;  %v429_v38 = vld [vmem:[%s4548_s3 + $0x758] sm:$0xff] }
  0x8e   : > { %v3015_v10 = vpack.c.bf16 %v839_v54, %v835_v53  ;;  %v843_v11 = vmax.f32 %v395_v61, 0.0  ;;  %v415_v43 = vld [vmem:[%s4548_s3 + $0x6e8] sm:$0xff]  ;;  %v417_v53 = vld [vmem:[%s4548_s3 + $0x6f8] sm:$0xff] }
  0x8f   : > { %3002 = vmatpush1.bf16.msra.mxu0 %v3001_v3  ;;  %v388_v3 = vld [vmem:[%s4548_s3 + $0x610] sm:$0xff]  ;;  %v3239_v22 = vpack.c.bf16 %v841_v2, %v837_v1  ;;  %v863_v56 = vmax.f32 %v415_v43, 0.0  ;;  %v423_v1 = vld [vmem:[%s4548_s3 + $0x728] sm:$0xff]  ;;  %v865_v4 = vmax.f32 %v417_v53, 0.0  ;;  %v4832_v53 = vld [vmem:[%s4548_s3 + $0x38] sm:$0xff] }
  0x90   : > { %3004 = vmatprep.subr.bf16.mxu0 %v3003_v8  ;;  %3226 = vmatpush1.bf16.msra.mxu1 %v3225_v15  ;;  %v397_v8 = vld [vmem:[%s4548_s3 + $0x658] sm:$0xff]  ;;  %v394_v15 = vld [vmem:[%s4548_s3 + $0x640] sm:$0xff]  ;;  %v836_v18 = vmax.f32 %v388_v3, 0.0  ;;  %v3019_v33 = vpack.c.bf16 %v847_v14, %v843_v11  ;;  %v871_v16 = vmax.f32 %v423_v1, 0.0 }
  0x91   : > { %3228 = vmatprep.subr.bf16.mxu1 %v3227_v20  ;;  %v403_v20 = vld [vmem:[%s4548_s3 + $0x688] sm:$0xff]  ;;  %v845_v24 = vmax.f32 %v397_v8, 0.0  ;;  %v842_v29 = vmax.f32 %v394_v15, 0.0  ;;  %v425_v11 = vld [vmem:[%s4548_s3 + $0x738] sm:$0xff] }
  0x92   : > { %v851_v34 = vmax.f32 %v403_v20, 0.0  ;;  %v3241_v39 = vpack.c.bf16 %v840_v19, %v836_v18  ;;  %v422_v18 = vld [vmem:[%s4548_s3 + $0x720] sm:$0xff]  ;;  %v437_v1 = vld [vmem:[%s4548_s3 + $0x798] sm:$0xff] }
  0x93   : > { %3006 = vmatpush1.bf16.msra.mxu0 %v3005_v26  ;;  %v396_v26 = vld [vmem:[%s4548_s3 + $0x650] sm:$0xff]  ;;  %v3243_v44 = vpack.c.bf16 %v849_v25, %v845_v24  ;;  %v3021_v49 = vpack.c.bf16 %v846_v30, %v842_v29  ;;  %v431_v24 = vld [vmem:[%s4548_s3 + $0x768] sm:$0xff]  ;;  %v873_v29 = vmax.f32 %v425_v11, 0.0  ;;  %v876_v11 = vmax.f32 %v428_v59, 0.0 }
  0x94   : > { %3008 = vmatprep.subr.bf16.mxu0 %v3007_v31  ;;  %3230 = vmatpush1.bf16.msra.mxu1 %v3229_v37  ;;  %v405_v31 = vld [vmem:[%s4548_s3 + $0x698] sm:$0xff]  ;;  %v402_v37 = vld [vmem:[%s4548_s3 + $0x680] sm:$0xff]  ;;  %v844_v40 = vmax.f32 %v396_v26, 0.0  ;;  %v3023_v54 = vpack.c.bf16 %v855_v35, %v851_v34  ;;  %v4810_v25 = vld [vmem:[%s4548_s3 + $0x8] sm:$0xff] }
  0x95   : > { %3232 = vmatprep.subr.bf16.mxu1 %v3231_v42  ;;  %v411_v42 = vld [vmem:[%s4548_s3 + $0x6c8] sm:$0xff]  ;;  %v853_v45 = vmax.f32 %v405_v31, 0.0  ;;  %v850_v50 = vmax.f32 %v402_v37, 0.0  ;;  %v420_v30 = vld [vmem:[%s4548_s3 + $0x710] sm:$0xff]  ;;  %v870_v37 = vmax.f32 %v422_v18, 0.0  ;;  %v4855_v18 = vld [vmem:[%s4548_s3 + $0x20] sm:$0xff] }
  0x96   : > { %v859_v55 = vmax.f32 %v411_v42, 0.0  ;;  %v3245_v60 = vpack.c.bf16 %v848_v41, %v844_v40  ;;  %v424_v31 = vld [vmem:[%s4548_s3 + $0x730] sm:$0xff]  ;;  %v4822_v40 = vld [vmem:[%s4548_s3 + $0x18] sm:$0xff]  ;;  %v868_v48 = vmax.f32 %v420_v30, 0.0  ;;  %v482_v26 = vld [vmem:[%s4548_s3 + $0x900] sm:$0xff] }
  0x97   : > { %3010 = vmatpush1.bf16.msra.mxu0 %v3009_v47  ;;  %v404_v47 = vld [vmem:[%s4548_s3 + $0x690] sm:$0xff]  ;;  %v3247_v2 = vpack.c.bf16 %v857_v46, %v853_v45  ;;  %v3025_v7 = vpack.c.bf16 %v854_v51, %v850_v50  ;;  %v426_v45 = vld [vmem:[%s4548_s3 + $0x740] sm:$0xff]  ;;  %v435_v50 = vld [vmem:[%s4548_s3 + $0x788] sm:$0xff] }
  0x98   : > { %3012 = vmatprep.subr.bf16.mxu0 %v3011_v52  ;;  %3234 = vmatpush1.bf16.msra.mxu1 %v3233_v58  ;;  %v413_v52 = vld [vmem:[%s4548_s3 + $0x6d8] sm:$0xff]  ;;  %v410_v58 = vld [vmem:[%s4548_s3 + $0x6c0] sm:$0xff]  ;;  %v852_v61 = vmax.f32 %v404_v47, 0.0  ;;  %v3027_v14 = vpack.c.bf16 %v863_v56, %v859_v55  ;;  %v439_v51 = vld [vmem:[%s4548_s3 + $0x7a8] sm:$0xff]  ;;  %v877_v56 = vmax.f32 %v429_v38, 0.0  ;;  %v883_v6 = vmax.f32 %v435_v50, 0.0 }
  0x99   : > { %3236 = vmatprep.subr.bf16.mxu1 %v3235_v0  ;;  %v419_v0 = vld [vmem:[%s4548_s3 + $0x708] sm:$0xff]  ;;  %v861_v3 = vmax.f32 %v413_v52, 0.0  ;;  %v858_v8 = vmax.f32 %v410_v58, 0.0  ;;  %v430_v46 = vld [vmem:[%s4548_s3 + $0x760] sm:$0xff]  ;;  %v1545_v52 = vcombine.high %v4691_v62, %v4691_v62  ;;  %v441_v62 = vld [vmem:[%s4548_s3 + $0x7b8] sm:$0xff] }
  0x9a   : > { %v867_v15 = vmax.f32 %v419_v0, 0.0  ;;  %v3249_v19 = vpack.c.bf16 %v856_v63, %v852_v61  ;;  %v874_v63 = vmax.f32 %v426_v45, 0.0  ;;  %v878_v0 = vmax.f32 %v430_v46, 0.0  ;;  %v4868_v38 = vld [vmem:[%s4548_s3 + $0x30] sm:$0xff]  ;;  %v442_v45 = vld [vmem:[%s4548_s3 + $0x7c0] sm:$0xff] }
  0x9b   : > { %3014 = vmatpush1.bf16.msra.mxu0 %v3013_v5  ;;  %v412_v5 = vld [vmem:[%s4548_s3 + $0x6d0] sm:$0xff]  ;;  %v3251_v27 = vpack.c.bf16 %v865_v4, %v861_v3  ;;  %v3029_v34 = vpack.c.bf16 %v862_v9, %v858_v8  ;;  %v4843_v3 = vld [vmem:[%s4548_s3] sm:$0xff]  ;;  %v483_v4 = vld [vmem:[%s4548_s3 + $0x908] sm:$0xff] }
  0x9c   : > { %3016 = vmatprep.subr.bf16.mxu0 %v3015_v10  ;;  %3238 = vmatpush1.bf16.msra.mxu1 %v3237_v17  ;;  %v421_v10 = vld [vmem:[%s4548_s3 + $0x718] sm:$0xff]  ;;  %v418_v17 = vld [vmem:[%s4548_s3 + $0x700] sm:$0xff]  ;;  %v860_v20 = vmax.f32 %v412_v5, 0.0  ;;  %v3031_v42 = vpack.c.bf16 %v871_v16, %v867_v15  ;;  %v443_v15 = vld [vmem:[%s4548_s3 + $0x7c8] sm:$0xff]  ;;  %v3037_v30 = vpack.c.bf16 %v878_v0, %v874_v63 }
  0x9d   : > { %3240 = vmatprep.subr.bf16.mxu1 %v3239_v22  ;;  %v427_v22 = vld [vmem:[%s4548_s3 + $0x748] sm:$0xff]  ;;  %v866_v35 = vmax.f32 %v418_v17, 0.0  ;;  %v434_v8 = vld [vmem:[%s4548_s3 + $0x780] sm:$0xff]  ;;  %v444_v63 = vld [vmem:[%s4548_s3 + $0x7d0] sm:$0xff] }
  0x9e   : > { %v875_v43 = vmax.f32 %v427_v22, 0.0  ;;  %v3253_v47 = vpack.c.bf16 %v864_v21, %v860_v20  ;;  %v438_v9 = vld [vmem:[%s4548_s3 + $0x7a0] sm:$0xff]  ;;  %v447_v16 = vld [vmem:[%s4548_s3 + $0x7e8] sm:$0xff]  ;;  %v885_v21 = vmax.f32 %v437_v1, 0.0  ;;  %v889_v22 = vmax.f32 %v441_v62, 0.0  ;;  %v448_v0 = vld [vmem:[%s4548_s3 + $0x7f0] sm:$0xff] }
  0x9f   : > { %3018 = vmatpush1.bf16.msra.mxu0 %v3017_v28  ;;  %v869_v28 = vmax.f32 %v421_v10, 0.0  ;;  %v3033_v61 = vpack.c.bf16 %v870_v37, %v866_v35  ;;  %v445_v35 = vld [vmem:[%s4548_s3 + $0x7d8] sm:$0xff]  ;;  %v446_v46 = vld [vmem:[%s4548_s3 + $0x7e0] sm:$0xff]  ;;  %v4887_v1 = vld [vmem:[%s4548_s3 + $0x50] sm:$0xff] }
  0xa0   : > { %3020 = vmatprep.subr.bf16.mxu0 %v3019_v33  ;;  %3242 = vmatpush1.bf16.msra.mxu1 %v3241_v39  ;;  %v433_v39 = vld [vmem:[%s4548_s3 + $0x778] sm:$0xff]  ;;  %v3263_v59 = vpack.c.bf16 %v889_v22, %v885_v21  ;;  %v454_v21 = vld [vmem:[%s4548_s3 + $0x820] sm:$0xff]  ;;  %v460_v62 = vld [vmem:[%s4548_s3 + $0x850] sm:$0xff] }
  0xa1   : > { %3244 = vmatprep.subr.bf16.mxu1 %v3243_v44  ;;  %v879_v44 = vmax.f32 %v431_v24, 0.0  ;;  %v3255_v55 = vpack.c.bf16 %v873_v29, %v869_v28  ;;  %v881_v58 = vmax.f32 %v433_v39, 0.0  ;;  %v436_v24 = vld [vmem:[%s4548_s3 + $0x790] sm:$0xff]  ;;  %v449_v37 = vld [vmem:[%s4548_s3 + $0x7f8] sm:$0xff]  ;;  %v4899_v22 = vld [vmem:[%s4548_s3 + $0x80] sm:$0xff] }
  0xa2   : > { %v4861_v28 = vld [vmem:[%s4548_s3 + $0x10] sm:$0xff]  ;;  %v884_v50 = vmax.f32 %v436_v24, 0.0  ;;  %v458_v24 = vld [vmem:[%s4548_s3 + $0x840] sm:$0xff]  ;;  %v479_v29 = vld [vmem:[%s4548_s3 + $0x8e8] sm:$0xff] }
  0xa3   : > { %3022 = vmatpush1.bf16.msra.mxu0 %v3021_v49  ;;  %v872_v49 = vmax.f32 %v424_v31, 0.0  ;;  %v3035_v5 = vpack.c.bf16 %v879_v44, %v875_v43  ;;  %v3259_v20 = vpack.c.bf16 %v881_v58, %v877_v56  ;;  %v882_v31 = vmax.f32 %v434_v8, 0.0  ;;  %v4881_v56 = vld [vmem:[%s4548_s3 + $0x60] sm:$0xff]  ;;  %v453_v8 = vld [vmem:[%s4548_s3 + $0x818] sm:$0xff]  ;;  %v476_v41 = vld [vmem:[%s4548_s3 + $0x8d0] sm:$0xff] }
  0xa4   : > { %3024 = vmatprep.subr.bf16.mxu0 %v3023_v54  ;;  %3246 = vmatpush1.bf16.msra.mxu1 %v3245_v60  ;;  %v432_v60 = vld [vmem:[%s4548_s3 + $0x770] sm:$0xff]  ;;  %v891_v43 = vmax.f32 %v443_v15, 0.0  ;;  %v895_v44 = vmax.f32 %v447_v16, 0.0  ;;  %v469_v58 = vld [vmem:[%s4548_s3 + $0x898] sm:$0xff]  ;;  %v470_v39 = vld [vmem:[%s4548_s3 + $0x8a0] sm:$0xff] }
  0xa5   : > { %3248 = vmatprep.subr.bf16.mxu1 %v3247_v2  ;;  %v4840_v2 = vrot.slane %v1545_v52, %v4686_v57  ;;  %v3257_v10 = vpack.c.bf16 %v872_v49, %v868_v48  ;;  %v451_v52 = vld [vmem:[%s4548_s3 + $0x808] sm:$0xff]  ;;  %v466_v48 = vld [vmem:[%s4548_s3 + $0x880] sm:$0xff]  ;;  %v485_v33 = vld [vmem:[%s4548_s3 + $0x918] sm:$0xff] }
  0xa6   : > { %v899_v15 = vmax.f32 %v451_v52, 0.0  ;;  %v456_v52 = vld [vmem:[%s4548_s3 + $0x830] sm:$0xff]  ;;  %v487_v54 = vld [vmem:[%s4548_s3 + $0x928] sm:$0xff] }
  0xa7   : > { %3026 = vmatpush1.bf16.msra.mxu0 %v3025_v7  ;;  %6087 = vst [vmem:[#allocation11_spill] sm:$0xff] %v4840_v2  ;;  %v887_v7 = vmax.f32 %v439_v51, 0.0  ;;  %v4852_v17 = vcombine.high %v4840_v2, %v4840_v2 }
  0xa8   : > { %3028 = vmatprep.subr.bf16.mxu0 %v3027_v14  ;;  %3250 = vmatpush1.bf16.msra.mxu1 %v3249_v19  ;;  %v880_v14 = vmax.f32 %v432_v60, 0.0  ;;  %v893_v60 = vmax.f32 %v445_v35, 0.0  ;;  %v463_v35 = vld [vmem:[%s4548_s3 + $0x868] sm:$0xff]  ;;  %v4966_v19 = vld [vmem:[%s4548_s3 + $0x130] sm:$0xff] }
  0xa9   : > { %3252 = vmatprep.subr.bf16.mxu1 %v3251_v27  ;;  %6088 = vst [vmem:[#allocation12_spill] sm:$0xff] %v4852_v17  ;;  %v440_v27 = vld [vmem:[%s4548_s3 + $0x7b0] sm:$0xff]  ;;  %1720 = vmatprep.mubr.f32.mxu0 %v4852_v17 }
  0xaa   : > { %2004 = vmatprep.mubr.f32.mxu1 %v4852_v17  ;;  %v3261_v49 = vpack.c.bf16 %v880_v14, %v876_v11  ;;  %v888_v51 = vmax.f32 %v440_v27, 0.0  ;;  %v3043_v14 = vpack.c.bf16 %v895_v44, %v891_v43  ;;  %v901_v44 = vmax.f32 %v453_v8, 0.0  ;;  %v467_v11 = vld [vmem:[%s4548_s3 + $0x888] sm:$0xff]  ;;  %v490_v17 = vld [vmem:[%s4548_s3 + $0x940] sm:$0xff] }
  0xab   : > { %3030 = vmatpush1.bf16.msra.mxu0 %v3029_v34  ;;  %v886_v34 = vmax.f32 %v438_v9, 0.0  ;;  %v457_v9 = vld [vmem:[%s4548_s3 + $0x838] sm:$0xff] }
  0xac   : > { %3032 = vmatprep.subr.bf16.mxu0 %v3031_v42  ;;  %3254 = vmatpush1.bf16.msra.mxu1 %v3253_v47  ;;  %v3039_v42 = vpack.c.bf16 %v887_v7, %v883_v6  ;;  %v4875_v47 = vld [vmem:[%s4548_s3 + $0x40] sm:$0xff]  ;;  %v890_v6 = vmax.f32 %v442_v45, 0.0  ;;  %v894_v7 = vmax.f32 %v446_v46, 0.0  ;;  %v3265_v27 = vpack.c.bf16 %v888_v51, %v884_v50  ;;  %v452_v46 = vld [vmem:[%s4548_s3 + $0x810] sm:$0xff] }
  0xad   : > { %3256 = vmatprep.subr.bf16.mxu1 %v3255_v55  ;;  %v455_v55 = vld [vmem:[%s4548_s3 + $0x828] sm:$0xff]  ;;  %v905_v45 = vmax.f32 %v457_v9, 0.0  ;;  %v911_v9 = vmax.f32 %v463_v35, 0.0  ;;  %v462_v50 = vld [vmem:[%s4548_s3 + $0x860] sm:$0xff] }
  0xae   : > { %v903_v16 = vmax.f32 %v455_v55, 0.0  ;;  %v3045_v51 = vpack.c.bf16 %v894_v7, %v890_v6  ;;  %v464_v6 = vld [vmem:[%s4548_s3 + $0x870] sm:$0xff] }
  0xaf   : > { %3034 = vmatpush1.bf16.msra.mxu0 %v3033_v61  ;;  %v897_v61 = vmax.f32 %v449_v37, 0.0  ;;  %v4905_v37 = vld [vmem:[%s4548_s3 + $0xa0] sm:$0xff] }
  0xb0   : > { %3036 = vmatprep.subr.bf16.mxu0 %v3035_v5  ;;  %3258 = vmatpush1.bf16.msra.mxu1 %v3257_v10  ;;  %v3041_v5 = vpack.c.bf16 %v886_v34, %v882_v31  ;;  %v4893_v10 = vld [vmem:[%s4548_s3 + $0x70] sm:$0xff]  ;;  %v896_v31 = vmax.f32 %v448_v0, 0.0  ;;  %v459_v34 = vld [vmem:[%s4548_s3 + $0x848] sm:$0xff]  ;;  %v461_v0 = vld [vmem:[%s4548_s3 + $0x858] sm:$0xff] }
  0xb1   : > { %3260 = vmatprep.subr.bf16.mxu1 %v3259_v20  ;;  %v450_v20 = vld [vmem:[%s4548_s3 + $0x800] sm:$0xff]  ;;  %v3267_v43 = vpack.c.bf16 %v897_v61, %v893_v60  ;;  %v3047_v61 = vpack.c.bf16 %v903_v16, %v899_v15  ;;  %v907_v8 = vmax.f32 %v459_v34, 0.0  ;;  %v471_v60 = vld [vmem:[%s4548_s3 + $0x8a8] sm:$0xff]  ;;  %v3271_v16 = vpack.c.bf16 %v905_v45, %v901_v44  ;;  %v473_v15 = vld [vmem:[%s4548_s3 + $0x8b8] sm:$0xff] }
  0xb2   : > { %v898_v55 = vmax.f32 %v450_v20, 0.0  ;;  %v900_v20 = vmax.f32 %v452_v46, 0.0  ;;  %v909_v34 = vmax.f32 %v461_v0, 0.0  ;;  %v906_v46 = vmax.f32 %v458_v24, 0.0  ;;  %v468_v24 = vld [vmem:[%s4548_s3 + $0x890] sm:$0xff] }
  0xb3   : > { %3038 = vmatpush1.bf16.msra.mxu0 %v3037_v30  ;;  %v892_v30 = vmax.f32 %v444_v63, 0.0  ;;  %v902_v63 = vmax.f32 %v454_v21, 0.0  ;;  %v904_v21 = vmax.f32 %v456_v52, 0.0  ;;  %v910_v52 = vmax.f32 %v462_v50, 0.0 }
  0xb4   : > { %3040 = vmatprep.subr.bf16.mxu0 %v3039_v42  ;;  %3262 = vmatpush1.bf16.msra.mxu1 %v3261_v49  ;;  %v4911_v49 = vld [vmem:[%s4548_s3 + $0x90] sm:$0xff]  ;;  %v465_v42 = vld [vmem:[%s4548_s3 + $0x878] sm:$0xff]  ;;  %v3051_v44 = vpack.c.bf16 %v911_v9, %v907_v8  ;;  %v915_v45 = vmax.f32 %v467_v11, 0.0  ;;  %v919_v0 = vmax.f32 %v471_v60, 0.0  ;;  %v917_v8 = vmax.f32 %v469_v58, 0.0 }
  0xb5   : > { %3264 = vmatprep.subr.bf16.mxu1 %v3263_v59  ;;  %v4917_v59 = vld [vmem:[%s4548_s3 + $0xb0] sm:$0xff]  ;;  %v3269_v7 = vpack.c.bf16 %v896_v31, %v892_v30  ;;  %v913_v35 = vmax.f32 %v465_v42, 0.0  ;;  %v3049_v31 = vpack.c.bf16 %v902_v63, %v898_v55  ;;  %v3273_v50 = vpack.c.bf16 %v904_v21, %v900_v20  ;;  %v475_v30 = vld [vmem:[%s4548_s3 + $0x8c8] sm:$0xff]  ;;  %v477_v42 = vld [vmem:[%s4548_s3 + $0x8d8] sm:$0xff] }
  0xb6   : > { %v908_v55 = vmax.f32 %v460_v62, 0.0  ;;  %v912_v63 = vmax.f32 %v464_v6, 0.0  ;;  %v921_v9 = vmax.f32 %v473_v15, 0.0  ;;  %v4960_v62 = vld [vmem:[%s4548_s3 + $0x110] sm:$0xff]  ;;  %v3053_v20 = vpack.c.bf16 %v910_v52, %v906_v46  ;;  %v474_v6 = vld [vmem:[%s4548_s3 + $0x8c0] sm:$0xff] }
  0xb7   : > { %3042 = vmatpush1.bf16.msra.mxu0 %v3041_v5  ;;  %v4923_v5 = vld [vmem:[%s4548_s3 + $0xc0] sm:$0xff]  ;;  %v3275_v60 = vpack.c.bf16 %v913_v35, %v909_v34  ;;  %v914_v21 = vmax.f32 %v466_v48, 0.0  ;;  %v918_v11 = vmax.f32 %v470_v39, 0.0  ;;  %v3055_v15 = vpack.c.bf16 %v919_v0, %v915_v45  ;;  %v480_v48 = vld [vmem:[%s4548_s3 + $0x8f0] sm:$0xff] }
  0xb8   : > { %3044 = vmatprep.subr.bf16.mxu0 %v3043_v14  ;;  %3266 = vmatpush1.bf16.msra.mxu1 %v3265_v27  ;;  %v4929_v14 = vld [vmem:[%s4548_s3 + $0xe0] sm:$0xff]  ;;  %v4935_v27 = vld [vmem:[%s4548_s3 + $0xd0] sm:$0xff]  ;;  %v923_v34 = vmax.f32 %v475_v30, 0.0  ;;  %v927_v35 = vmax.f32 %v479_v29, 0.0  ;;  %v3277_v46 = vpack.c.bf16 %v912_v63, %v908_v55  ;;  %v916_v52 = vmax.f32 %v468_v24, 0.0  ;;  %v489_v29 = vld [vmem:[%s4548_s3 + $0x938] sm:$0xff] }
  0xb9   : > { %3268 = vmatprep.subr.bf16.mxu1 %v3267_v43  ;;  %v4941_v43 = vld [vmem:[%s4548_s3 + $0xf0] sm:$0xff]  ;;  %v4973_v39 = vld [vmem:[%s4548_s3 + $0x140] sm:$0xff]  ;;  %v3279_v30 = vpack.c.bf16 %v921_v9, %v917_v8  ;;  %v925_v45 = vmax.f32 %v477_v42, 0.0  ;;  %v3057_v55 = vpack.c.bf16 %v918_v11, %v914_v21  ;;  %v922_v63 = vmax.f32 %v474_v6, 0.0  ;;  %v495_v42 = vld [vmem:[%s4548_s3 + $0x968] sm:$0xff] }
  0xba   : > { %v3059_v8 = vpack.c.bf16 %v927_v35, %v923_v34  ;;  %v931_v9 = vmax.f32 %v483_v4, 0.0  ;;  %v486_v24 = vld [vmem:[%s4548_s3 + $0x920] sm:$0xff]  ;;  %v924_v21 = vmax.f32 %v476_v41, 0.0  ;;  %v933_v34 = vmax.f32 %v485_v33, 0.0  ;;  %v488_v6 = vld [vmem:[%s4548_s3 + $0x930] sm:$0xff]  ;;  %v503_v33 = vld [vmem:[%s4548_s3 + $0x9a8] sm:$0xff] }
  0xbb   : > { %3046 = vmatpush1.bf16.msra.mxu0 %v3045_v51  ;;  %v4947_v51 = vld [vmem:[%s4548_s3 + $0x100] sm:$0xff]  ;;  %v937_v35 = vmax.f32 %v489_v29, 0.0 }
  0xbc   : > { %3048 = vmatprep.subr.bf16.mxu0 %v3047_v61  ;;  %3270 = vmatpush1.bf16.msra.mxu1 %v3269_v7  ;;  %v4953_v61 = vld [vmem:[%s4548_s3 + $0x120] sm:$0xff]  ;;  %v472_v7 = vld [vmem:[%s4548_s3 + $0x8b0] sm:$0xff] }
  0xbd   : > { %3272 = vmatprep.subr.bf16.mxu1 %v3271_v16  ;;  %v481_v16 = vld [vmem:[%s4548_s3 + $0x8f8] sm:$0xff]  ;;  %v920_v58 = vmax.f32 %v472_v7, 0.0  ;;  %v4997_v11 = vld [vmem:[%s4548_s3 + $0x180] sm:$0xff] }
  0xbe   : > { %1721 = vmatmul.mubr.f32.vlgmr.msra.gmra.mrb[0].mxu0 %v4840_v2  ;;  %v929_v0 = vmax.f32 %v481_v16, 0.0  ;;  %v935_v16 = vmax.f32 %v487_v54, 0.0  ;;  %v497_v54 = vld [vmem:[%s4548_s3 + $0x978] sm:$0xff]  ;;  %v494_v41 = vld [vmem:[%s4548_s3 + $0x960] sm:$0xff] }
  0xbf   : > { %3050 = vmatpush1.bf16.msra.mxu0 %v3049_v31  ;;  %2005 = vmatmul.mubr.f32.vlgmr.msra.gmra.mrb[0].mxu1 %v4840_v2  ;;  %v478_v31 = vld [vmem:[%s4548_s3 + $0x8e0] sm:$0xff]  ;;  %v493_v2 = vld [vmem:[%s4548_s3 + $0x958] sm:$0xff] }
  0xc0   : > { %3052 = vmatprep.subr.bf16.mxu0 %v3051_v44  ;;  %3274 = vmatpush1.bf16.msra.mxu1 %v3273_v50  ;;  %v4979_v44 = vld [vmem:[%s4548_s3 + $0x160] sm:$0xff]  ;;  %v4985_v50 = vld [vmem:[%s4548_s3 + $0x150] sm:$0xff]  ;;  %v926_v7 = vmax.f32 %v478_v31, 0.0  ;;  %v928_v31 = vmax.f32 %v480_v48, 0.0  ;;  %v3283_v4 = vpack.c.bf16 %v929_v0, %v925_v45  ;;  %v3063_v29 = vpack.c.bf16 %v935_v16, %v931_v9 }
  0xc1   : > { %3276 = vmatprep.subr.bf16.mxu1 %v3275_v60  ;;  %v4991_v60 = vld [vmem:[%s4548_s3 + $0x170] sm:$0xff]  ;;  %v939_v45 = vmax.f32 %v491_v12, 0.0  ;;  %v943_v0 = vmax.f32 %v495_v42, 0.0  ;;  %v3287_v42 = vpack.c.bf16 %v937_v35, %v933_v34  ;;  %v941_v9 = vmax.f32 %v493_v2, 0.0  ;;  %v505_v12 = vld [vmem:[%s4548_s3 + $0x9b8] sm:$0xff] }
  0xc2   : > { %v3061_v48 = vpack.c.bf16 %v926_v7, %v922_v63  ;;  %v932_v63 = vmax.f32 %v484_v36, 0.0  ;;  %v936_v7 = vmax.f32 %v488_v6, 0.0  ;;  %v945_v16 = vmax.f32 %v497_v54, 0.0  ;;  %v498_v36 = vld [vmem:[%s4548_s3 + $0x980] sm:$0xff]  ;;  %v504_v2 = vld [vmem:[%s4548_s3 + $0x9b0] sm:$0xff] }
  0xc3   : > { %3054 = vmatpush1.bf16.msra.mxu0 %v3053_v20  ;;  %v3281_v20 = vpack.c.bf16 %v920_v58, %v916_v52  ;;  %v5009_v58 = vld [vmem:[%s4548_s3 + $0x190] sm:$0xff]  ;;  %v934_v52 = vmax.f32 %v486_v24, 0.0  ;;  %v3285_v24 = vpack.c.bf16 %v928_v31, %v924_v21  ;;  %v938_v21 = vmax.f32 %v490_v17, 0.0  ;;  %v513_v17 = vld [vmem:[%s4548_s3 + $0x9f8] sm:$0xff] }
  0xc4   : > { %3056 = vmatprep.subr.bf16.mxu0 %v3055_v15  ;;  %3278 = vmatpush1.bf16.msra.mxu1 %v3277_v46  ;;  %v5003_v15 = vld [vmem:[%s4548_s3 + $0x1a0] sm:$0xff]  ;;  %6090 = vst [vmem:[#allocation14_spill] sm:$0xff] %v5009_v58  ;;  %v930_v46 = vmax.f32 %v482_v26, 0.0  ;;  %v496_v26 = vld [vmem:[%s4548_s3 + $0x970] sm:$0xff]  ;;  %v942_v31 = vmax.f32 %v494_v41, 0.0  ;;  %v3067_v54 = vpack.c.bf16 %v943_v0, %v939_v45  ;;  %v947_v34 = vmax.f32 %v499_v13, 0.0 }
  0xc5   : > { %6089 = vst [vmem:[#allocation13_spill] sm:$0xff] %v5003_v15  ;;  %3280 = vmatprep.subr.bf16.mxu1 %v3279_v30  ;;  %v5015_v30 = vld [vmem:[%s4548_s3 + $0x1b0] sm:$0xff]  ;;  %v951_v35 = vmax.f32 %v503_v33, 0.0  ;;  %v3289_v41 = vpack.c.bf16 %v936_v7, %v932_v63  ;;  %v3291_v33 = vpack.c.bf16 %v945_v16, %v941_v9  ;;  %v953_v0 = vmax.f32 %v505_v12, 0.0  ;;  %v509_v7 = vld [vmem:[%s4548_s3 + $0x9d8] sm:$0xff]  ;;  %v506_v16 = vld [vmem:[%s4548_s3 + $0x9c0] sm:$0xff] }
  0xc6   : > { %6091 = vst [vmem:[#allocation15_spill] sm:$0xff] %v5015_v30  ;;  %v3065_v6 = vpack.c.bf16 %v934_v52, %v930_v46  ;;  %v5046_v46 = vld [vmem:[%s4548_s3 + $0x200] sm:$0xff]  ;;  %v940_v52 = vmax.f32 %v492_v23, 0.0  ;;  %v3069_v23 = vpack.c.bf16 %v942_v31, %v938_v21  ;;  %v957_v21 = vmax.f32 %v509_v7, 0.0  ;;  %v523_v7 = vld [vmem:[%s4548_s3 + $0xa48] sm:$0xff] }
  0xc7   : > { %3058 = vmatpush1.bf16.msra.mxu0 %v3057_v55  ;;  %v5021_v55 = vld [vmem:[%s4548_s3 + $0x1c0] sm:$0xff]  ;;  %6096 = vst [vmem:[#allocation20_spill] sm:$0xff] %v5046_v46  ;;  %v3071_v13 = vpack.c.bf16 %v951_v35, %v947_v34  ;;  %v515_v34 = vld [vmem:[%s4548_s3 + $0xa08] sm:$0xff] }
  0xc8   : > { %3060 = vmatprep.subr.bf16.mxu0 %v3059_v8  ;;  %6092 = vst [vmem:[#allocation16_spill] sm:$0xff] %v5021_v55  ;;  %3282 = vmatpush1.bf16.msra.mxu1 %v3281_v20  ;;  %v5027_v8 = vld [vmem:[%s4548_s3 + $0x1e0] sm:$0xff]  ;;  %v5033_v20 = vld [vmem:[%s4548_s3 + $0x1d0] sm:$0xff]  ;;  %v501_v55 = vld [vmem:[%s4548_s3 + $0x998] sm:$0xff] }
  0xc9   : > { %6093 = vst [vmem:[#allocation17_spill] sm:$0xff] %v5027_v8  ;;  %3284 = vmatprep.subr.bf16.mxu1 %v3283_v4  ;;  %6094 = vst [vmem:[#allocation18_spill] sm:$0xff] %v5033_v20  ;;  %v5039_v4 = vld [vmem:[%s4548_s3 + $0x1f0] sm:$0xff]  ;;  %v502_v20 = vld [vmem:[%s4548_s3 + $0x9a0] sm:$0xff]  ;;  %v944_v8 = vmax.f32 %v496_v26, 0.0  ;;  %v949_v45 = vmax.f32 %v501_v55, 0.0 }
  0xca   : > { %6095 = vst [vmem:[#allocation19_spill] sm:$0xff] %v5039_v4  ;;  %v507_v4 = vld [vmem:[%s4548_s3 + $0x9c8] sm:$0xff]  ;;  %v5053_v30 = vld [vmem:[%s4548_s3 + $0x220] sm:$0xff]  ;;  %v950_v26 = vmax.f32 %v502_v20, 0.0  ;;  %v5065_v20 = vld [vmem:[%s4548_s3 + $0x230] sm:$0xff] }
  0xcb   : > { %3062 = vmatpush1.bf16.msra.mxu0 %v3061_v48  ;;  %v500_v48 = vld [vmem:[%s4548_s3 + $0x990] sm:$0xff]  ;;  %6097 = vst [vmem:[#allocation21_spill] sm:$0xff] %v5053_v30  ;;  %v955_v9 = vmax.f32 %v507_v4, 0.0  ;;  %v510_v12 = vld [vmem:[%s4548_s3 + $0x9e0] sm:$0xff]  ;;  %6099 = vst [vmem:[#allocation23_spill] sm:$0xff] %v5065_v20  ;;  %v3293_v4 = vpack.c.bf16 %v944_v8, %v940_v52  ;;  %v961_v20 = vmax.f32 %v513_v17, 0.0 }
  0xcc   : > { %3064 = vmatprep.subr.bf16.mxu0 %v3063_v29  ;;  %3286 = vmatpush1.bf16.msra.mxu1 %v3285_v24  ;;  %v511_v29 = vld [vmem:[%s4548_s3 + $0x9e8] sm:$0xff]  ;;  %v946_v24 = vmax.f32 %v498_v36, 0.0  ;;  %v948_v63 = vmax.f32 %v500_v48, 0.0  ;;  %v5069_v31 = vld [vmem:[%s4548_s3 + $0x240] sm:$0xff]  ;;  %v3295_v36 = vpack.c.bf16 %v953_v0, %v949_v45  ;;  %v517_v30 = vld [vmem:[%s4548_s3 + $0xa18] sm:$0xff]  ;;  %v958_v46 = vmax.f32 %v510_v12, 0.0 }
  0xcd   : > { %3288 = vmatprep.subr.bf16.mxu1 %v3287_v42  ;;  %v952_v42 = vmax.f32 %v504_v2, 0.0  ;;  %v959_v55 = vmax.f32 %v511_v29, 0.0  ;;  %6100 = vst [vmem:[#allocation24_spill] sm:$0xff] %v5069_v31  ;;  %v519_v35 = vld [vmem:[%s4548_s3 + $0xa28] sm:$0xff]  ;;  %v5076_v48 = vld [vmem:[%s4548_s3 + $0x260] sm:$0xff]  ;;  %v521_v2 = vld [vmem:[%s4548_s3 + $0xa38] sm:$0xff] }
  0xce   : > { %6101 = vst [vmem:[#allocation25_spill] sm:$0xff] %v5076_v48  ;;  %v3073_v52 = vpack.c.bf16 %v950_v26, %v946_v24  ;;  %v954_v31 = vmax.f32 %v506_v16, 0.0  ;;  %v514_v58 = vld [vmem:[%s4548_s3 + $0xa00] sm:$0xff]  ;;  %v963_v17 = vmax.f32 %v515_v34, 0.0  ;;  %v967_v0 = vmax.f32 %v519_v35, 0.0  ;;  %v527_v48 = vld [vmem:[%s4548_s3 + $0xa68] sm:$0xff] }
  0xcf   : > { %3066 = vmatpush1.bf16.msra.mxu0 %v3065_v6  ;;  %v5061_v6 = vld [vmem:[%s4548_s3 + $0x210] sm:$0xff]  ;;  %v518_v29 = vld [vmem:[%s4548_s3 + $0xa20] sm:$0xff]  ;;  %v3075_v45 = vpack.c.bf16 %v959_v55, %v955_v9  ;;  %v969_v24 = vmax.f32 %v521_v2, 0.0  ;;  %v525_v2 = vld [vmem:[%s4548_s3 + $0xa58] sm:$0xff] }
  0xd0   : > { %3068 = vmatprep.subr.bf16.mxu0 %v3067_v54  ;;  %6098 = vst [vmem:[#allocation22_spill] sm:$0xff] %v5061_v6  ;;  %3290 = vmatpush1.bf16.msra.mxu1 %v3289_v41  ;;  %v508_v54 = vld [vmem:[%s4548_s3 + $0x9d0] sm:$0xff]  ;;  %v966_v9 = vmax.f32 %v518_v29, 0.0  ;;  %v3077_v12 = vpack.c.bf16 %v958_v46, %v954_v31  ;;  %v3079_v34 = vpack.c.bf16 %v967_v0, %v963_v17  ;;  %v522_v35 = vld [vmem:[%s4548_s3 + $0xa40] sm:$0xff]  ;;  %v973_v31 = vmax.f32 %v525_v2, 0.0 }
  0xd1   : > { %3292 = vmatprep.subr.bf16.mxu1 %v3291_v33  ;;  %v512_v6 = vld [vmem:[%s4548_s3 + $0x9f0] sm:$0xff]  ;;  %v3297_v33 = vpack.c.bf16 %v952_v42, %v948_v63  ;;  %v956_v15 = vmax.f32 %v508_v54, 0.0  ;;  %v3299_v63 = vpack.c.bf16 %v961_v20, %v957_v21  ;;  %v962_v42 = vmax.f32 %v514_v58, 0.0  ;;  %v5101_v54 = vld [vmem:[%s6022_s1 + $0x8] sm:$0x3f] }
  0xd2   : > { %v5083_v41 = vld [vmem:[%s4548_s3 + $0x250] sm:$0xff]  ;;  %v960_v8 = vmax.f32 %v512_v6, 0.0  ;;  %v975_v6 = vmax.f32 %v527_v48, 0.0  ;;  %6104 = vst [vmem:[#allocation28_spill] sm:$0xff] %v5101_v54  ;;  %v5108_v20 = vld [vmem:[%s4548_s3 + $0x2a0] sm:$0xff]  ;;  %v5123_v17 = vrot.slane %v5101_v54, %v4686_v57 }
  0xd3   : > { %6102 = vst [vmem:[#allocation26_spill] sm:$0xff] %v5083_v41  ;;  %3070 = vmatpush1.bf16.msra.mxu0 %v3069_v23  ;;  %v965_v23 = vmax.f32 %v517_v30, 0.0  ;;  %v5091_v26 = vld [vmem:[%s4548_s3 + $0x270] sm:$0xff]  ;;  %v971_v30 = vmax.f32 %v523_v7, 0.0  ;;  %6106 = vst [vmem:[#allocation30_spill] sm:$0xff] %v5108_v20  ;;  %v526_v48 = vld [vmem:[%s4548_s3 + $0xa60] sm:$0xff]  ;;  %v3081_v46 = vpack.c.bf16 %v966_v9, %v962_v42 }
  0xd4   : > { %3072 = vmatprep.subr.bf16.mxu0 %v3071_v13  ;;  %3294 = vmatpush1.bf16.msra.mxu1 %v3293_v4  ;;  %6103 = vst [vmem:[#allocation27_spill] sm:$0xff] %v5091_v26  ;;  %v516_v55 = vld [vmem:[%s4548_s3 + $0xa10] sm:$0xff]  ;;  %v529_v4 = vld [vmem:[%s4548_s3 + $0xa78] sm:$0xff]  ;;  %v531_v26 = vld [vmem:[%s4548_s3 + $0xa88] sm:$0xff] }
  0xd5   : > { %3296 = vmatprep.subr.bf16.mxu1 %v3295_v36  ;;  %v520_v16 = vld [vmem:[%s4548_s3 + $0xa30] sm:$0xff]  ;;  %v5104_v36 = vld [vmem:[%s4548_s3 + $0x280] sm:$0xff]  ;;  %v3303_v7 = vpack.c.bf16 %v969_v24, %v965_v23  ;;  %v964_v58 = vmax.f32 %v516_v55, 0.0  ;;  %v535_v41 = vld [vmem:[%s4548_s3 + $0xaa8] sm:$0xff]  ;;  %6108 = vst [vmem:[#allocation32_spill] sm:$0xff] %v5123_v17  ;;  %v979_v42 = vmax.f32 %v531_v26, 0.0 }
  0xd6   : > { %6105 = vst [vmem:[#allocation29_spill] sm:$0xff] %v5104_v36  ;;  %v5112_v21 = vld [vmem:[%s4548_s3 + $0x290] sm:$0xff]  ;;  %v968_v13 = vmax.f32 %v520_v16, 0.0  ;;  %v533_v23 = vld [vmem:[%s4548_s3 + $0xa98] sm:$0xff]  ;;  %v983_v9 = vmax.f32 %v535_v41, 0.0  ;;  %v530_v55 = vld [vmem:[%s4548_s3 + $0xa80] sm:$0xff] }
  0xd7   : > { %3074 = vmatpush1.bf16.msra.mxu0 %v3073_v52  ;;  %6107 = vst [vmem:[#allocation31_spill] sm:$0xff] %v5112_v21  ;;  %v524_v29 = vld [vmem:[%s4548_s3 + $0xa50] sm:$0xff]  ;;  %v3301_v52 = vpack.c.bf16 %v960_v8, %v956_v15  ;;  %v3083_v15 = vpack.c.bf16 %v975_v6, %v971_v30  ;;  %v970_v8 = vmax.f32 %v522_v35, 0.0  ;;  %v537_v24 = vld [vmem:[%s4548_s3 + $0xab8] sm:$0xff]  ;;  %v534_v16 = vld [vmem:[%s4548_s3 + $0xaa0] sm:$0xff]  ;;  %v981_v54 = vmax.f32 %v533_v23, 0.0 }
  0xd8   : > { %3076 = vmatprep.subr.bf16.mxu0 %v3075_v45  ;;  %3298 = vmatpush1.bf16.msra.mxu1 %v3297_v33  ;;  %v528_v36 = vld [vmem:[%s4548_s3 + $0xa70] sm:$0xff]  ;;  %v977_v45 = vmax.f32 %v529_v4, 0.0  ;;  %v974_v33 = vmax.f32 %v526_v48, 0.0  ;;  %v972_v0 = vmax.f32 %v524_v29, 0.0  ;;  %v5138_v2 = vld [vmem:[%s4548_s3 + $0x2c0] sm:$0xff]  ;;  %v539_v35 = vld [vmem:[%s4548_s3 + $0xac8] sm:$0xff] }
  0xd9   : > { %3300 = vmatprep.subr.bf16.mxu1 %v3299_v63  ;;  %v976_v63 = vmax.f32 %v528_v36, 0.0  ;;  %v5134_v30 = vld [vmem:[%s4548_s3 + $0x2b0] sm:$0xff]  ;;  %6111 = vst [vmem:[#allocation35_spill] sm:$0xff] %v5138_v2  ;;  %v5142_v26 = vld [vmem:[%s4548_s3 + $0x2e0] sm:$0xff]  ;;  %v3305_v36 = vpack.c.bf16 %v968_v13, %v964_v58  ;;  %v543_v48 = vld [vmem:[%s4548_s3 + $0xae8] sm:$0xff]  ;;  %v985_v4 = vmax.f32 %v537_v24, 0.0 }
  0xda   : > { %6110 = vst [vmem:[#allocation34_spill] sm:$0xff] %v5134_v30  ;;  %6112 = vst [vmem:[#allocation36_spill] sm:$0xff] %v5142_v26  ;;  %v5151_v29 = vld [vmem:[%s4548_s3 + $0x2d0] sm:$0xff]  ;;  %v3307_v57 = vpack.c.bf16 %v977_v45, %v973_v31  ;;  %v541_v30 = vld [vmem:[%s4548_s3 + $0xad8] sm:$0xff]  ;;  %v978_v26 = vmax.f32 %v530_v55, 0.0  ;;  %v3087_v45 = vpack.c.bf16 %v983_v9, %v979_v42  ;;  %v987_v23 = vmax.f32 %v539_v35, 0.0 }
  0xdb   : > { %3078 = vmatpush1.bf16.msra.mxu0 %v3077_v12  ;;  %v5131_v12 = vcombine.high %v5123_v17, %v5123_v17  ;;  %6113 = vst [vmem:[#allocation37_spill] sm:$0xff] %v5151_v29  ;;  %v536_v2 = vld [vmem:[%s4548_s3 + $0xab0] sm:$0xff]  ;;  %v545_v41 = vld [vmem:[%s4548_s3 + $0xaf8] sm:$0xff]  ;;  %v3309_v31 = vpack.c.bf16 %v976_v63, %v972_v0  ;;  %v991_v24 = vmax.f32 %v543_v48, 0.0  ;;  %v538_v6 = vld [vmem:[%s4548_s3 + $0xac0] sm:$0xff] }
  0xdc   : > { %3080 = vmatprep.subr.bf16.mxu0 %v3079_v34  ;;  %3302 = vmatpush1.bf16.msra.mxu1 %v3301_v52  ;;  %v5146_v34 = vld [vmem:[%s4548_s3 + $0xa90] sm:$0xff]  ;;  %v3085_v52 = vpack.c.bf16 %v974_v33, %v970_v8  ;;  %v542_v29 = vld [vmem:[%s4548_s3 + $0xae0] sm:$0xff]  ;;  %v984_v8 = vmax.f32 %v536_v2, 0.0  ;;  %v989_v33 = vmax.f32 %v541_v30, 0.0  ;;  %v993_v55 = vmax.f32 %v545_v41, 0.0 }
  0xdd   : > { %6109 = vst [vmem:[#allocation33_spill] sm:$0xff] %v5131_v12  ;;  %3304 = vmatprep.subr.bf16.mxu1 %v3303_v7  ;;  %1791 = vmatprep.mubr.f32.mxu0 %v5131_v12  ;;  %v5159_v13 = vld [vmem:[%s4548_s3 + $0x2f0] sm:$0xff]  ;;  %v982_v7 = vmax.f32 %v534_v16, 0.0  ;;  %v547_v16 = vld [vmem:[%s4548_s3 + $0xb08] sm:$0xff]  ;;  %v5169_v58 = vld [vmem:[%s4548_s3 + $0x300] sm:$0xff]  ;;  %v3311_v30 = vpack.c.bf16 %v985_v4, %v981_v54  ;;  %v986_v42 = vmax.f32 %v538_v6, 0.0  ;;  %v3091_v4 = vpack.c.bf16 %v991_v24, %v987_v23 }
  0xde   : > { %6114 = vst [vmem:[#allocation38_spill] sm:$0xff] %v5159_v13  ;;  %2075 = vmatprep.mubr.f32.mxu1 %v5131_v12  ;;  %6115 = vst [vmem:[#allocation39_spill] sm:$0xff] %v5169_v58  ;;  %v5173_v63 = vld [vmem:[%s4548_s3 + $0x320] sm:$0xff]  ;;  %v5177_v9 = vld [vmem:[%s4548_s3 + $0x310] sm:$0xff]  ;;  %v990_v12 = vmax.f32 %v542_v29, 0.0  ;;  %v3315_v6 = vpack.c.bf16 %v993_v55, %v989_v33 }
  0xdf   : > { %3082 = vmatpush1.bf16.msra.mxu0 %v3081_v46  ;;  %v980_v46 = vmax.f32 %v5146_v34, 0.0  ;;  %6116 = vst [vmem:[#allocation40_spill] sm:$0xff] %v5173_v63  ;;  %6117 = vst [vmem:[#allocation41_spill] sm:$0xff] %v5177_v9  ;;  %v540_v41 = vld [vmem:[%s4548_s3 + $0xad0] sm:$0xff]  ;;  %v549_v34 = vld [vmem:[%s4548_s3 + $0xb18] sm:$0xff]  ;;  %v3089_v0 = vpack.c.bf16 %v982_v7, %v978_v26  ;;  %v995_v9 = vmax.f32 %v547_v16, 0.0 }
  0xe0   : > { %3084 = vmatprep.subr.bf16.mxu0 %v3083_v15  ;;  %3306 = vmatpush1.bf16.msra.mxu1 %v3305_v36  ;;  %v551_v15 = vld [vmem:[%s4548_s3 + $0xb28] sm:$0xff]  ;;  %v544_v36 = vld [vmem:[%s4548_s3 + $0xaf0] sm:$0xff]  ;;  %v553_v63 = vld [vmem:[%s4548_s3 + $0xb38] sm:$0xff]  ;;  %v988_v29 = vmax.f32 %v540_v41, 0.0  ;;  %v997_v54 = vmax.f32 %v549_v34, 0.0 }
  0xe1   : > { %3308 = vmatprep.subr.bf16.mxu1 %v3307_v57  ;;  %v5184_v35 = vld [vmem:[%s4548_s3 + $0x330] sm:$0xff]  ;;  %v546_v58 = vld [vmem:[%s4548_s3 + $0xb00] sm:$0xff]  ;;  %v999_v13 = vmax.f32 %v551_v15, 0.0  ;;  %v3313_v26 = vpack.c.bf16 %v984_v8, %v980_v46  ;;  %v555_v7 = vld [vmem:[%s4548_s3 + $0xb48] sm:$0xff]  ;;  %v3093_v46 = vpack.c.bf16 %v990_v12, %v986_v42 }
  0xe2   : > { %6118 = vst [vmem:[#allocation42_spill] sm:$0xff] %v5184_v35  ;;  %v550_v2 = vld [vmem:[%s4548_s3 + $0xb20] sm:$0xff]  ;;  %v548_v21 = vld [vmem:[%s4548_s3 + $0xb10] sm:$0xff]  ;;  %v559_v35 = vld [vmem:[%s4548_s3 + $0xb68] sm:$0xff]  ;;  %v994_v23 = vmax.f32 %v546_v58, 0.0  ;;  %v1003_v41 = vmax.f32 %v555_v7, 0.0 }
  0xe3   : > { %3086 = vmatpush1.bf16.msra.mxu0 %v3085_v52  ;;  %v5191_v57 = vld [vmem:[%s4548_s3 + $0x340] sm:$0xff]  ;;  %v552_v48 = vld [vmem:[%s4548_s3 + $0xb30] sm:$0xff]  ;;  %v992_v52 = vmax.f32 %v544_v36, 0.0  ;;  %v998_v24 = vmax.f32 %v550_v2, 0.0  ;;  %v996_v8 = vmax.f32 %v548_v21, 0.0  ;;  %v557_v55 = vld [vmem:[%s4548_s3 + $0xb58] sm:$0xff]  ;;  %v3095_v2 = vpack.c.bf16 %v999_v13, %v995_v9 }
  0xe4   : > { %6119 = vst [vmem:[#allocation43_spill] sm:$0xff] %v5191_v57  ;;  %3088 = vmatprep.subr.bf16.mxu0 %v3087_v45  ;;  %3310 = vmatpush1.bf16.msra.mxu1 %v3309_v31  ;;  %v1001_v45 = vmax.f32 %v553_v63, 0.0  ;;  %v5199_v16 = vld [vmem:[%s4548_s3 + $0x360] sm:$0xff]  ;;  %v1000_v33 = vmax.f32 %v552_v48, 0.0  ;;  %v561_v15 = vld [vmem:[%s4548_s3 + $0xb78] sm:$0xff]  ;;  %v5206_v63 = vld [vmem:[%s4548_s3 + $0x350] sm:$0xff] }
  0xe5   : > { %3312 = vmatprep.subr.bf16.mxu1 %v3311_v30  ;;  %6120 = vst [vmem:[#allocation44_spill] sm:$0xff] %v5199_v16  ;;  %v554_v30 = vld [vmem:[%s4548_s3 + $0xb40] sm:$0xff]  ;;  %6121 = vst [vmem:[#allocation45_spill] sm:$0xff] %v5206_v63  ;;  %v5211_v12 = vld [vmem:[%s4548_s3 + $0xb50] sm:$0xff]  ;;  %v3097_v34 = vpack.c.bf16 %v998_v24, %v994_v23  ;;  %v1009_v16 = vmax.f32 %v561_v15, 0.0 }
  0xe6   : > { %v558_v36 = vld [vmem:[%s4548_s3 + $0xb60] sm:$0xff]  ;;  %v5214_v21 = vld [vmem:[%s4548_s3 + $0xb70] sm:$0xff]  ;;  %v563_v7 = vld [vmem:[%s4548_s3 + $0xb88] sm:$0xff]  ;;  %v3319_v63 = vpack.c.bf16 %v1001_v45, %v997_v54  ;;  %v3321_v20 = vpack.c.bf16 %v1000_v33, %v996_v8  ;;  %v1002_v9 = vmax.f32 %v554_v30, 0.0 }
  0xe7   : > { %3090 = vmatpush1.bf16.msra.mxu0 %v3089_v0  ;;  %v1007_v0 = vmax.f32 %v559_v35, 0.0  ;;  %v5217_v42 = vld [vmem:[%s4548_s3 + $0x370] sm:$0xff]  ;;  %v5221_v48 = vld [vmem:[%s4548_s3 + $0x380] sm:$0xff]  ;;  %v3317_v35 = vpack.c.bf16 %v992_v52, %v988_v29  ;;  %v567_v58 = vld [vmem:[%s4548_s3 + $0xba8] sm:$0xff]  ;;  %v1004_v29 = vmax.f32 %v5211_v12, 0.0  ;;  %v1008_v54 = vmax.f32 %v5214_v21, 0.0 }
  0xe8   : > { %3092 = vmatprep.subr.bf16.mxu0 %v3091_v4  ;;  %6122 = vst [vmem:[#allocation46_spill] sm:$0xff] %v5217_v42  ;;  %6123 = vst [vmem:[#allocation47_spill] sm:$0xff] %v5221_v48  ;;  %v5225_v13 = vld [vmem:[%s4548_s3 + $0x3a0] sm:$0xff]  ;;  %3314 = vmatpush1.bf16.msra.mxu1 %v3313_v26  ;;  %v565_v31 = vld [vmem:[%s4548_s3 + $0xb98] sm:$0xff]  ;;  %v1005_v42 = vmax.f32 %v557_v55, 0.0  ;;  %v1006_v26 = vmax.f32 %v558_v36, 0.0 }
  0xe9   : > { %6124 = vst [vmem:[#allocation48_spill] sm:$0xff] %v5225_v13  ;;  %3316 = vmatprep.subr.bf16.mxu1 %v3315_v6  ;;  %v569_v57 = vld [vmem:[%s4548_s3 + $0xbb8] sm:$0xff]  ;;  %v562_v4 = vld [vmem:[%s4548_s3 + $0xb80] sm:$0xff]  ;;  %v564_v52 = vld [vmem:[%s4548_s3 + $0xb90] sm:$0xff]  ;;  %v3099_v6 = vpack.c.bf16 %v1007_v0, %v1003_v41  ;;  %v1011_v45 = vmax.f32 %v563_v7, 0.0  ;;  %v1015_v23 = vmax.f32 %v567_v58, 0.0 }
  0xea   : > { %v566_v48 = vld [vmem:[%s4548_s3 + $0xba0] sm:$0xff]  ;;  %v568_v13 = vld [vmem:[%s4548_s3 + $0xbb0] sm:$0xff]  ;;  %v571_v24 = vld [vmem:[%s4548_s3 + $0xbc8] sm:$0xff]  ;;  %v1013_v15 = vmax.f32 %v565_v31, 0.0  ;;  %v1010_v8 = vmax.f32 %v562_v4, 0.0  ;;  %v3323_v41 = vpack.c.bf16 %v1009_v16, %v1005_v42  ;;  %v1012_v58 = vmax.f32 %v564_v52, 0.0 }
  0xeb   : > { %3094 = vmatpush1.bf16.msra.mxu0 %v3093_v46  ;;  %v575_v55 = vld [vmem:[%s4548_s3 + $0xbe8] sm:$0xff]  ;;  %v1017_v46 = vmax.f32 %v569_v57, 0.0  ;;  %v1014_v33 = vmax.f32 %v566_v48, 0.0  ;;  %v5241_v30 = vld [vmem:[%s4548_s3 + $0x390] sm:$0xff]  ;;  %v1016_v0 = vmax.f32 %v568_v13, 0.0  ;;  %v3101_v57 = vpack.c.bf16 %v1006_v26, %v1002_v9  ;;  %v573_v48 = vld [vmem:[%s4548_s3 + $0xbd8] sm:$0xff] }
  0xec   : > { %3096 = vmatprep.subr.bf16.mxu0 %v3095_v2  ;;  %3318 = vmatpush1.bf16.msra.mxu1 %v3317_v35  ;;  %v5245_v36 = vld [vmem:[%s4548_s3 + $0x3b0] sm:$0xff]  ;;  %v1019_v12 = vmax.f32 %v571_v24, 0.0  ;;  %v1023_v21 = vmax.f32 %v575_v55, 0.0  ;;  %v577_v4 = vld [vmem:[%s4548_s3 + $0xbf8] sm:$0xff]  ;;  %v570_v35 = vld [vmem:[%s4548_s3 + $0xbc0] sm:$0xff]  ;;  %v3103_v9 = vpack.c.bf16 %v1015_v23, %v1011_v45  ;;  %v3325_v55 = vpack.c.bf16 %v1008_v54, %v1004_v29 }
  0xed   : > { %3320 = vmatprep.subr.bf16.mxu1 %v3319_v63  ;;  %v5252_v7 = vld [vmem:[%s4548_s3 + $0x3c0] sm:$0xff]  ;;  %v5260_v13 = vld [vmem:[%s4548_s3 + $0x3d0] sm:$0xff]  ;;  %v3327_v16 = vpack.c.bf16 %v1017_v46, %v1013_v15  ;;  %v3105_v31 = vpack.c.bf16 %v1014_v33, %v1010_v8  ;;  %v579_v42 = vld [vmem:[%s4548_s3 + $0xc08] sm:$0xff]  ;;  %v1025_v45 = vmax.f32 %v577_v4, 0.0  ;;  %v1018_v23 = vmax.f32 %v570_v35, 0.0 }
  0xee   : > { %6125 = vst [vmem:[#allocation49_spill] sm:$0xff] %v5252_v7  ;;  %v5256_v63 = vld [vmem:[%s4548_s3 + $0x3e0] sm:$0xff]  ;;  %6127 = vst [vmem:[#allocation51_spill] sm:$0xff] %v5260_v13  ;;  %v5265_v52 = vld [vmem:[%s4548_s3 + $0x3f0] sm:$0xff]  ;;  %v3107_v7 = vpack.c.bf16 %v1023_v21, %v1019_v12  ;;  %v6128_v54 = vlaneseq  ;;  %v6129_v15 = vmov 0  ;;  %v1027_v46 = vmax.f32 %v579_v42, 0.0 }
  0xef   : > { %3098 = vmatpush1.bf16.msra.mxu0 %v3097_v34  ;;  %6126 = vst [vmem:[#allocation50_spill] sm:$0xff] %v5256_v63  ;;  %v574_v26 = vld [vmem:[%s4548_s3 + $0xbe0] sm:$0xff]  ;;  %v583_v2 = vld [vmem:[%s4548_s3 + $0xc28] sm:$0xff]  ;;  %v3329_v34 = vpack.c.bf16 %v1016_v0, %v1012_v58  ;;  %v572_v13 = vld [vmem:[%s4548_s3 + $0xbd0] sm:$0xff]  ;;  %v6074_v58 = vmov 0.0   ;;  %v6132_v0 = vmin.f32 %v4810_v25, 0.0 }
  0xf0   : > { %3100 = vmatprep.subr.bf16.mxu0 %v3099_v6  ;;  %3322 = vmatpush1.bf16.msra.mxu1 %v3321_v20  ;;  %v1021_v6 = vmax.f32 %v573_v48, 0.0  ;;  %v576_v63 = vld [vmem:[%s4548_s3 + $0xbf0] sm:$0xff]  ;;  %v1022_v24 = vmax.f32 %v574_v26, 0.0  ;;  %v581_v20 = vld [vmem:[%s4548_s3 + $0xc18] sm:$0xff]  ;;  %vm5275_vm0 = vcmp.lt.s32.totalorder %v6128_v54, 512  ;;  %v1031_v8 = vmax.f32 %v583_v2, 0.0 }
  0xf1   : > { %3324 = vmatprep.subr.bf16.mxu1 %v3323_v41  ;;  %v585_v29 = vld [vmem:[%s4548_s3 + $0xc38] sm:$0xff]  ;;  %v6130_v15 = vsel %vm5275_vm0, 4294967295, %v6129_v15  ;;  %v578_v33 = vld [vmem:[%s4548_s3 + $0xc00] sm:$0xff]  ;;  %192 = vst.msk [vmem:[#allocation2] sm:$0xf] %vm5275_vm0, %v6074_v58  ;;  %v6134_v2 = vmin.f32 %v4822_v40, 0.0 }
  0xf2   : > { %6131 = vst [vmem:[#allocation52_spill] sm:$0xff] %v6130_v15  ;;  %v582_v41 = vld [vmem:[%s4548_s3 + $0xc20] sm:$0xff]  ;;  %193 = vst.msk [vmem:[#allocation3] sm:$0xf] %vm5275_vm0, %v6074_v58  ;;  %v6135_v21 = vmin.f32 %v4832_v53, 0.0  ;;  %v1020_v4 = vmax.f32 %v572_v13, 0.0 }
  0xf3   : > { %3102 = vmatpush1.bf16.msra.mxu0 %v3101_v57  ;;  %v6133_v57 = vmin.f32 %v4816_v32, 0.0  ;;  %v1024_v35 = vmax.f32 %v576_v63, 0.0  ;;  %v587_v42 = vld [vmem:[%s4548_s3 + $0xc48] sm:$0xff]  ;;  %v6136_v26 = vmin.f32 %v4843_v3, 0.0  ;;  %v6137_v25 = vmin.f32 %v4855_v18, 0.0 }
  0xf4   : > { %3104 = vmatprep.subr.bf16.mxu0 %v3103_v9  ;;  %v5297_v48 = vpack.c.bf16 %v6135_v21, %v6134_v2  ;;  %3326 = vmatpush1.bf16.msra.mxu1 %v3325_v55  ;;  %v591_v9 = vld [vmem:[%s4548_s3 + $0xc68] sm:$0xff]  ;;  %v6138_v54 = vmin.f32 %v4861_v28, 0.0  ;;  %v6139_v40 = vmin.f32 %v4868_v38, 0.0  ;;  %v3331_v55 = vpack.c.bf16 %v1025_v45, %v1021_v6  ;;  %v593_v6 = vld [vmem:[%s4548_s3 + $0xc78] sm:$0xff] }
  0xf5   : > { %v5291_v12 = vpack.c.bf16 %v6133_v57, %v6132_v0  ;;  %v5305_v32 = vpack.c.bf16 %v6137_v25, %v6136_v26  ;;  %3328 = vmatprep.subr.bf16.mxu1 %v3327_v16  ;;  %v1029_v13 = vmax.f32 %v581_v20, 0.0  ;;  %v1033_v63 = vmax.f32 %v585_v29, 0.0  ;;  %v580_v0 = vld [vmem:[%s4548_s3 + $0xc10] sm:$0xff]  ;;  %v589_v16 = vld [vmem:[%s4548_s3 + $0xc58] sm:$0xff] }
  0xf6   : > { %v5311_v53 = vpack.c.bf16 %v6139_v40, %v6138_v54  ;;  %v584_v57 = vld [vmem:[%s4548_s3 + $0xc30] sm:$0xff]  ;;  %v6140_v3 = vmin.f32 %v4875_v47, 0.0  ;;  %v6141_v18 = vmin.f32 %v4881_v56, 0.0  ;;  %v3109_v28 = vpack.c.bf16 %v1022_v24, %v1018_v23  ;;  %v590_v24 = vld [vmem:[%s4548_s3 + $0xc60] sm:$0xff] }
  0xf7   : > { %3106 = vmatpush1.bf16.msra.mxu0 %v3105_v31  ;;  %v1026_v21 = vmax.f32 %v578_v33, 0.0  ;;  %v1030_v38 = vmax.f32 %v582_v41, 0.0  ;;  %v6142_v45 = vmin.f32 %v4887_v1, 0.0  ;;  %v6143_v20 = vmin.f32 %v4893_v10, 0.0  ;;  %v586_v31 = vld [vmem:[%s4548_s3 + $0xc40] sm:$0xff] }
  0xf8   : > { %v5319_v2 = vpack.c.bf16 %v6141_v18, %v6140_v3  ;;  %3108 = vmatprep.subr.bf16.mxu0 %v3107_v7  ;;  %v3111_v47 = vpack.c.bf16 %v1031_v8, %v1027_v46  ;;  %v1035_v26 = vmax.f32 %v587_v42, 0.0  ;;  %v1039_v56 = vmax.f32 %v591_v9, 0.0  ;;  %3330 = vmatpush1.bf16.msra.mxu1 %v3329_v34  ;;  %v595_v7 = vld [vmem:[%s4548_s3 + $0xc88] sm:$0xff]  ;;  %v588_v34 = vld [vmem:[%s4548_s3 + $0xc50] sm:$0xff] }
  0xf9   : > { %v5327_v29 = vpack.c.bf16 %v6143_v20, %v6142_v45  ;;  %v6144_v23 = vmin.f32 %v4899_v22, 0.0  ;;  %v6145_v33 = vmin.f32 %v4905_v37, 0.0  ;;  %v3333_v1 = vpack.c.bf16 %v1024_v35, %v1020_v4  ;;  %v599_v46 = vld [vmem:[%s4548_s3 + $0xca8] sm:$0xff]  ;;  %3332 = vmatprep.subr.bf16.mxu1 %v3331_v55  ;;  %v592_v4 = vld [vmem:[%s4548_s3 + $0xc70] sm:$0xff]  ;;  %v597_v55 = vld [vmem:[%s4548_s3 + $0xc98] sm:$0xff] }
  0xfa   : > { %v1028_v25 = vmax.f32 %v580_v0, 0.0  ;;  %v1032_v10 = vmax.f32 %v584_v57, 0.0  ;;  %v6146_v8 = vmin.f32 %v4911_v49, 0.0  ;;  %v6147_v42 = vmin.f32 %v4917_v59, 0.0 }
  0xfb   : > { %v5335_v41 = vpack.c.bf16 %v6145_v33, %v6144_v23  ;;  %v3335_v22 = vpack.c.bf16 %v1033_v63, %v1029_v13  ;;  %v1037_v54 = vmax.f32 %v589_v16, 0.0  ;;  %v1041_v37 = vmax.f32 %v593_v6, 0.0  ;;  %3110 = vmatpush1.bf16.msra.mxu0 %v3109_v28  ;;  %v601_v13 = vld [vmem:[%s4548_s3 + $0xcb8] sm:$0xff]  ;;  %v594_v6 = vld [vmem:[%s4548_s3 + $0xc80] sm:$0xff]  ;;  %v596_v33 = vld [vmem:[%s4548_s3 + $0xc90] sm:$0xff] }
  0xfc   : > { %v5343_v9 = vpack.c.bf16 %v6147_v42, %v6146_v8  ;;  %v6148_v35 = vmin.f32 %v4923_v5, 0.0  ;;  %v6149_v40 = vmin.f32 %v4929_v14, 0.0  ;;  %v3113_v49 = vpack.c.bf16 %v1030_v38, %v1026_v21  ;;  %3112 = vmatprep.subr.bf16.mxu0 %v3111_v47  ;;  %v598_v28 = vld [vmem:[%s4548_s3 + $0xca0] sm:$0xff]  ;;  %3334 = vmatpush1.bf16.msra.mxu1 %v3333_v1  ;;  %v607_v47 = vld [vmem:[%s4548_s3 + $0xce8] sm:$0xff]  ;;  %v600_v1 = vld [vmem:[%s4548_s3 + $0xcb0] sm:$0xff] }
  0xfd   : > { %v1034_v57 = vmax.f32 %v586_v31, 0.0  ;;  %v1038_v59 = vmax.f32 %v590_v24, 0.0  ;;  %v6150_v63 = vmin.f32 %v4935_v27, 0.0  ;;  %v6151_v3 = vmin.f32 %v4941_v43, 0.0  ;;  %v603_v31 = vld [vmem:[%s4548_s3 + $0xcc8] sm:$0xff]  ;;  %3336 = vmatprep.subr.bf16.mxu1 %v3335_v22  ;;  %v605_v8 = vld [vmem:[%s4548_s3 + $0xcd8] sm:$0xff] }
  0xfe   : > { %v5351_v0 = vpack.c.bf16 %v6149_v40, %v6148_v35  ;;  %v3115_v5 = vpack.c.bf16 %v1039_v56, %v1035_v26  ;;  %v1043_v16 = vmax.f32 %v595_v7, 0.0  ;;  %v1047_v14 = vmax.f32 %v599_v46, 0.0  ;;  %1792 = vmatmul.mubr.f32.vlgmr.msra.gmra.mrb[0].mxu0 %v5123_v17  ;;  %v609_v42 = vld [vmem:[%s4548_s3 + $0xcf8] sm:$0xff]  ;;  %v606_v35 = vld [vmem:[%s4548_s3 + $0xce0] sm:$0xff] }
  0xff   : > { %v5359_v18 = vpack.c.bf16 %v6151_v3, %v6150_v63  ;;  %v6152_v21 = vmin.f32 %v4947_v51, 0.0  ;;  %v6153_v38 = vmin.f32 %v4953_v61, 0.0  ;;  %v3337_v27 = vpack.c.bf16 %v1032_v10, %v1028_v25  ;;  %3114 = vmatpush1.bf16.msra.mxu0 %v3113_v49  ;;  %1862 = vmatprep.mubr.f32.mxu0 %v6074_v58  ;;  %v6161_v49 = vld [vmem:[#allocation13_spill] sm:$0xff]  ;;  %v615_v63 = vld [vmem:[%s4548_s3 + $0xd28] sm:$0xff]  ;;  %v6163_v3 = vld [vmem:[#allocation14_spill] sm:$0xff] }
 0x100   : > { %v1036_v20 = vmax.f32 %v588_v34, 0.0  ;;  %v1040_v43 = vmax.f32 %v592_v4, 0.0  ;;  %v6154_v26 = vmin.f32 %v4960_v62, 0.0  ;;  %v6155_v56 = vmin.f32 %v4966_v19, 0.0  ;;  %2076 = vmatmul.mubr.f32.vlgmr.msra.gmra.mrb[0].mxu1 %v5123_v17  ;;  %3116 = vmatprep.subr.bf16.mxu0 %v3115_v5  ;;  %v602_v4 = vld [vmem:[%s4548_s3 + $0xcc0] sm:$0xff] }
 0x101   : > { %v5367_v45 = vpack.c.bf16 %v6153_v38, %v6152_v21  ;;  %v3339_v51 = vpack.c.bf16 %v1041_v37, %v1037_v54  ;;  %v1045_v61 = vmax.f32 %v597_v55, 0.0  ;;  %v1049_v23 = vmax.f32 %v601_v13, 0.0  ;;  %3338 = vmatpush1.bf16.msra.mxu1 %v3337_v27  ;;  %v611_v13 = vld [vmem:[%s4548_s3 + $0xd08] sm:$0xff]  ;;  %2146 = vmatprep.mubr.f32.mxu1 %v6074_v58  ;;  %v604_v38 = vld [vmem:[%s4548_s3 + $0xcd0] sm:$0xff] }
 0x102   : > { %v5375_v24 = vpack.c.bf16 %v6155_v56, %v6154_v26  ;;  %v6156_v25 = vmin.f32 %v4973_v39, 0.0  ;;  %v6157_v10 = vmin.f32 %v4979_v44, 0.0  ;;  %v3117_v19 = vpack.c.bf16 %v1038_v59, %v1034_v57  ;;  %v608_v27 = vld [vmem:[%s4548_s3 + $0xcf0] sm:$0xff] }
 0x103   : > { %v1042_v62 = vmax.f32 %v594_v6, 0.0  ;;  %v1046_v46 = vmax.f32 %v598_v28, 0.0  ;;  %v6158_v22 = vmin.f32 %v4985_v50, 0.0  ;;  %v6159_v54 = vmin.f32 %v4991_v60, 0.0  ;;  %3340 = vmatprep.subr.bf16.mxu1 %v3339_v51  ;;  %v613_v51 = vld [vmem:[%s4548_s3 + $0xd18] sm:$0xff] }
 0x104   : > { %v5384_v7 = vpack.c.bf16 %v6157_v10, %v6156_v25  ;;  %v3119_v44 = vpack.c.bf16 %v1047_v14, %v1043_v16  ;;  %v1051_v37 = vmax.f32 %v603_v31, 0.0  ;;  %v1055_v34 = vmax.f32 %v607_v47, 0.0  ;;  %v6165_v16 = vld [vmem:[#allocation15_spill] sm:$0xff]  ;;  %v6169_v31 = vld [vmem:[#allocation17_spill] sm:$0xff]  ;;  %3118 = vmatpush1.bf16.msra.mxu0 %v3117_v19 }
 0x105   : > { %v5393_v39 = vpack.c.bf16 %v6159_v54, %v6158_v22  ;;  %v6160_v40 = vmin.f32 %v4997_v11, 0.0  ;;  %v6162_v57 = vmin.f32 %v6161_v49, 0.0  ;;  %v3341_v50 = vpack.c.bf16 %v1040_v43, %v1036_v20  ;;  %v6167_v20 = vld [vmem:[#allocation16_spill] sm:$0xff]  ;;  %v6173_v10 = vld [vmem:[#allocation19_spill] sm:$0xff] }
 0x106   : > { %v1044_v60 = vmax.f32 %v596_v33, 0.0  ;;  %v1048_v55 = vmax.f32 %v600_v1, 0.0  ;;  %v6164_v5 = vmin.f32 %v6163_v3, 0.0  ;;  %v6166_v14 = vmin.f32 %v6165_v16, 0.0  ;;  %3120 = vmatprep.subr.bf16.mxu0 %v3119_v44  ;;  %v610_v19 = vld [vmem:[%s4548_s3 + $0xd00] sm:$0xff]  ;;  %v619_v44 = vld [vmem:[%s4548_s3 + $0xd48] sm:$0xff] }
 0x107   : > { %v5402_v59 = vpack.c.bf16 %v6162_v57, %v6160_v40  ;;  %v3343_v11 = vpack.c.bf16 %v1049_v23, %v1045_v61  ;;  %v1053_v28 = vmax.f32 %v605_v8, 0.0  ;;  %v1057_v21 = vmax.f32 %v609_v42, 0.0  ;;  %v617_v61 = vld [vmem:[%s4548_s3 + $0xd38] sm:$0xff]  ;;  %3342 = vmatpush1.bf16.msra.mxu1 %v3341_v50  ;;  %v612_v50 = vld [vmem:[%s4548_s3 + $0xd10] sm:$0xff] }
 0x108   : > { %v5411_v6 = vpack.c.bf16 %v6166_v14, %v6164_v5  ;;  %v6168_v43 = vmin.f32 %v6167_v20, 0.0  ;;  %v6170_v47 = vmin.f32 %v6169_v31, 0.0  ;;  %v3121_v56 = vpack.c.bf16 %v1046_v46, %v1042_v62  ;;  %v6171_v23 = vld [vmem:[#allocation18_spill] sm:$0xff]  ;;  %v614_v62 = vld [vmem:[%s4548_s3 + $0xd20] sm:$0xff]  ;;  %v6175_v46 = vld [vmem:[#allocation20_spill] sm:$0xff] }
 0x109   : > { %v1050_v33 = vmax.f32 %v602_v4, 0.0  ;;  %v1054_v1 = vmax.f32 %v606_v35, 0.0  ;;  %v6172_v25 = vmin.f32 %v6171_v23, 0.0  ;;  %v6174_v8 = vmin.f32 %v6173_v10, 0.0  ;;  %v6177_v35 = vld [vmem:[#allocation21_spill] sm:$0xff]  ;;  %3344 = vmatprep.subr.bf16.mxu1 %v3343_v11  ;;  %v621_v11 = vld [vmem:[%s4548_s3 + $0xd58] sm:$0xff] }
 0x10a   : > { %v5419_v26 = vpack.c.bf16 %v6170_v47, %v6168_v43  ;;  %v3123_v22 = vpack.c.bf16 %v1055_v34, %v1051_v37  ;;  %v1059_v54 = vmax.f32 %v611_v13, 0.0  ;;  %v1063_v40 = vmax.f32 %v615_v63, 0.0  ;;  %v623_v37 = vld [vmem:[%s4548_s3 + $0xd68] sm:$0xff]  ;;  %v6179_v34 = vld [vmem:[#allocation22_spill] sm:$0xff]  ;;  %v6181_v63 = vld [vmem:[#allocation23_spill] sm:$0xff]  ;;  %3122 = vmatpush1.bf16.msra.mxu0 %v3121_v56 }
 0x10b   : > { %v5427_v42 = vpack.c.bf16 %v6174_v8, %v6172_v25  ;;  %v6176_v4 = vmin.f32 %v6175_v46, 0.0  ;;  %v6178_v49 = vmin.f32 %v6177_v35, 0.0  ;;  %v3345_v3 = vpack.c.bf16 %v1048_v55, %v1044_v60  ;;  %v616_v60 = vld [vmem:[%s4548_s3 + $0xd30] sm:$0xff]  ;;  %v6183_v55 = vld [vmem:[#allocation24_spill] sm:$0xff]  ;;  %v618_v56 = vld [vmem:[%s4548_s3 + $0xd40] sm:$0xff] }
 0x10c   : > { %v1052_v5 = vmax.f32 %v604_v38, 0.0  ;;  %v1056_v16 = vmax.f32 %v608_v27, 0.0  ;;  %v6180_v13 = vmin.f32 %v6179_v34, 0.0  ;;  %v6182_v14 = vmin.f32 %v6181_v63, 0.0  ;;  %v6185_v27 = vld [vmem:[#allocation25_spill] sm:$0xff]  ;;  %3124 = vmatprep.subr.bf16.mxu0 %v3123_v22  ;;  %v627_v22 = vld [vmem:[%s4548_s3 + $0xd88] sm:$0xff] }
 0x10d   : > { %v5435_v57 = vpack.c.bf16 %v6178_v49, %v6176_v4  ;;  %v3347_v43 = vpack.c.bf16 %v1057_v21, %v1053_v28  ;;  %v1061_v31 = vmax.f32 %v613_v51, 0.0  ;;  %v1065_v47 = vmax.f32 %v617_v61, 0.0  ;;  %v625_v28 = vld [vmem:[%s4548_s3 + $0xd78] sm:$0xff]  ;;  %v6189_v61 = vld [vmem:[#allocation27_spill] sm:$0xff]  ;;  %3346 = vmatpush1.bf16.msra.mxu1 %v3345_v3  ;;  %v620_v3 = vld [vmem:[%s4548_s3 + $0xd50] sm:$0xff] }
 0x10e   : > { %v5443_v20 = vpack.c.bf16 %v6182_v14, %v6180_v13  ;;  %v6184_v38 = vmin.f32 %v6183_v55, 0.0  ;;  %v6186_v23 = vmin.f32 %v6185_v27, 0.0  ;;  %v3125_v10 = vpack.c.bf16 %v1054_v1, %v1050_v33  ;;  %v6187_v21 = vld [vmem:[#allocation26_spill] sm:$0xff]  ;;  %v622_v33 = vld [vmem:[%s4548_s3 + $0xd60] sm:$0xff]  ;;  %v6191_v1 = vld [vmem:[#allocation29_spill] sm:$0xff] }
 0x10f   : > { %v1058_v8 = vmax.f32 %v610_v19, 0.0  ;;  %v1062_v46 = vmax.f32 %v614_v62, 0.0  ;;  %v6188_v51 = vmin.f32 %v6187_v21, 0.0  ;;  %v6190_v4 = vmin.f32 %v6189_v61, 0.0  ;;  %v6193_v62 = vld [vmem:[#allocation30_spill] sm:$0xff]  ;;  %3348 = vmatprep.subr.bf16.mxu1 %v3347_v43 }
 0x110   : > { %v5451_v25 = vpack.c.bf16 %v6186_v23, %v6184_v38  ;;  %v3127_v49 = vpack.c.bf16 %v1063_v40, %v1059_v54  ;;  %v1067_v34 = vmax.f32 %v619_v44, 0.0  ;;  %v1071_v13 = vmax.f32 %v623_v37, 0.0  ;;  %v631_v54 = vld [vmem:[%s4548_s3 + $0xda8] sm:$0xff]  ;;  %v6195_v40 = vld [vmem:[#allocation31_spill] sm:$0xff]  ;;  %v6197_v37 = vld [vmem:[#allocation34_spill] sm:$0xff]  ;;  %3126 = vmatpush1.bf16.msra.mxu0 %v3125_v10 }
 0x111   : > { %v5459_v35 = vpack.c.bf16 %v6190_v4, %v6188_v51  ;;  %v6192_v19 = vmin.f32 %v6191_v1, 0.0  ;;  %v6194_v63 = vmin.f32 %v6193_v62, 0.0  ;;  %v3349_v55 = vpack.c.bf16 %v1056_v16, %v1052_v5  ;;  %v624_v5 = vld [vmem:[%s4548_s3 + $0xd70] sm:$0xff]  ;;  %v6199_v16 = vld [vmem:[#allocation35_spill] sm:$0xff]  ;;  %v629_v43 = vld [vmem:[%s4548_s3 + $0xd98] sm:$0xff] }
 0x112   : > { %v1060_v38 = vmax.f32 %v612_v50, 0.0  ;;  %v1064_v27 = vmax.f32 %v616_v60, 0.0  ;;  %v6196_v44 = vmin.f32 %v6195_v40, 0.0  ;;  %v6198_v23 = vmin.f32 %v6197_v37, 0.0  ;;  %v6201_v60 = vld [vmem:[#allocation36_spill] sm:$0xff]  ;;  %3128 = vmatprep.subr.bf16.mxu0 %v3127_v49  ;;  %v626_v10 = vld [vmem:[%s4548_s3 + $0xd80] sm:$0xff] }
 0x113   : > { %v5467_v14 = vpack.c.bf16 %v6194_v63, %v6192_v19  ;;  %v3351_v51 = vpack.c.bf16 %v1065_v47, %v1061_v31  ;;  %v1069_v61 = vmax.f32 %v621_v11, 0.0  ;;  %v1073_v4 = vmax.f32 %v625_v28, 0.0  ;;  %v633_v31 = vld [vmem:[%s4548_s3 + $0xdb8] sm:$0xff]  ;;  %v6203_v47 = vld [vmem:[#allocation37_spill] sm:$0xff]  ;;  %3350 = vmatpush1.bf16.msra.mxu1 %v3349_v55  ;;  %v635_v49 = vld [vmem:[%s4548_s3 + $0xdc8] sm:$0xff] }
 0x114   : > { %v5475_v21 = vpack.c.bf16 %v6198_v23, %v6196_v44  ;;  %v6200_v50 = vmin.f32 %v6199_v16, 0.0  ;;  %v6202_v1 = vmin.f32 %v6201_v60, 0.0  ;;  %v3129_v62 = vpack.c.bf16 %v1062_v46, %v1058_v8  ;;  %v6205_v28 = vld [vmem:[#allocation38_spill] sm:$0xff]  ;;  %v630_v8 = vld [vmem:[%s4548_s3 + $0xda0] sm:$0xff]  ;;  %v628_v55 = vld [vmem:[%s4548_s3 + $0xd90] sm:$0xff] }
 0x115   : > { %v1066_v63 = vmax.f32 %v618_v56, 0.0  ;;  %v1070_v40 = vmax.f32 %v622_v33, 0.0  ;;  %v6204_v11 = vmin.f32 %v6203_v47, 0.0  ;;  %v6206_v44 = vmin.f32 %v6205_v28, 0.0  ;;  %v6207_v46 = vld [vmem:[#allocation39_spill] sm:$0xff]  ;;  %v6209_v33 = vld [vmem:[#allocation40_spill] sm:$0xff]  ;;  %3352 = vmatprep.subr.bf16.mxu1 %v3351_v51 }
 0x116   : > { %v5483_v19 = vpack.c.bf16 %v6202_v1, %v6200_v50  ;;  %v3131_v23 = vpack.c.bf16 %v1071_v13, %v1067_v34  ;;  %v1075_v16 = vmax.f32 %v627_v22, 0.0  ;;  %v1079_v50 = vmax.f32 %v631_v54, 0.0  ;;  %v639_v34 = vld [vmem:[%s4548_s3 + $0xde8] sm:$0xff]  ;;  %v6211_v13 = vld [vmem:[#allocation41_spill] sm:$0xff]  ;;  %v6213_v54 = vld [vmem:[#allocation42_spill] sm:$0xff]  ;;  %3130 = vmatpush1.bf16.msra.mxu0 %v3129_v62 }
 0x117   : > { %v5491_v37 = vpack.c.bf16 %v6206_v44, %v6204_v11  ;;  %v6208_v56 = vmin.f32 %v6207_v46, 0.0  ;;  %v6210_v60 = vmin.f32 %v6209_v33, 0.0  ;;  %v3353_v47 = vpack.c.bf16 %v1064_v27, %v1060_v38  ;;  %v632_v38 = vld [vmem:[%s4548_s3 + $0xdb0] sm:$0xff]  ;;  %v6216_v27 = vld [vmem:[#allocation43_spill] sm:$0xff] }
 0x118   : > { %v1068_v58 = vmax.f32 %v620_v3, 0.0  ;;  %v1072_v11 = vmax.f32 %v624_v5, 0.0  ;;  %v6212_v22 = vmin.f32 %v6211_v13, 0.0  ;;  %v6214_v28 = vmin.f32 %v6213_v54, 0.0  ;;  %v6218_v5 = vld [vmem:[#allocation44_spill] sm:$0xff]  ;;  %v6221_v51 = vld [vmem:[#allocation45_spill] sm:$0xff]  ;;  %3132 = vmatprep.subr.bf16.mxu0 %v3131_v23 }
 0x119   : > { %v5499_v1 = vpack.c.bf16 %v6210_v60, %v6208_v56  ;;  %v3355_v46 = vpack.c.bf16 %v1073_v4, %v1069_v61  ;;  %v1077_v15 = vmax.f32 %v629_v43, 0.0  ;;  %v1081_v56 = vmax.f32 %v633_v31, 0.0  ;;  %v6223_v4 = vld [vmem:[#allocation46_spill] sm:$0xff]  ;;  %v6226_v62 = vld [vmem:[#allocation47_spill] sm:$0xff]  ;;  %3354 = vmatpush1.bf16.msra.mxu1 %v3353_v47 }
 0x11a   : > { %v5507_v44 = vpack.c.bf16 %v6214_v28, %v6212_v22  ;;  %v6217_v3 = vmin.f32 %v6216_v27, 0.0  ;;  %v6219_v33 = vmin.f32 %v6218_v5, 0.0  ;;  %v3133_v13 = vpack.c.bf16 %v1070_v40, %v1066_v63  ;;  %v637_v22 = vld [vmem:[%s4548_s3 + $0xdd8] sm:$0xff]  ;;  %v6228_v40 = vld [vmem:[#allocation48_spill] sm:$0xff] }
 0x11b   : > { %v1074_v17 = vmax.f32 %v626_v10, 0.0  ;;  %v1078_v54 = vmax.f32 %v630_v8, 0.0  ;;  %v641_v28 = vld [vmem:[%s4548_s3 + $0xdf8] sm:$0xff]  ;;  %v6222_v61 = vmin.f32 %v6221_v51, 0.0  ;;  %v6224_v43 = vmin.f32 %v6223_v4, 0.0  ;;  %3356 = vmatprep.subr.bf16.mxu1 %v3355_v46 }
 0x11c   : > { %6215 = vst [vmem:[#allocation13_spill] sm:$0xff] %v5507_v44  ;;  %v5515_v60 = vpack.c.bf16 %v6219_v33, %v6217_v3  ;;  %v3135_v44 = vpack.c.bf16 %v1079_v50, %v1075_v16  ;;  %v1083_v27 = vmax.f32 %v635_v49, 0.0  ;;  %v1087_v5 = vmax.f32 %v639_v34, 0.0  ;;  %v634_v3 = vld [vmem:[%s4548_s3 + $0xdc0] sm:$0xff]  ;;  %3134 = vmatpush1.bf16.msra.mxu0 %v3133_v13  ;;  %v6239_v13 = vld [vmem:[#allocation28_spill] sm:$0xff] }
 0x11d   : > { %v5523_v31 = vpack.c.bf16 %v6224_v43, %v6222_v61  ;;  %v638_v33 = vld [vmem:[%s4548_s3 + $0xde0] sm:$0xff]  ;;  %v6227_v63 = vmin.f32 %v6226_v62, 0.0  ;;  %v6229_v10 = vmin.f32 %v6228_v40, 0.0  ;;  %v3357_v51 = vpack.c.bf16 %v1072_v11, %v1068_v58  ;;  %v636_v43 = vld [vmem:[%s4548_s3 + $0xdd0] sm:$0xff] }
 0x11e   : > { %6220 = vst [vmem:[#allocation14_spill] sm:$0xff] %v5515_v60  ;;  %v1076_v60 = vmax.f32 %v628_v55, 0.0  ;;  %v1080_v4 = vmax.f32 %v632_v38, 0.0  ;;  %v6230_v61 = vmin.f32 %v5241_v30, 0.0  ;;  %v6231_v23 = vmin.f32 %v5245_v36, 0.0  ;;  %v640_v62 = vld [vmem:[%s4548_s3 + $0xdf0] sm:$0xff]  ;;  %3136 = vmatprep.subr.bf16.mxu0 %v3135_v44 }
 0x11f   : > { %6225 = vst [vmem:[#allocation15_spill] sm:$0xff] %v5523_v31  ;;  %v5531_v8 = vpack.c.bf16 %v6229_v10, %v6227_v63  ;;  %v3359_v50 = vpack.c.bf16 %v1081_v56, %v1077_v15  ;;  %v1085_v49 = vmax.f32 %v637_v22, 0.0  ;;  %v1089_v34 = vmax.f32 %v641_v28, 0.0  ;;  %v6232_v31 = vld [vmem:[#allocation49_spill] sm:$0xff]  ;;  %v6234_v63 = vld [vmem:[#allocation50_spill] sm:$0xff]  ;;  %v6236_v36 = vld [vmem:[#allocation51_spill] sm:$0xff]  ;;  %3358 = vmatpush1.bf16.msra.mxu1 %v3357_v51 }
 0x120   : > { %v5537_v16 = vpack.c.bf16 %v6231_v23, %v6230_v61  ;;  %v6233_v40 = vmin.f32 %v6232_v31, 0.0  ;;  %v6235_v10 = vmin.f32 %v6234_v63, 0.0  ;;  %v3137_v58 = vpack.c.bf16 %v1078_v54, %v1074_v17  ;;  %v3972_v44 = vld [vmem:[%s4548_s3 + $0x68] sm:$0xff]  ;;  %v3973_v51 = vld [vmem:[%s4548_s3 + $0x58] sm:$0xff] }
 0x121   : > { %v1082_v30 = vmax.f32 %v634_v3, 0.0  ;;  %v1086_v11 = vmax.f32 %v638_v33, 0.0  ;;  %v6237_v55 = vmin.f32 %v6236_v36, 0.0  ;;  %v6238_v46 = vmin.f32 %v5265_v52, 0.0  ;;  %3360 = vmatprep.subr.bf16.mxu1 %v3359_v50  ;;  %v3971_v52 = vld [vmem:[%s4548_s3 + $0x48] sm:$0xff]  ;;  %v3974_v61 = vld [vmem:[%s4548_s3 + $0x78] sm:$0xff] }
 0x122   : > { %v5545_v47 = vpack.c.bf16 %v6235_v10, %v6233_v40  ;;  %v3139_v56 = vpack.c.bf16 %v1087_v5, %v1083_v27  ;;  %v3361_v38 = vpack.c.bf16 %v1080_v4, %v1076_v60  ;;  %v1084_v22 = vmax.f32 %v636_v43, 0.0  ;;  %3138 = vmatpush1.bf16.msra.mxu0 %v3137_v58  ;;  %v6240_v5 = vld [vmem:[#allocation8_spill] sm:$0xff]  ;;  %v3977_v63 = vld [vmem:[%s4548_s3 + $0x98] sm:$0xff] }
 0x123   : > { %v5551_v15 = vpack.c.bf16 %v6238_v46, %v6237_v55  ;;  %v1088_v28 = vmax.f32 %v640_v62, 0.0  ;;  %v3363_v17 = vpack.c.bf16 %v1089_v34, %v1085_v49  ;;  %v1562_v54 = vcombine.high %v6239_v13, %v6239_v13  ;;  %v3975_v49 = vld [vmem:[%s4548_s3 + $0x88] sm:$0xff]  ;;  %v3978_v58 = vld [vmem:[%s4548_s3 + $0xb8] sm:$0xff] }
 0x124   : > { %v3141_v31 = vpack.c.bf16 %v1086_v11, %v1082_v30  ;;  %3140 = vmatprep.subr.bf16.mxu0 %v3139_v56  ;;  %v1099_v3 = vmin.f32 %v3971_v52, 0.0  ;;  %v1103_v27 = vmin.f32 %v3972_v44, 0.0  ;;  %3362 = vmatpush1.bf16.msra.mxu1 %v3361_v38  ;;  %v1101_v4 = vmin.f32 %v3973_v51, 0.0  ;;  %v3976_v43 = vld [vmem:[%s4548_s3 + $0xa8] sm:$0xff] }
 0x125   : > { %v3365_v60 = vpack.c.bf16 %v1088_v28, %v1084_v22  ;;  %3364 = vmatprep.subr.bf16.mxu1 %v3363_v17  ;;  %v5558_v33 = vrot.slane %v1562_v54, %v6240_v5  ;;  %v1105_v23 = vmin.f32 %v3974_v61, 0.0  ;;  %v1107_v34 = vmin.f32 %v3975_v49, 0.0  ;;  %v3979_v36 = vld [vmem:[%s4548_s3 + $0xc8] sm:$0xff]  ;;  %v3982_v22 = vld [vmem:[%s4548_s3 + $0xf8] sm:$0xff] }
 0x126   : > { %3142 = vmatpush1.bf16.msra.mxu0 %v3141_v31  ;;  %v3371_v50 = vpack.c.bf16 %v1103_v27, %v1099_v3  ;;  %v1111_v62 = vmin.f32 %v3976_v43, 0.0  ;;  %v1109_v10 = vmin.f32 %v3977_v63, 0.0  ;;  %v1113_v30 = vmin.f32 %v3978_v58, 0.0  ;;  %v3983_v13 = vld [vmem:[%s4548_s3 + $0x108] sm:$0xff]  ;;  %v3985_v3 = vld [vmem:[%s4548_s3 + $0x118] sm:$0xff] }
 0x127   : > { %3368 = vmatprep.subr.bf16.mxu0 %v5291_v12  ;;  %v3595_v40 = vpack.c.bf16 %v1105_v23, %v1101_v4  ;;  %v6241_v12 = vld [vmem:[#allocation10_spill] sm:$0xff]  ;;  %v1115_v55 = vmin.f32 %v3979_v36, 0.0  ;;  %v1121_v28 = vmin.f32 %v3982_v22, 0.0  ;;  %v1123_v54 = vmin.f32 %v3983_v13, 0.0  ;;  %v3984_v31 = vld [vmem:[%s4548_s3 + $0x128] sm:$0xff] }
 0x128   : > { %3366 = vmatpush1.bf16.msra.mxu1 %v3365_v60  ;;  %v3375_v11 = vpack.c.bf16 %v1111_v62, %v1107_v34  ;;  %v3599_v56 = vpack.c.bf16 %v1113_v30, %v1109_v10  ;;  %v1125_v44 = vmin.f32 %v3985_v3, 0.0  ;;  %v3986_v27 = vld [vmem:[%s4548_s3 + $0x138] sm:$0xff]  ;;  %v3987_v5 = vld [vmem:[%s4548_s3 + $0x148] sm:$0xff] }
 0x129   : > { %1863 = vmatmul.mubr.f32.vlgmr.msra.gmra.mrb[0].mxu0 %v5558_v33  ;;  %3592 = vmatprep.subr.bf16.mxu1 %v5297_v48  ;;  %v3980_v48 = vld [vmem:[%s4548_s3 + $0xe8] sm:$0xff]  ;;  %v1129_v60 = vmin.f32 %v3986_v27, 0.0  ;;  %v1131_v51 = vmin.f32 %v3987_v5, 0.0  ;;  %v3989_v23 = vld [vmem:[%s4548_s3 + $0x158] sm:$0xff] }
 0x12a   : > { %3370 = vmatpush1.bf16.msra.mxu0 %v5305_v32  ;;  %2217 = vmatprep.mubr.f32.mxu0 %v6241_v12  ;;  %v1119_v46 = vmin.f32 %v3980_v48, 0.0  ;;  %v3981_v32 = vld [vmem:[%s4548_s3 + $0xd8] sm:$0xff]  ;;  %v3988_v4 = vld [vmem:[%s4548_s3 + $0x168] sm:$0xff] }
 0x12b   : > { %2147 = vmatmul.mubr.f32.vlgmr.msra.gmra.mrb[0].mxu1 %v5558_v33  ;;  %3372 = vmatprep.subr.bf16.mxu0 %v3371_v50  ;;  %v1117_v38 = vmin.f32 %v3981_v32, 0.0  ;;  %v1135_v61 = vmin.f32 %v3988_v4, 0.0  ;;  %v1133_v50 = vmin.f32 %v3989_v23, 0.0  ;;  %v3990_v49 = vld [vmem:[%s4548_s3 + $0x178] sm:$0xff]  ;;  %v3991_v43 = vld [vmem:[%s4548_s3 + $0x188] sm:$0xff] }
 0x12c   : > { %3594 = vmatpush1.bf16.msra.mxu1 %v5311_v53  ;;  %2501 = vmatprep.mubr.f32.mxu1 %v6241_v12  ;;  %v3379_v17 = vpack.c.bf16 %v1119_v46, %v1115_v55  ;;  %v1127_v53 = vmin.f32 %v3984_v31, 0.0  ;;  %v1137_v34 = vmin.f32 %v3990_v49, 0.0  ;;  %v1139_v62 = vmin.f32 %v3991_v43, 0.0  ;;  %v3993_v10 = vld [vmem:[%s4548_s3 + $0x198] sm:$0xff]  ;;  %v3996_v55 = vld [vmem:[%s4548_s3 + $0x1e8] sm:$0xff] }
 0x12d   : > { %3596 = vmatprep.subr.bf16.mxu1 %v3595_v40  ;;  %v3603_v52 = vpack.c.bf16 %v1121_v28, %v1117_v38  ;;  %v3992_v40 = vld [vmem:[%s4548_s3 + $0x1a8] sm:$0xff]  ;;  %v1141_v58 = vmin.f32 %v3993_v10, 0.0  ;;  %v3994_v30 = vld [vmem:[%s4548_s3 + $0x1b8] sm:$0xff]  ;;  %v1151_v48 = vmin.f32 %v3996_v55, 0.0 }
 0x12e   : > { %3374 = vmatpush1.bf16.msra.mxu0 %v5319_v2  ;;  %v3383_v2 = vpack.c.bf16 %v1127_v53, %v1123_v54  ;;  %v1143_v63 = vmin.f32 %v3992_v40, 0.0  ;;  %v1145_v12 = vmin.f32 %v3994_v30, 0.0  ;;  %v3997_v46 = vld [vmem:[%s4548_s3 + $0x1d8] sm:$0xff]  ;;  %v3999_v22 = vld [vmem:[%s4548_s3 + $0x208] sm:$0xff] }
 0x12f   : > { %3376 = vmatprep.subr.bf16.mxu0 %v3375_v11  ;;  %v3995_v11 = vld [vmem:[%s4548_s3 + $0x1c8] sm:$0xff]  ;;  %v3998_v32 = vld [vmem:[%s4548_s3 + $0x1f8] sm:$0xff]  ;;  %v1155_v28 = vmin.f32 %v3999_v22, 0.0 }
 0x130   : > { %3598 = vmatpush1.bf16.msra.mxu1 %v5327_v29  ;;  %v3607_v29 = vpack.c.bf16 %v1129_v60, %v1125_v44  ;;  %v1147_v36 = vmin.f32 %v3995_v11, 0.0  ;;  %v1153_v38 = vmin.f32 %v3998_v32, 0.0  ;;  %v4001_v54 = vld [vmem:[%s4548_s3 + $0x218] sm:$0xff]  ;;  %v4003_v3 = vld [vmem:[%s4548_s3 + $0x248] sm:$0xff] }
 0x131   : > { %3600 = vmatprep.subr.bf16.mxu1 %v3599_v56  ;;  %v1149_v56 = vmin.f32 %v3997_v46, 0.0  ;;  %v1157_v31 = vmin.f32 %v4001_v54, 0.0  ;;  %v4002_v53 = vld [vmem:[%s4548_s3 + $0x238] sm:$0xff]  ;;  %v1163_v44 = vmin.f32 %v4003_v3, 0.0  ;;  %v4004_v27 = vld [vmem:[%s4548_s3 + $0x268] sm:$0xff] }
 0x132   : > { %3378 = vmatpush1.bf16.msra.mxu0 %v5335_v41  ;;  %v3387_v41 = vpack.c.bf16 %v1135_v61, %v1131_v51  ;;  %v1167_v60 = vmin.f32 %v4004_v27, 0.0  ;;  %v4006_v51 = vld [vmem:[%s4548_s3 + $0x278] sm:$0xff]  ;;  %v4007_v61 = vld [vmem:[%s4548_s3 + $0x288] sm:$0xff] }
 0x133   : > { %3380 = vmatprep.subr.bf16.mxu0 %v3379_v17  ;;  %v4000_v17 = vld [vmem:[%s4548_s3 + $0x228] sm:$0xff]  ;;  %v1169_v4 = vmin.f32 %v4006_v51, 0.0  ;;  %v4009_v49 = vld [vmem:[%s4548_s3 + $0x298] sm:$0xff]  ;;  %v6242_v51 = vld [vmem:[#allocation13_spill] sm:$0xff] }
 0x134   : > { %3602 = vmatpush1.bf16.msra.mxu1 %v5343_v9  ;;  %v3611_v9 = vpack.c.bf16 %v1137_v34, %v1133_v50  ;;  %v1159_v13 = vmin.f32 %v4000_v17, 0.0  ;;  %v4008_v23 = vld [vmem:[%s4548_s3 + $0x2a8] sm:$0xff]  ;;  %v1173_v34 = vmin.f32 %v4009_v49, 0.0  ;;  %v4013_v10 = vld [vmem:[%s4548_s3 + $0x2d8] sm:$0xff] }
 0x135   : > { %3604 = vmatprep.subr.bf16.mxu1 %v3603_v52  ;;  %v1161_v52 = vmin.f32 %v4002_v53, 0.0  ;;  %v1175_v50 = vmin.f32 %v4008_v23, 0.0  ;;  %v4014_v30 = vld [vmem:[%s4548_s3 + $0x2f8] sm:$0xff]  ;;  %v4019_v32 = vld [vmem:[%s4548_s3 + $0x348] sm:$0xff] }
 0x136   : > { %3382 = vmatpush1.bf16.msra.mxu0 %v5351_v0  ;;  %v3391_v0 = vpack.c.bf16 %v1143_v63, %v1139_v62  ;;  %v4011_v62 = vld [vmem:[%s4548_s3 + $0x2c8] sm:$0xff]  ;;  %v4018_v46 = vld [vmem:[%s4548_s3 + $0x338] sm:$0xff] }
 0x137   : > { %3384 = vmatprep.subr.bf16.mxu0 %v3383_v2  ;;  %v4005_v2 = vld [vmem:[%s4548_s3 + $0x258] sm:$0xff]  ;;  %v1179_v40 = vmin.f32 %v4011_v62, 0.0  ;;  %v4012_v63 = vld [vmem:[%s4548_s3 + $0x2e8] sm:$0xff] }
 0x138   : > { %3606 = vmatpush1.bf16.msra.mxu1 %v5359_v18  ;;  %v3615_v18 = vpack.c.bf16 %v1145_v12, %v1141_v58  ;;  %v1165_v5 = vmin.f32 %v4005_v2, 0.0  ;;  %v1181_v58 = vmin.f32 %v4013_v10, 0.0  ;;  %v1185_v12 = vmin.f32 %v4014_v30, 0.0  ;;  %v4023_v54 = vld [vmem:[%s4548_s3 + $0x388] sm:$0xff]  ;;  %v6243_v23 = vld [vmem:[#allocation14_spill] sm:$0xff]  ;;  %v4036_v10 = vld [vmem:[%s4548_s3 + $0x420] sm:$0xff] }
 0x139   : > { %3608 = vmatprep.subr.bf16.mxu1 %v3607_v29  ;;  %v1171_v29 = vmin.f32 %v4007_v61, 0.0  ;;  %v4024_v53 = vld [vmem:[%s4548_s3 + $0x3a8] sm:$0xff]  ;;  %v4030_v61 = vld [vmem:[%s4548_s3 + $0x3f8] sm:$0xff] }
 0x13a   : > { %3386 = vmatpush1.bf16.msra.mxu0 %v5367_v45  ;;  %v3395_v45 = vpack.c.bf16 %v1151_v48, %v1147_v36  ;;  %v4016_v36 = vld [vmem:[%s4548_s3 + $0x328] sm:$0xff]  ;;  %v4017_v48 = vld [vmem:[%s4548_s3 + $0x318] sm:$0xff] }
 0x13b   : > { %3388 = vmatprep.subr.bf16.mxu0 %v3387_v41  ;;  %v4010_v41 = vld [vmem:[%s4548_s3 + $0x2b8] sm:$0xff]  ;;  %v1191_v55 = vmin.f32 %v4016_v36, 0.0  ;;  %v4028_v2 = vld [vmem:[%s4548_s3 + $0x3e8] sm:$0xff]  ;;  %v4039_v36 = vld [vmem:[%s4548_s3 + $0x410] sm:$0xff] }
 0x13c   : > { %3610 = vmatpush1.bf16.msra.mxu1 %v5375_v24  ;;  %v3619_v24 = vpack.c.bf16 %v1153_v38, %v1149_v56  ;;  %v1177_v43 = vmin.f32 %v4010_v41, 0.0  ;;  %v1193_v56 = vmin.f32 %v4018_v46, 0.0  ;;  %v1195_v38 = vmin.f32 %v4019_v32, 0.0  ;;  %v4032_v49 = vld [vmem:[%s4548_s3 + $0x428] sm:$0xff]  ;;  %v6244_v41 = vld [vmem:[#allocation15_spill] sm:$0xff] }
 0x13d   : > { %3612 = vmatprep.subr.bf16.mxu1 %v3611_v9  ;;  %v1183_v9 = vmin.f32 %v4012_v63, 0.0 }
 0x13e   : > { %3390 = vmatpush1.bf16.msra.mxu0 %v5384_v7  ;;  %v3399_v7 = vpack.c.bf16 %v1159_v13, %v1155_v28  ;;  %v4021_v28 = vld [vmem:[%s4548_s3 + $0x358] sm:$0xff] }
 0x13f   : > { %3392 = vmatprep.subr.bf16.mxu0 %v3391_v0  ;;  %v4015_v0 = vld [vmem:[%s4548_s3 + $0x308] sm:$0xff]  ;;  %v1197_v17 = vmin.f32 %v4021_v28, 0.0  ;;  %v4022_v13 = vld [vmem:[%s4548_s3 + $0x378] sm:$0xff] }
 0x140   : > { %3614 = vmatpush1.bf16.msra.mxu1 %v5393_v39  ;;  %v3623_v39 = vpack.c.bf16 %v1161_v52, %v1157_v31  ;;  %v1187_v11 = vmin.f32 %v4015_v0, 0.0  ;;  %v1203_v31 = vmin.f32 %v4023_v54, 0.0  ;;  %v1207_v52 = vmin.f32 %v4024_v53, 0.0  ;;  %v4038_v0 = vld [vmem:[%s4548_s3 + $0x468] sm:$0xff] }
 0x141   : > { %3616 = vmatprep.subr.bf16.mxu1 %v3615_v18  ;;  %v1189_v18 = vmin.f32 %v4017_v48, 0.0  ;;  %v4045_v28 = vld [vmem:[%s4548_s3 + $0x488] sm:$0xff] }
 0x142   : > { %3394 = vmatpush1.bf16.msra.mxu0 %v5402_v59  ;;  %v3403_v59 = vpack.c.bf16 %v1167_v60, %v1163_v44  ;;  %v4026_v44 = vld [vmem:[%s4548_s3 + $0x3b8] sm:$0xff]  ;;  %v4027_v60 = vld [vmem:[%s4548_s3 + $0x3c8] sm:$0xff] }
 0x143   : > { %3396 = vmatprep.subr.bf16.mxu0 %v3395_v45  ;;  %v4020_v45 = vld [vmem:[%s4548_s3 + $0x368] sm:$0xff]  ;;  %v1209_v27 = vmin.f32 %v4026_v44, 0.0  ;;  %v4050_v44 = vld [vmem:[%s4548_s3 + $0x4b8] sm:$0xff] }
 0x144   : > { %3618 = vmatpush1.bf16.msra.mxu1 %v5411_v6  ;;  %v3627_v6 = vpack.c.bf16 %v1169_v4, %v1165_v5  ;;  %v1199_v22 = vmin.f32 %v4020_v45, 0.0  ;;  %v1215_v5 = vmin.f32 %v4028_v2, 0.0  ;;  %v4029_v4 = vld [vmem:[%s4548_s3 + $0x3d8] sm:$0xff] }
 0x145   : > { %3620 = vmatprep.subr.bf16.mxu1 %v3619_v24  ;;  %v1201_v24 = vmin.f32 %v4022_v13, 0.0  ;;  %v4046_v13 = vld [vmem:[%s4548_s3 + $0x4a8] sm:$0xff] }
 0x146   : > { %3398 = vmatpush1.bf16.msra.mxu0 %v5419_v26  ;;  %v3407_v26 = vpack.c.bf16 %v1175_v50, %v1171_v29  ;;  %v1217_v29 = vmin.f32 %v4030_v61, 0.0  ;;  %v4031_v50 = vld [vmem:[%s4548_s3 + $0x408] sm:$0xff] }
 0x147   : > { %3400 = vmatprep.subr.bf16.mxu0 %v3399_v7  ;;  %v4025_v7 = vld [vmem:[%s4548_s3 + $0x398] sm:$0xff] }
 0x148   : > { %3622 = vmatpush1.bf16.msra.mxu1 %v5427_v42  ;;  %v3631_v42 = vpack.c.bf16 %v1177_v43, %v1173_v34  ;;  %v1205_v3 = vmin.f32 %v4025_v7, 0.0  ;;  %v1223_v34 = vmin.f32 %v4032_v49, 0.0  ;;  %v4049_v7 = vld [vmem:[%s4548_s3 + $0x498] sm:$0xff] }
 0x149   : > { %3624 = vmatprep.subr.bf16.mxu1 %v3623_v39  ;;  %v1211_v39 = vmin.f32 %v4027_v60, 0.0 }
 0x14a   : > { %3402 = vmatpush1.bf16.msra.mxu0 %v5435_v57  ;;  %v3411_v57 = vpack.c.bf16 %v1183_v9, %v1179_v40  ;;  %v4034_v40 = vld [vmem:[%s4548_s3 + $0x438] sm:$0xff]  ;;  %v4035_v9 = vld [vmem:[%s4548_s3 + $0x400] sm:$0xff] }
 0x14b   : > { %3404 = vmatprep.subr.bf16.mxu0 %v3403_v59  ;;  %v1213_v59 = vmin.f32 %v4029_v4, 0.0  ;;  %v1225_v63 = vmin.f32 %v4034_v40, 0.0  ;;  %v4059_v40 = vld [vmem:[%s4548_s3 + $0x4c0] sm:$0xff] }
 0x14c   : > { %3626 = vmatpush1.bf16.msra.mxu1 %v5443_v20  ;;  %v3635_v20 = vpack.c.bf16 %v1185_v12, %v1181_v58  ;;  %v1222_v58 = vmin.f32 %v4036_v10, 0.0  ;;  %v4037_v12 = vld [vmem:[%s4548_s3 + $0x448] sm:$0xff] }
 0x14d   : > { %3628 = vmatprep.subr.bf16.mxu1 %v3627_v6  ;;  %v1219_v6 = vmin.f32 %v4031_v50, 0.0  ;;  %v3651_v43 = vpack.c.bf16 %v1217_v29, %v1213_v59  ;;  %v4054_v59 = vld [vmem:[%s4548_s3 + $0x4e8] sm:$0xff]  ;;  %v4056_v50 = vld [vmem:[%s4548_s3 + $0x4b0] sm:$0xff] }
 0x14e   : > { %3406 = vmatpush1.bf16.msra.mxu0 %v5451_v25  ;;  %v3415_v25 = vpack.c.bf16 %v1191_v55, %v1187_v11  ;;  %v1231_v11 = vmin.f32 %v4038_v0, 0.0  ;;  %v1220_v55 = vmin.f32 %v4039_v36, 0.0  ;;  %v1247_v61 = vmin.f32 %v4054_v59, 0.0  ;;  %v4079_v59 = vld [vmem:[%s4548_s3 + $0x550] sm:$0xff] }
 0x14f   : > { %3408 = vmatprep.subr.bf16.mxu0 %v3407_v26  ;;  %v4033_v26 = vld [vmem:[%s4548_s3 + $0x418] sm:$0xff]  ;;  %v3431_v30 = vpack.c.bf16 %v1223_v34, %v1219_v6  ;;  %v1240_v6 = vmin.f32 %v4056_v50, 0.0 }
 0x150   : > { %3630 = vmatpush1.bf16.msra.mxu1 %v5459_v35  ;;  %v3639_v35 = vpack.c.bf16 %v1193_v56, %v1189_v18  ;;  %v1221_v62 = vmin.f32 %v4033_v26, 0.0  ;;  %v4041_v18 = vld [vmem:[%s4548_s3 + $0x458] sm:$0xff] }
 0x151   : > { %3632 = vmatprep.subr.bf16.mxu1 %v3631_v42  ;;  %v1218_v42 = vmin.f32 %v4035_v9, 0.0  ;;  %v1229_v46 = vmin.f32 %v4041_v18, 0.0  ;;  %v4042_v56 = vld [vmem:[%s4548_s3 + $0x478] sm:$0xff]  ;;  %v4060_v9 = vld [vmem:[%s4548_s3 + $0x4e0] sm:$0xff] }
 0x152   : > { %3410 = vmatpush1.bf16.msra.mxu0 %v5467_v14  ;;  %v3419_v14 = vpack.c.bf16 %v1199_v22, %v1195_v38  ;;  %v3655_v48 = vpack.c.bf16 %v1225_v63, %v1221_v62  ;;  %v4043_v38 = vld [vmem:[%s4548_s3 + $0x440] sm:$0xff]  ;;  %v4057_v34 = vld [vmem:[%s4548_s3 + $0x4d8] sm:$0xff]  ;;  %v1242_v63 = vmin.f32 %v4059_v40, 0.0 }
 0x153   : > { %3412 = vmatprep.subr.bf16.mxu0 %v3411_v57  ;;  %v1227_v57 = vmin.f32 %v4037_v12, 0.0  ;;  %v3433_v32 = vpack.c.bf16 %v1222_v58, %v1218_v42  ;;  %v1226_v45 = vmin.f32 %v4043_v38, 0.0  ;;  %v1246_v42 = vmin.f32 %v4060_v9, 0.0  ;;  %v4061_v58 = vld [vmem:[%s4548_s3 + $0x508] sm:$0xff]  ;;  %v4081_v50 = vld [vmem:[%s4548_s3 + $0x598] sm:$0xff] }
 0x154   : > { %3634 = vmatpush1.bf16.msra.mxu1 %v5475_v21  ;;  %v3643_v21 = vpack.c.bf16 %v1201_v24, %v1197_v17  ;;  %v1235_v17 = vmin.f32 %v4045_v28, 0.0  ;;  %v1239_v24 = vmin.f32 %v4046_v13, 0.0  ;;  %v4062_v12 = vld [vmem:[%s4548_s3 + $0x528] sm:$0xff] }
 0x155   : > { %3636 = vmatprep.subr.bf16.mxu1 %v3635_v20  ;;  %v4040_v20 = vld [vmem:[%s4548_s3 + $0x430] sm:$0xff]  ;;  %v4085_v9 = vld [vmem:[%s4548_s3 + $0x5c8] sm:$0xff] }
 0x156   : > { %3414 = vmatpush1.bf16.msra.mxu0 %v5483_v19  ;;  %v3423_v19 = vpack.c.bf16 %v1207_v52, %v1203_v31  ;;  %v4048_v31 = vld [vmem:[%s4548_s3 + $0x470] sm:$0xff] }
 0x157   : > { %3416 = vmatprep.subr.bf16.mxu0 %v3415_v25  ;;  %v1233_v25 = vmin.f32 %v4042_v56, 0.0  ;;  %v1232_v53 = vmin.f32 %v4048_v31, 0.0  ;;  %v6245_v52 = vld [vmem:[#allocation9_spill] sm:$0xff] }
 0x158   : > { %3638 = vmatpush1.bf16.msra.mxu1 %v5491_v37  ;;  %v3647_v37 = vpack.c.bf16 %v1209_v27, %v1205_v3  ;;  %v1237_v3 = vmin.f32 %v4049_v7, 0.0  ;;  %v1241_v27 = vmin.f32 %v4050_v44, 0.0  ;;  %v4074_v7 = vld [vmem:[%s4548_s3 + $0x578] sm:$0xff] }
 0x159   : > { %3640 = vmatprep.subr.bf16.mxu1 %v3639_v35  ;;  %v3435_v35 = vpack.c.bf16 %v1231_v11, %v1227_v57  ;;  %v1255_v57 = vmin.f32 %v4062_v12, 0.0  ;;  %v4063_v11 = vld [vmem:[%s4548_s3 + $0x4d0] sm:$0xff] }
 0x15a   : > { %3418 = vmatpush1.bf16.msra.mxu0 %v5499_v1  ;;  %v3427_v1 = vpack.c.bf16 %v1215_v5, %v1211_v39  ;;  %v4052_v39 = vld [vmem:[%s4548_s3 + $0x4a0] sm:$0xff]  ;;  %v6246_v5 = vld [vmem:[#allocation12_spill] sm:$0xff]  ;;  %v3663_v49 = vpack.c.bf16 %v1241_v27, %v1237_v3  ;;  %v1244_v36 = vmin.f32 %v4063_v11, 0.0  ;;  %v1265_v3 = vmin.f32 %v4074_v7, 0.0  ;;  %v4087_v12 = vld [vmem:[%s4548_s3 + $0x590] sm:$0xff] }
 0x15b   : > { %3420 = vmatprep.subr.bf16.mxu0 %v3419_v14  ;;  %v1238_v2 = vmin.f32 %v4052_v39, 0.0  ;;  %v4075_v27 = vld [vmem:[%s4548_s3 + $0x540] sm:$0xff] }
 0x15c   : > { %3642 = vmatpush1.bf16.msra.mxu1 %v6242_v51  ;;  %v3439_v51 = vpack.c.bf16 %v1239_v24, %v1235_v17  ;;  %v4070_v17 = vld [vmem:[%s4548_s3 + $0x568] sm:$0xff]  ;;  %v4099_v7 = vld [vmem:[%s4548_s3 + $0x600] sm:$0xff] }
 0x15d   : > { %3644 = vmatprep.subr.bf16.mxu1 %v3643_v21  ;;  %v3659_v21 = vpack.c.bf16 %v1233_v25, %v1229_v46  ;;  %v4066_v46 = vld [vmem:[%s4548_s3 + $0x538] sm:$0xff]  ;;  %v3445_v25 = vpack.c.bf16 %v1246_v42, %v1242_v63  ;;  %v1263_v13 = vmin.f32 %v4070_v17, 0.0  ;;  %v1275_v42 = vmin.f32 %v4085_v9, 0.0  ;;  %v4095_v17 = vld [vmem:[%s4548_s3 + $0x5d0] sm:$0xff] }
 0x15e   : > { %3422 = vmatpush1.bf16.msra.mxu0 %v6243_v23  ;;  %v4055_v23 = vld [vmem:[%s4548_s3 + $0x490] sm:$0xff]  ;;  %v1257_v56 = vmin.f32 %v4066_v46, 0.0  ;;  %v4091_v46 = vld [vmem:[%s4548_s3 + $0x5c0] sm:$0xff] }
 0x15f   : > { %3424 = vmatprep.subr.bf16.mxu0 %v3423_v19 }
 0x160   : > { %3646 = vmatpush1.bf16.msra.mxu1 %v6244_v41  ;;  %v1245_v41 = vmin.f32 %v4057_v34, 0.0 }
 0x161   : > { %3648 = vmatprep.subr.bf16.mxu1 %v3647_v37  ;;  %v4053_v37 = vld [vmem:[%s4548_s3 + $0x4c8] sm:$0xff] }
 0x162   : > { %3426 = vmatpush1.bf16.msra.mxu0 %v5531_v8  ;;  %v1224_v8 = vmin.f32 %v4040_v20, 0.0  ;;  %v1243_v4 = vmin.f32 %v4053_v37, 0.0 }
 0x163   : > { %3428 = vmatprep.subr.bf16.mxu0 %v3427_v1  ;;  %v1236_v1 = vmin.f32 %v4055_v23, 0.0 }
 0x164   : > { %3650 = vmatpush1.bf16.msra.mxu1 %v5537_v16  ;;  %v4044_v16 = vld [vmem:[%s4548_s3 + $0x460] sm:$0xff]  ;;  %v3657_v14 = vpack.c.bf16 %v1224_v8, %v1220_v55  ;;  %v3443_v10 = vpack.c.bf16 %v1247_v61, %v1243_v4  ;;  %v4064_v55 = vld [vmem:[%s4548_s3 + $0x4f0] sm:$0xff]  ;;  %v1260_v61 = vmin.f32 %v4079_v59, 0.0 }
 0x165   : > { %3652 = vmatprep.subr.bf16.mxu1 %v3651_v43  ;;  %v1230_v22 = vmin.f32 %v4044_v16, 0.0  ;;  %v4058_v43 = vld [vmem:[%s4548_s3 + $0x4f8] sm:$0xff]  ;;  %v3665_v0 = vpack.c.bf16 %v1240_v6, %v1236_v1  ;;  %v1248_v20 = vmin.f32 %v4064_v55, 0.0  ;;  %v1269_v6 = vmin.f32 %v4081_v50, 0.0 }
 0x166   : > { %3430 = vmatpush1.bf16.msra.mxu0 %v5545_v47  ;;  %v4047_v47 = vld [vmem:[%s4548_s3 + $0x450] sm:$0xff]  ;;  %v1249_v26 = vmin.f32 %v4058_v43, 0.0  ;;  %v4083_v43 = vld [vmem:[%s4548_s3 + $0x580] sm:$0xff]  ;;  %v4089_v55 = vld [vmem:[%s4548_s3 + $0x5d8] sm:$0xff] }
 0x167   : > { %3432 = vmatprep.subr.bf16.mxu0 %v3431_v30  ;;  %v1228_v54 = vmin.f32 %v4047_v47, 0.0  ;;  %v3437_v19 = vpack.c.bf16 %v1230_v22, %v1226_v45  ;;  %v1251_v30 = vmin.f32 %v4061_v58, 0.0  ;;  %v4068_v45 = vld [vmem:[%s4548_s3 + $0x520] sm:$0xff]  ;;  %v3669_v24 = vpack.c.bf16 %v1248_v20, %v1244_v36 }
 0x168   : > { %3654 = vmatpush1.bf16.msra.mxu1 %v5551_v15  ;;  %v4051_v15 = vld [vmem:[%s4548_s3 + $0x480] sm:$0xff]  ;;  %v3667_v8 = vpack.c.bf16 %v1249_v26, %v1245_v41  ;;  %v1254_v16 = vmin.f32 %v4068_v45, 0.0  ;;  %v1266_v26 = vmin.f32 %v4083_v43, 0.0  ;;  %v1277_v20 = vmin.f32 %v4089_v55, 0.0  ;;  %v4093_v45 = vld [vmem:[%s4548_s3 + $0x608] sm:$0xff] }
 0x169   : > { %3656 = vmatprep.subr.bf16.mxu1 %v3655_v48  ;;  %2218 = vmatmul.mubr.f32.vlgmr.msra.gmra.mrb[2].mxu0 %v6245_v52  ;;  %v1234_v60 = vmin.f32 %v4051_v15, 0.0  ;;  %v3661_v29 = vpack.c.bf16 %v1232_v53, %v1228_v54  ;;  %v4065_v48 = vld [vmem:[%s4548_s3 + $0x518] sm:$0xff]  ;;  %v3447_v22 = vpack.c.bf16 %v1255_v57, %v1251_v30  ;;  %v4072_v54 = vld [vmem:[%s4548_s3 + $0x530] sm:$0xff]  ;;  %v4076_v15 = vld [vmem:[%s4548_s3 + $0x560] sm:$0xff]  ;;  %v1268_v57 = vmin.f32 %v4087_v12, 0.0 }
 0x16a   : > { %3434 = vmatpush1.bf16.msra.mxu0 %v3433_v32  ;;  %2288 = vmatprep.mubr.f32.mxu0 %v6246_v5  ;;  %v1253_v18 = vmin.f32 %v4065_v48, 0.0  ;;  %v4067_v32 = vld [vmem:[%s4548_s3 + $0x500] sm:$0xff]  ;;  %v1256_v31 = vmin.f32 %v4072_v54, 0.0  ;;  %v4097_v54 = vld [vmem:[%s4548_s3 + $0x618] sm:$0xff] }
 0x16b   : > { %2502 = vmatmul.mubr.f32.vlgmr.msra.gmra.mrb[2].mxu1 %v6245_v52  ;;  %3436 = vmatprep.subr.bf16.mxu0 %v3435_v35  ;;  %v3441_v62 = vpack.c.bf16 %v1238_v2, %v1234_v60  ;;  %v1250_v38 = vmin.f32 %v4067_v32, 0.0  ;;  %v4069_v35 = vld [vmem:[%s4548_s3 + $0x548] sm:$0xff]  ;;  %v4073_v52 = vld [vmem:[%s4548_s3 + $0x558] sm:$0xff]  ;;  %v1262_v60 = vmin.f32 %v4076_v15, 0.0 }
 0x16c   : > { %3658 = vmatpush1.bf16.msra.mxu1 %v3657_v14  ;;  %2572 = vmatprep.mubr.f32.mxu1 %v6246_v5  ;;  %v1259_v28 = vmin.f32 %v4069_v35, 0.0  ;;  %v4071_v14 = vld [vmem:[%s4548_s3 + $0x510] sm:$0xff]  ;;  %v3671_v53 = vpack.c.bf16 %v1257_v56, %v1253_v18  ;;  %v4077_v2 = vld [vmem:[%s4548_s3 + $0x588] sm:$0xff]  ;;  %v1274_v56 = vmin.f32 %v4091_v46, 0.0 }
 0x16d   : > { %3660 = vmatprep.subr.bf16.mxu1 %v3659_v21  ;;  %v1252_v47 = vmin.f32 %v4071_v14, 0.0  ;;  %v1261_v21 = vmin.f32 %v4073_v52, 0.0  ;;  %v3449_v44 = vpack.c.bf16 %v1254_v16, %v1250_v38  ;;  %v1267_v5 = vmin.f32 %v4077_v2, 0.0  ;;  %v4101_v15 = vld [vmem:[%s4548_s3 + $0x648] sm:$0xff] }
 0x16e   : > { %3438 = vmatpush1.bf16.msra.mxu0 %v3437_v19  ;;  %v1258_v19 = vmin.f32 %v4075_v27, 0.0  ;;  %v3451_v39 = vpack.c.bf16 %v1263_v13, %v1259_v28  ;;  %v1283_v16 = vmin.f32 %v4093_v45, 0.0  ;;  %v1276_v13 = vmin.f32 %v4095_v17, 0.0 }
 0x16f   : > { %3440 = vmatprep.subr.bf16.mxu0 %v3439_v51  ;;  %v4078_v51 = vld [vmem:[%s4548_s3 + $0x5a8] sm:$0xff]  ;;  %v3673_v4 = vpack.c.bf16 %v1256_v31, %v1252_v47  ;;  %v3675_v1 = vpack.c.bf16 %v1265_v3, %v1261_v21  ;;  %v1285_v31 = vmin.f32 %v4097_v54, 0.0  ;;  %v1282_v3 = vmin.f32 %v4099_v7, 0.0 }
 0x170   : > { %3662 = vmatpush1.bf16.msra.mxu1 %v3661_v29  ;;  %v1271_v37 = vmin.f32 %v4078_v51, 0.0  ;;  %v4080_v29 = vld [vmem:[%s4548_s3 + $0x570] sm:$0xff]  ;;  %v3453_v41 = vpack.c.bf16 %v1262_v60, %v1258_v19  ;;  %v1291_v60 = vmin.f32 %v4101_v15, 0.0 }
 0x171   : > { %3664 = vmatprep.subr.bf16.mxu1 %v3663_v49  ;;  %v1264_v23 = vmin.f32 %v4080_v29, 0.0  ;;  %v4082_v49 = vld [vmem:[%s4548_s3 + $0x5b8] sm:$0xff]  ;;  %v4103_v51 = vld [vmem:[%s4548_s3 + $0x610] sm:$0xff] }
 0x172   : > { %3442 = vmatpush1.bf16.msra.mxu0 %v3441_v62  ;;  %v1273_v34 = vmin.f32 %v4082_v49, 0.0  ;;  %v4084_v62 = vld [vmem:[%s4548_s3 + $0x5a0] sm:$0xff]  ;;  %v3455_v63 = vpack.c.bf16 %v1271_v37, %v1267_v5  ;;  %v1284_v37 = vmin.f32 %v4103_v51, 0.0  ;;  %v4105_v29 = vld [vmem:[%s4548_s3 + $0x658] sm:$0xff] }
 0x173   : > { %3444 = vmatprep.subr.bf16.mxu0 %v3443_v10  ;;  %v1270_v40 = vmin.f32 %v4084_v62, 0.0  ;;  %v4086_v10 = vld [vmem:[%s4548_s3 + $0x5e8] sm:$0xff]  ;;  %v3677_v30 = vpack.c.bf16 %v1264_v23, %v1260_v61  ;;  %v1293_v23 = vmin.f32 %v4105_v29, 0.0  ;;  %v4107_v49 = vld [vmem:[%s4548_s3 + $0x640] sm:$0xff] }
 0x174   : > { %3666 = vmatpush1.bf16.msra.mxu1 %v3665_v0  ;;  %v1279_v58 = vmin.f32 %v4086_v10, 0.0  ;;  %v4088_v0 = vld [vmem:[%s4548_s3 + $0x5b0] sm:$0xff]  ;;  %v3679_v36 = vpack.c.bf16 %v1273_v34, %v1269_v6  ;;  %v1290_v34 = vmin.f32 %v4107_v49, 0.0  ;;  %v4109_v62 = vld [vmem:[%s4548_s3 + $0x688] sm:$0xff] }
 0x175   : > { %3668 = vmatprep.subr.bf16.mxu1 %v3667_v8  ;;  %v1272_v11 = vmin.f32 %v4088_v0, 0.0  ;;  %v4090_v8 = vld [vmem:[%s4548_s3 + $0x5f8] sm:$0xff]  ;;  %v3457_v18 = vpack.c.bf16 %v1270_v40, %v1266_v26  ;;  %v1299_v40 = vmin.f32 %v4109_v62, 0.0  ;;  %v4111_v10 = vld [vmem:[%s4548_s3 + $0x650] sm:$0xff] }
 0x176   : > { %3446 = vmatpush1.bf16.msra.mxu0 %v3445_v25  ;;  %v1281_v48 = vmin.f32 %v4090_v8, 0.0  ;;  %v4092_v25 = vld [vmem:[%s4548_s3 + $0x5e0] sm:$0xff]  ;;  %v3459_v38 = vpack.c.bf16 %v1279_v58, %v1275_v42  ;;  %v1292_v58 = vmin.f32 %v4111_v10, 0.0  ;;  %v4113_v0 = vld [vmem:[%s4548_s3 + $0x698] sm:$0xff] }
 0x177   : > { %3448 = vmatprep.subr.bf16.mxu0 %v3447_v22  ;;  %v1278_v32 = vmin.f32 %v4092_v25, 0.0  ;;  %v4094_v22 = vld [vmem:[%s4548_s3 + $0x628] sm:$0xff]  ;;  %v3681_v28 = vpack.c.bf16 %v1272_v11, %v1268_v57  ;;  %v1301_v11 = vmin.f32 %v4113_v0, 0.0  ;;  %v4115_v8 = vld [vmem:[%s4548_s3 + $0x680] sm:$0xff] }
 0x178   : > { %3670 = vmatpush1.bf16.msra.mxu1 %v3669_v24  ;;  %v1287_v35 = vmin.f32 %v4094_v22, 0.0  ;;  %v4096_v24 = vld [vmem:[%s4548_s3 + $0x5f0] sm:$0xff]  ;;  %v3683_v47 = vpack.c.bf16 %v1281_v48, %v1277_v20  ;;  %v1298_v48 = vmin.f32 %v4115_v8, 0.0  ;;  %v4117_v25 = vld [vmem:[%s4548_s3 + $0x6c8] sm:$0xff] }
 0x179   : > { %3672 = vmatprep.subr.bf16.mxu1 %v3671_v53  ;;  %v1280_v14 = vmin.f32 %v4096_v24, 0.0  ;;  %v4098_v53 = vld [vmem:[%s4548_s3 + $0x638] sm:$0xff]  ;;  %v3461_v21 = vpack.c.bf16 %v1278_v32, %v1274_v56  ;;  %v1307_v32 = vmin.f32 %v4117_v25, 0.0  ;;  %v4119_v22 = vld [vmem:[%s4548_s3 + $0x690] sm:$0xff] }
 0x17a   : > { %3450 = vmatpush1.bf16.msra.mxu0 %v3449_v44  ;;  %v1289_v52 = vmin.f32 %v4098_v53, 0.0  ;;  %v4100_v44 = vld [vmem:[%s4548_s3 + $0x620] sm:$0xff]  ;;  %v3463_v19 = vpack.c.bf16 %v1287_v35, %v1283_v16  ;;  %v1300_v35 = vmin.f32 %v4119_v22, 0.0  ;;  %v4121_v24 = vld [vmem:[%s4548_s3 + $0x6d8] sm:$0xff] }
 0x17b   : > { %3452 = vmatprep.subr.bf16.mxu0 %v3451_v39  ;;  %v1286_v27 = vmin.f32 %v4100_v44, 0.0  ;;  %v4102_v39 = vld [vmem:[%s4548_s3 + $0x668] sm:$0xff]  ;;  %v3685_v5 = vpack.c.bf16 %v1280_v14, %v1276_v13  ;;  %v1309_v14 = vmin.f32 %v4121_v24, 0.0  ;;  %v4123_v53 = vld [vmem:[%s4548_s3 + $0x6c0] sm:$0xff] }
 0x17c   : > { %3674 = vmatpush1.bf16.msra.mxu1 %v3673_v4  ;;  %v1295_v2 = vmin.f32 %v4102_v39, 0.0  ;;  %v4104_v4 = vld [vmem:[%s4548_s3 + $0x630] sm:$0xff]  ;;  %v3687_v61 = vpack.c.bf16 %v1289_v52, %v1285_v31  ;;  %v1306_v52 = vmin.f32 %v4123_v53, 0.0  ;;  %v4125_v44 = vld [vmem:[%s4548_s3 + $0x708] sm:$0xff] }
 0x17d   : > { %3676 = vmatprep.subr.bf16.mxu1 %v3675_v1  ;;  %v1288_v59 = vmin.f32 %v4104_v4, 0.0  ;;  %v4106_v1 = vld [vmem:[%s4548_s3 + $0x678] sm:$0xff]  ;;  %v3465_v6 = vpack.c.bf16 %v1286_v27, %v1282_v3  ;;  %v1315_v27 = vmin.f32 %v4125_v44, 0.0  ;;  %v4127_v39 = vld [vmem:[%s4548_s3 + $0x6d0] sm:$0xff] }
 0x17e   : > { %3454 = vmatpush1.bf16.msra.mxu0 %v3453_v41  ;;  %v1297_v50 = vmin.f32 %v4106_v1, 0.0  ;;  %v4108_v41 = vld [vmem:[%s4548_s3 + $0x660] sm:$0xff]  ;;  %v3467_v26 = vpack.c.bf16 %v1295_v2, %v1291_v60  ;;  %v1308_v2 = vmin.f32 %v4127_v39, 0.0  ;;  %v4129_v4 = vld [vmem:[%s4548_s3 + $0x718] sm:$0xff] }
 0x17f   : > { %3456 = vmatprep.subr.bf16.mxu0 %v3455_v63  ;;  %v1294_v43 = vmin.f32 %v4108_v41, 0.0  ;;  %v4110_v63 = vld [vmem:[%s4548_s3 + $0x6a8] sm:$0xff]  ;;  %v3689_v42 = vpack.c.bf16 %v1288_v59, %v1284_v37  ;;  %v1317_v59 = vmin.f32 %v4129_v4, 0.0  ;;  %v4131_v1 = vld [vmem:[%s4548_s3 + $0x700] sm:$0xff] }
 0x180   : > { %3678 = vmatpush1.bf16.msra.mxu1 %v3677_v30  ;;  %v1303_v9 = vmin.f32 %v4110_v63, 0.0  ;;  %v4112_v30 = vld [vmem:[%s4548_s3 + $0x670] sm:$0xff]  ;;  %v3691_v57 = vpack.c.bf16 %v1297_v50, %v1293_v23  ;;  %v1314_v50 = vmin.f32 %v4131_v1, 0.0  ;;  %v4133_v41 = vld [vmem:[%s4548_s3 + $0x748] sm:$0xff] }
 0x181   : > { %3680 = vmatprep.subr.bf16.mxu1 %v3679_v36  ;;  %v1296_v12 = vmin.f32 %v4112_v30, 0.0  ;;  %v4114_v36 = vld [vmem:[%s4548_s3 + $0x6b8] sm:$0xff]  ;;  %v3469_v20 = vpack.c.bf16 %v1294_v43, %v1290_v34  ;;  %v1323_v43 = vmin.f32 %v4133_v41, 0.0  ;;  %v4135_v63 = vld [vmem:[%s4548_s3 + $0x710] sm:$0xff] }
 0x182   : > { %3458 = vmatpush1.bf16.msra.mxu0 %v3457_v18  ;;  %v1305_v55 = vmin.f32 %v4114_v36, 0.0  ;;  %v4116_v18 = vld [vmem:[%s4548_s3 + $0x6a0] sm:$0xff]  ;;  %v3471_v56 = vpack.c.bf16 %v1303_v9, %v1299_v40  ;;  %v1316_v9 = vmin.f32 %v4135_v63, 0.0  ;;  %v4137_v30 = vld [vmem:[%s4548_s3 + $0x758] sm:$0xff] }
 0x183   : > { %3460 = vmatprep.subr.bf16.mxu0 %v3459_v38  ;;  %v1302_v46 = vmin.f32 %v4116_v18, 0.0  ;;  %v4118_v38 = vld [vmem:[%s4548_s3 + $0x6e8] sm:$0xff]  ;;  %v3693_v16 = vpack.c.bf16 %v1296_v12, %v1292_v58  ;;  %v1325_v12 = vmin.f32 %v4137_v30, 0.0  ;;  %v4139_v36 = vld [vmem:[%s4548_s3 + $0x740] sm:$0xff] }
 0x184   : > { %3682 = vmatpush1.bf16.msra.mxu1 %v3681_v28  ;;  %v1311_v45 = vmin.f32 %v4118_v38, 0.0  ;;  %v4120_v28 = vld [vmem:[%s4548_s3 + $0x6b0] sm:$0xff]  ;;  %v3695_v13 = vpack.c.bf16 %v1305_v55, %v1301_v11  ;;  %v1322_v55 = vmin.f32 %v4139_v36, 0.0  ;;  %v4141_v18 = vld [vmem:[%s4548_s3 + $0x788] sm:$0xff] }
 0x185   : > { %3684 = vmatprep.subr.bf16.mxu1 %v3683_v47  ;;  %v1304_v17 = vmin.f32 %v4120_v28, 0.0  ;;  %v4122_v47 = vld [vmem:[%s4548_s3 + $0x6f8] sm:$0xff]  ;;  %v3473_v31 = vpack.c.bf16 %v1302_v46, %v1298_v48  ;;  %v1331_v46 = vmin.f32 %v4141_v18, 0.0  ;;  %v4143_v38 = vld [vmem:[%s4548_s3 + $0x750] sm:$0xff] }
 0x186   : > { %3462 = vmatpush1.bf16.msra.mxu0 %v3461_v21  ;;  %v1313_v54 = vmin.f32 %v4122_v47, 0.0  ;;  %v4124_v21 = vld [vmem:[%s4548_s3 + $0x6e0] sm:$0xff]  ;;  %v3475_v3 = vpack.c.bf16 %v1311_v45, %v1307_v32  ;;  %v1324_v45 = vmin.f32 %v4143_v38, 0.0  ;;  %v4145_v28 = vld [vmem:[%s4548_s3 + $0x798] sm:$0xff] }
 0x187   : > { %3464 = vmatprep.subr.bf16.mxu0 %v3463_v19  ;;  %v1310_v7 = vmin.f32 %v4124_v21, 0.0  ;;  %v4126_v19 = vld [vmem:[%s4548_s3 + $0x728] sm:$0xff]  ;;  %v3697_v60 = vpack.c.bf16 %v1304_v17, %v1300_v35  ;;  %v1333_v17 = vmin.f32 %v4145_v28, 0.0  ;;  %v4147_v47 = vld [vmem:[%s4548_s3 + $0x780] sm:$0xff] }
 0x188   : > { %3686 = vmatpush1.bf16.msra.mxu1 %v3685_v5  ;;  %v1319_v15 = vmin.f32 %v4126_v19, 0.0  ;;  %v4128_v5 = vld [vmem:[%s4548_s3 + $0x6f0] sm:$0xff]  ;;  %v3699_v37 = vpack.c.bf16 %v1313_v54, %v1309_v14  ;;  %v1330_v54 = vmin.f32 %v4147_v47, 0.0  ;;  %v4149_v21 = vld [vmem:[%s4548_s3 + $0x7c8] sm:$0xff] }
 0x189   : > { %3688 = vmatprep.subr.bf16.mxu1 %v3687_v61  ;;  %v1312_v51 = vmin.f32 %v4128_v5, 0.0  ;;  %v4130_v61 = vld [vmem:[%s4548_s3 + $0x738] sm:$0xff]  ;;  %v3477_v23 = vpack.c.bf16 %v1310_v7, %v1306_v52  ;;  %v1339_v7 = vmin.f32 %v4149_v21, 0.0  ;;  %v4151_v19 = vld [vmem:[%s4548_s3 + $0x790] sm:$0xff] }
 0x18a   : > { %3466 = vmatpush1.bf16.msra.mxu0 %v3465_v6  ;;  %v1321_v29 = vmin.f32 %v4130_v61, 0.0  ;;  %v4132_v6 = vld [vmem:[%s4548_s3 + $0x720] sm:$0xff]  ;;  %v3479_v34 = vpack.c.bf16 %v1319_v15, %v1315_v27  ;;  %v1332_v15 = vmin.f32 %v4151_v19, 0.0  ;;  %v4153_v5 = vld [vmem:[%s4548_s3 + $0x7d8] sm:$0xff] }
 0x18b   : > { %3468 = vmatprep.subr.bf16.mxu0 %v3467_v26  ;;  %v1318_v49 = vmin.f32 %v4132_v6, 0.0  ;;  %v4134_v26 = vld [vmem:[%s4548_s3 + $0x768] sm:$0xff]  ;;  %v3701_v40 = vpack.c.bf16 %v1312_v51, %v1308_v2  ;;  %v1341_v51 = vmin.f32 %v4153_v5, 0.0  ;;  %v4155_v61 = vld [vmem:[%s4548_s3 + $0x7c0] sm:$0xff]  ;;  %v4178_v5 = vld [vmem:[%s4548_s3 + $0x8b8] sm:$0xff] }
 0x18c   : > { %3690 = vmatpush1.bf16.msra.mxu1 %v3689_v42  ;;  %v1327_v62 = vmin.f32 %v4134_v26, 0.0  ;;  %v4136_v42 = vld [vmem:[%s4548_s3 + $0x730] sm:$0xff]  ;;  %v3703_v58 = vpack.c.bf16 %v1321_v29, %v1317_v59  ;;  %v1338_v29 = vmin.f32 %v4155_v61, 0.0  ;;  %v4157_v6 = vld [vmem:[%s4548_s3 + $0x808] sm:$0xff]  ;;  %v4180_v61 = vld [vmem:[%s4548_s3 + $0x8a0] sm:$0xff] }
 0x18d   : > { %3692 = vmatprep.subr.bf16.mxu1 %v3691_v57  ;;  %v1320_v10 = vmin.f32 %v4136_v42, 0.0  ;;  %v4138_v57 = vld [vmem:[%s4548_s3 + $0x778] sm:$0xff]  ;;  %v3481_v11 = vpack.c.bf16 %v1318_v49, %v1314_v50  ;;  %v1347_v49 = vmin.f32 %v4157_v6, 0.0  ;;  %v4159_v26 = vld [vmem:[%s4548_s3 + $0x7d0] sm:$0xff] }
 0x18e   : > { %3470 = vmatpush1.bf16.msra.mxu0 %v3469_v20  ;;  %v1329_v0 = vmin.f32 %v4138_v57, 0.0  ;;  %v4140_v20 = vld [vmem:[%s4548_s3 + $0x760] sm:$0xff]  ;;  %v3483_v48 = vpack.c.bf16 %v1327_v62, %v1323_v43  ;;  %v1340_v62 = vmin.f32 %v4159_v26, 0.0  ;;  %v4161_v42 = vld [vmem:[%s4548_s3 + $0x818] sm:$0xff] }
 0x18f   : > { %3472 = vmatprep.subr.bf16.mxu0 %v3471_v56  ;;  %v1326_v8 = vmin.f32 %v4140_v20, 0.0  ;;  %v4142_v56 = vld [vmem:[%s4548_s3 + $0x7a8] sm:$0xff]  ;;  %v3705_v32 = vpack.c.bf16 %v1320_v10, %v1316_v9  ;;  %v1349_v10 = vmin.f32 %v4161_v42, 0.0  ;;  %v4163_v57 = vld [vmem:[%s4548_s3 + $0x800] sm:$0xff] }
 0x190   : > { %3694 = vmatpush1.bf16.msra.mxu1 %v3693_v16  ;;  %v1335_v25 = vmin.f32 %v4142_v56, 0.0  ;;  %v4144_v16 = vld [vmem:[%s4548_s3 + $0x770] sm:$0xff]  ;;  %v3707_v35 = vpack.c.bf16 %v1329_v0, %v1325_v12  ;;  %v1346_v0 = vmin.f32 %v4163_v57, 0.0  ;;  %v4165_v20 = vld [vmem:[%s4548_s3 + $0x848] sm:$0xff] }
 0x191   : > { %3696 = vmatprep.subr.bf16.mxu1 %v3695_v13  ;;  %v1328_v22 = vmin.f32 %v4144_v16, 0.0  ;;  %v4146_v13 = vld [vmem:[%s4548_s3 + $0x7b8] sm:$0xff]  ;;  %v3485_v14 = vpack.c.bf16 %v1326_v8, %v1322_v55  ;;  %v1355_v8 = vmin.f32 %v4165_v20, 0.0  ;;  %v4167_v56 = vld [vmem:[%s4548_s3 + $0x810] sm:$0xff] }
 0x192   : > { %3474 = vmatpush1.bf16.msra.mxu0 %v3473_v31  ;;  %v1337_v24 = vmin.f32 %v4146_v13, 0.0  ;;  %v4148_v31 = vld [vmem:[%s4548_s3 + $0x7a0] sm:$0xff]  ;;  %v3487_v52 = vpack.c.bf16 %v1335_v25, %v1331_v46  ;;  %v1348_v25 = vmin.f32 %v4167_v56, 0.0  ;;  %v4169_v16 = vld [vmem:[%s4548_s3 + $0x858] sm:$0xff] }
 0x193   : > { %3476 = vmatprep.subr.bf16.mxu0 %v3475_v3  ;;  %v1334_v53 = vmin.f32 %v4148_v31, 0.0  ;;  %v4150_v3 = vld [vmem:[%s4548_s3 + $0x7e8] sm:$0xff]  ;;  %v3709_v27 = vpack.c.bf16 %v1328_v22, %v1324_v45  ;;  %v1357_v22 = vmin.f32 %v4169_v16, 0.0  ;;  %v4171_v13 = vld [vmem:[%s4548_s3 + $0x840] sm:$0xff] }
 0x194   : > { %3698 = vmatpush1.bf16.msra.mxu1 %v3697_v60  ;;  %v1343_v44 = vmin.f32 %v4150_v3, 0.0  ;;  %v4152_v60 = vld [vmem:[%s4548_s3 + $0x7b0] sm:$0xff]  ;;  %v3711_v2 = vpack.c.bf16 %v1337_v24, %v1333_v17  ;;  %v1354_v24 = vmin.f32 %v4171_v13, 0.0  ;;  %v4173_v31 = vld [vmem:[%s4548_s3 + $0x888] sm:$0xff] }
 0x195   : > { %3700 = vmatprep.subr.bf16.mxu1 %v3699_v37  ;;  %v1336_v39 = vmin.f32 %v4152_v60, 0.0  ;;  %v4154_v37 = vld [vmem:[%s4548_s3 + $0x7f8] sm:$0xff]  ;;  %v3489_v59 = vpack.c.bf16 %v1334_v53, %v1330_v54  ;;  %v1363_v53 = vmin.f32 %v4173_v31, 0.0  ;;  %v4175_v3 = vld [vmem:[%s4548_s3 + $0x850] sm:$0xff] }
 0x196   : > { %3478 = vmatpush1.bf16.msra.mxu0 %v3477_v23  ;;  %v1345_v4 = vmin.f32 %v4154_v37, 0.0  ;;  %v4156_v23 = vld [vmem:[%s4548_s3 + $0x7e0] sm:$0xff]  ;;  %v3491_v50 = vpack.c.bf16 %v1343_v44, %v1339_v7  ;;  %v1356_v44 = vmin.f32 %v4175_v3, 0.0 }
 0x197   : > { %3480 = vmatprep.subr.bf16.mxu0 %v3479_v34  ;;  %v1342_v1 = vmin.f32 %v4156_v23, 0.0  ;;  %v4158_v34 = vld [vmem:[%s4548_s3 + $0x828] sm:$0xff]  ;;  %v3713_v43 = vpack.c.bf16 %v1336_v39, %v1332_v15  ;;  %v6247_v15 = vld [vmem:[#allocation11_spill] sm:$0xff]  ;;  %v4177_v39 = vld [vmem:[%s4548_s3 + $0x898] sm:$0xff] }
 0x198   : > { %3702 = vmatpush1.bf16.msra.mxu1 %v3701_v40  ;;  %v1351_v41 = vmin.f32 %v4158_v34, 0.0  ;;  %v4160_v40 = vld [vmem:[%s4548_s3 + $0x7f0] sm:$0xff]  ;;  %v3715_v9 = vpack.c.bf16 %v1345_v4, %v1341_v51  ;;  %v1369_v51 = vmin.f32 %v4178_v5, 0.0  ;;  %v4179_v4 = vld [vmem:[%s4548_s3 + $0x880] sm:$0xff] }
 0x199   : > { %3704 = vmatprep.subr.bf16.mxu1 %v3703_v58  ;;  %v1344_v63 = vmin.f32 %v4160_v40, 0.0  ;;  %v4162_v58 = vld [vmem:[%s4548_s3 + $0x838] sm:$0xff]  ;;  %v3493_v12 = vpack.c.bf16 %v1342_v1, %v1338_v29  ;;  %v1366_v29 = vmin.f32 %v4180_v61, 0.0  ;;  %v6248_v23 = vld [vmem:[#allocation33_spill] sm:$0xff] }
 0x19a   : > { %3482 = vmatpush1.bf16.msra.mxu0 %v3481_v11  ;;  %v1353_v30 = vmin.f32 %v4162_v58, 0.0  ;;  %v4164_v11 = vld [vmem:[%s4548_s3 + $0x820] sm:$0xff]  ;;  %v3495_v55 = vpack.c.bf16 %v1351_v41, %v1347_v49  ;;  %v4182_v49 = vld [vmem:[%s4548_s3 + $0x8e8] sm:$0xff] }
 0x19b   : > { %3484 = vmatprep.subr.bf16.mxu0 %v3483_v48  ;;  %v1350_v36 = vmin.f32 %v4164_v11, 0.0  ;;  %v4166_v48 = vld [vmem:[%s4548_s3 + $0x868] sm:$0xff]  ;;  %v3717_v46 = vpack.c.bf16 %v1344_v63, %v1340_v62  ;;  %v1375_v34 = vmin.f32 %v4182_v49, 0.0  ;;  %v4184_v62 = vld [vmem:[%s4548_s3 + $0x8b0] sm:$0xff] }
 0x19c   : > { %3706 = vmatpush1.bf16.msra.mxu1 %v3705_v32  ;;  %v1359_v18 = vmin.f32 %v4166_v48, 0.0  ;;  %v4168_v32 = vld [vmem:[%s4548_s3 + $0x830] sm:$0xff]  ;;  %v3719_v45 = vpack.c.bf16 %v1353_v30, %v1349_v10  ;;  %v1368_v40 = vmin.f32 %v4184_v62, 0.0  ;;  %v4186_v10 = vld [vmem:[%s4548_s3 + $0x8f8] sm:$0xff] }
 0x19d   : > { %3708 = vmatprep.subr.bf16.mxu1 %v3707_v35  ;;  %v1352_v38 = vmin.f32 %v4168_v32, 0.0  ;;  %v4170_v35 = vld [vmem:[%s4548_s3 + $0x878] sm:$0xff]  ;;  %v3497_v17 = vpack.c.bf16 %v1350_v36, %v1346_v0  ;;  %v1377_v58 = vmin.f32 %v4186_v10, 0.0  ;;  %v4188_v0 = vld [vmem:[%s4548_s3 + $0x8e0] sm:$0xff]  ;;  %v4207_v49 = vld [vmem:[%s4548_s3 + $0x950] sm:$0xff] }
 0x19e   : > { %3486 = vmatpush1.bf16.msra.mxu0 %v3485_v14  ;;  %v1361_v28 = vmin.f32 %v4170_v35, 0.0  ;;  %v4172_v14 = vld [vmem:[%s4548_s3 + $0x860] sm:$0xff]  ;;  %v3499_v54 = vpack.c.bf16 %v1359_v18, %v1355_v8  ;;  %v1374_v11 = vmin.f32 %v4188_v0, 0.0  ;;  %v4190_v8 = vld [vmem:[%s4548_s3 + $0x928] sm:$0xff]  ;;  %v4209_v62 = vld [vmem:[%s4548_s3 + $0x998] sm:$0xff] }
 0x19f   : > { %3488 = vmatprep.subr.bf16.mxu0 %v3487_v52  ;;  %v1358_v47 = vmin.f32 %v4172_v14, 0.0  ;;  %v4174_v52 = vld [vmem:[%s4548_s3 + $0x8a8] sm:$0xff]  ;;  %v3721_v7 = vpack.c.bf16 %v1352_v38, %v1348_v25  ;;  %v1383_v48 = vmin.f32 %v4190_v8, 0.0  ;;  %v4192_v25 = vld [vmem:[%s4548_s3 + $0x8f0] sm:$0xff]  ;;  %v4211_v10 = vld [vmem:[%s4548_s3 + $0x980] sm:$0xff] }
 0x1a0   : > { %3710 = vmatpush1.bf16.msra.mxu1 %v3709_v27  ;;  %v1367_v21 = vmin.f32 %v4174_v52, 0.0  ;;  %v4176_v27 = vld [vmem:[%s4548_s3 + $0x870] sm:$0xff]  ;;  %v3723_v60 = vpack.c.bf16 %v1361_v28, %v1357_v22  ;;  %v1376_v32 = vmin.f32 %v4192_v25, 0.0  ;;  %v4194_v22 = vld [vmem:[%s4548_s3 + $0x938] sm:$0xff]  ;;  %v4213_v0 = vld [vmem:[%s4548_s3 + $0x9c8] sm:$0xff] }
 0x1a1   : > { %3712 = vmatprep.subr.bf16.mxu1 %v3711_v2  ;;  %v1360_v19 = vmin.f32 %v4176_v27, 0.0  ;;  %v1365_v2 = vmin.f32 %v4177_v39, 0.0  ;;  %v3501_v37 = vpack.c.bf16 %v1358_v47, %v1354_v24  ;;  %v1385_v35 = vmin.f32 %v4194_v22, 0.0  ;;  %v4196_v24 = vld [vmem:[%s4548_s3 + $0x920] sm:$0xff]  ;;  %v4202_v39 = vld [vmem:[%s4548_s3 + $0x978] sm:$0xff]  ;;  %v4215_v8 = vld [vmem:[%s4548_s3 + $0x990] sm:$0xff] }
 0x1a2   : > { %3490 = vmatpush1.bf16.msra.mxu0 %v3489_v59  ;;  %v1362_v59 = vmin.f32 %v4179_v4, 0.0  ;;  %v3503_v1 = vpack.c.bf16 %v1367_v21, %v1363_v53  ;;  %v1382_v14 = vmin.f32 %v4196_v24, 0.0  ;;  %v4198_v53 = vld [vmem:[%s4548_s3 + $0x968] sm:$0xff]  ;;  %v4204_v4 = vld [vmem:[%s4548_s3 + $0x960] sm:$0xff]  ;;  %v4217_v25 = vld [vmem:[%s4548_s3 + $0x9d8] sm:$0xff] }
 0x1a3   : > { %3492 = vmatprep.subr.bf16.mxu0 %v3491_v50  ;;  %v4181_v50 = vld [vmem:[%s4548_s3 + $0x8c8] sm:$0xff]  ;;  %v3725_v41 = vpack.c.bf16 %v1360_v19, %v1356_v44  ;;  %v3727_v63 = vpack.c.bf16 %v1369_v51, %v1365_v2  ;;  %v1391_v52 = vmin.f32 %v4198_v53, 0.0  ;;  %v4200_v44 = vld [vmem:[%s4548_s3 + $0x930] sm:$0xff]  ;;  %v1393_v2 = vmin.f32 %v4202_v39, 0.0  ;;  %v4203_v51 = vld [vmem:[%s4548_s3 + $0x940] sm:$0xff] }
 0x1a4   : > { %3714 = vmatpush1.bf16.msra.mxu1 %v3713_v43  ;;  %v1371_v6 = vmin.f32 %v4181_v50, 0.0  ;;  %v4183_v43 = vld [vmem:[%s4548_s3 + $0x890] sm:$0xff]  ;;  %v3505_v30 = vpack.c.bf16 %v1366_v29, %v1362_v59  ;;  %v1384_v27 = vmin.f32 %v4200_v44, 0.0  ;;  %v1390_v59 = vmin.f32 %v4204_v4, 0.0  ;;  %v4205_v29 = vld [vmem:[%s4548_s3 + $0x988] sm:$0xff]  ;;  %v4219_v22 = vld [vmem:[%s4548_s3 + $0x9c0] sm:$0xff] }
 0x1a5   : > { %3716 = vmatprep.subr.bf16.mxu1 %v3715_v9  ;;  %v1364_v26 = vmin.f32 %v4183_v43, 0.0  ;;  %v4185_v9 = vld [vmem:[%s4548_s3 + $0x8d8] sm:$0xff]  ;;  %v4221_v24 = vld [vmem:[%s4548_s3 + $0xa08] sm:$0xff]  ;;  %v4223_v53 = vld [vmem:[%s4548_s3 + $0x9d0] sm:$0xff] }
 0x1a6   : > { %3494 = vmatpush1.bf16.msra.mxu0 %v3493_v12  ;;  %v1373_v42 = vmin.f32 %v4185_v9, 0.0  ;;  %v4187_v12 = vld [vmem:[%s4548_s3 + $0x8c0] sm:$0xff]  ;;  %v3507_v36 = vpack.c.bf16 %v1375_v34, %v1371_v6  ;;  %v1388_v34 = vmin.f32 %v4207_v49, 0.0  ;;  %v4225_v44 = vld [vmem:[%s4548_s3 + $0xa18] sm:$0xff]  ;;  %v4229_v4 = vld [vmem:[%s4548_s3 + $0xa48] sm:$0xff] }
 0x1a7   : > { %3496 = vmatprep.subr.bf16.mxu0 %v3495_v55  ;;  %v1370_v57 = vmin.f32 %v4187_v12, 0.0  ;;  %v4189_v55 = vld [vmem:[%s4548_s3 + $0x908] sm:$0xff]  ;;  %v3729_v18 = vpack.c.bf16 %v1368_v40, %v1364_v26  ;;  %v1397_v40 = vmin.f32 %v4209_v62, 0.0  ;;  %v4227_v39 = vld [vmem:[%s4548_s3 + $0xa00] sm:$0xff] }
 0x1a8   : > { %3718 = vmatpush1.bf16.msra.mxu1 %v3717_v46  ;;  %v1379_v20 = vmin.f32 %v4189_v55, 0.0  ;;  %v4191_v46 = vld [vmem:[%s4548_s3 + $0x8d0] sm:$0xff]  ;;  %v3731_v38 = vpack.c.bf16 %v1377_v58, %v1373_v42  ;;  %v1394_v58 = vmin.f32 %v4211_v10, 0.0 }
 0x1a9   : > { %3720 = vmatprep.subr.bf16.mxu1 %v3719_v45  ;;  %2289 = vmatmul.mubr.f32.vlgmr.msra.gmra.mrb[2].mxu0 %v6247_v15  ;;  %v1372_v56 = vmin.f32 %v4191_v46, 0.0  ;;  %v4193_v45 = vld [vmem:[%s4548_s3 + $0x918] sm:$0xff]  ;;  %v3509_v28 = vpack.c.bf16 %v1374_v11, %v1370_v57  ;;  %v1403_v11 = vmin.f32 %v4213_v0, 0.0 }
 0x1aa   : > { %3498 = vmatpush1.bf16.msra.mxu0 %v3497_v17  ;;  %2359 = vmatprep.mubr.f32.mxu0 %v6248_v23  ;;  %v1381_v16 = vmin.f32 %v4193_v45, 0.0  ;;  %v4195_v17 = vld [vmem:[%s4548_s3 + $0x900] sm:$0xff]  ;;  %v3511_v47 = vpack.c.bf16 %v1383_v48, %v1379_v20  ;;  %v1396_v48 = vmin.f32 %v4215_v8, 0.0 }
 0x1ab   : > { %2573 = vmatmul.mubr.f32.vlgmr.msra.gmra.mrb[2].mxu1 %v6247_v15  ;;  %3500 = vmatprep.subr.bf16.mxu0 %v3499_v54  ;;  %v1378_v13 = vmin.f32 %v4195_v17, 0.0  ;;  %v4197_v54 = vld [vmem:[%s4548_s3 + $0x948] sm:$0xff]  ;;  %v3733_v21 = vpack.c.bf16 %v1376_v32, %v1372_v56  ;;  %v4201_v15 = vld [vmem:[%s4548_s3 + $0x958] sm:$0xff]  ;;  %v1405_v32 = vmin.f32 %v4217_v25, 0.0 }
 0x1ac   : > { %3722 = vmatpush1.bf16.msra.mxu1 %v3721_v7  ;;  %2643 = vmatprep.mubr.f32.mxu1 %v6248_v23  ;;  %v1387_v31 = vmin.f32 %v4197_v54, 0.0  ;;  %v4199_v7 = vld [vmem:[%s4548_s3 + $0x910] sm:$0xff]  ;;  %v3735_v19 = vpack.c.bf16 %v1385_v35, %v1381_v16  ;;  %v1395_v23 = vmin.f32 %v4205_v29, 0.0  ;;  %v1402_v35 = vmin.f32 %v4219_v22, 0.0 }
 0x1ad   : > { %3724 = vmatprep.subr.bf16.mxu1 %v3723_v60  ;;  %v1380_v3 = vmin.f32 %v4199_v7, 0.0  ;;  %v1389_v60 = vmin.f32 %v4201_v15, 0.0  ;;  %v3513_v5 = vpack.c.bf16 %v1382_v14, %v1378_v13  ;;  %v1411_v14 = vmin.f32 %v4221_v24, 0.0 }
 0x1ae   : > { %3502 = vmatpush1.bf16.msra.mxu0 %v3501_v37  ;;  %v1386_v37 = vmin.f32 %v4203_v51, 0.0  ;;  %v3515_v61 = vpack.c.bf16 %v1391_v52, %v1387_v31  ;;  %v1404_v52 = vmin.f32 %v4223_v53, 0.0 }
 0x1af   : > { %3504 = vmatprep.subr.bf16.mxu0 %v3503_v1  ;;  %v4206_v1 = vld [vmem:[%s4548_s3 + $0x9a8] sm:$0xff]  ;;  %v3737_v6 = vpack.c.bf16 %v1384_v27, %v1380_v3  ;;  %v3739_v26 = vpack.c.bf16 %v1393_v2, %v1389_v60  ;;  %v1413_v27 = vmin.f32 %v4225_v44, 0.0  ;;  %v1410_v2 = vmin.f32 %v4227_v39, 0.0 }
 0x1b0   : > { %3726 = vmatpush1.bf16.msra.mxu1 %v3725_v41  ;;  %v1399_v50 = vmin.f32 %v4206_v1, 0.0  ;;  %v4208_v41 = vld [vmem:[%s4548_s3 + $0x970] sm:$0xff]  ;;  %v3517_v42 = vpack.c.bf16 %v1390_v59, %v1386_v37  ;;  %v1419_v59 = vmin.f32 %v4229_v4, 0.0 }
 0x1b1   : > { %3728 = vmatprep.subr.bf16.mxu1 %v3727_v63  ;;  %v1392_v43 = vmin.f32 %v4208_v41, 0.0  ;;  %v4210_v63 = vld [vmem:[%s4548_s3 + $0x9b8] sm:$0xff]  ;;  %v4231_v1 = vld [vmem:[%s4548_s3 + $0xa10] sm:$0xff] }
 0x1b2   : > { %3506 = vmatpush1.bf16.msra.mxu0 %v3505_v30  ;;  %v1401_v9 = vmin.f32 %v4210_v63, 0.0  ;;  %v4212_v30 = vld [vmem:[%s4548_s3 + $0x9a0] sm:$0xff]  ;;  %v3519_v57 = vpack.c.bf16 %v1399_v50, %v1395_v23  ;;  %v1412_v50 = vmin.f32 %v4231_v1, 0.0  ;;  %v4233_v41 = vld [vmem:[%s4548_s3 + $0xa58] sm:$0xff] }
 0x1b3   : > { %3508 = vmatprep.subr.bf16.mxu0 %v3507_v36  ;;  %v1398_v12 = vmin.f32 %v4212_v30, 0.0  ;;  %v4214_v36 = vld [vmem:[%s4548_s3 + $0x9e8] sm:$0xff]  ;;  %v3741_v20 = vpack.c.bf16 %v1392_v43, %v1388_v34  ;;  %v1421_v43 = vmin.f32 %v4233_v41, 0.0  ;;  %v4235_v63 = vld [vmem:[%s4548_s3 + $0xa40] sm:$0xff] }
 0x1b4   : > { %3730 = vmatpush1.bf16.msra.mxu1 %v3729_v18  ;;  %v1407_v55 = vmin.f32 %v4214_v36, 0.0  ;;  %v4216_v18 = vld [vmem:[%s4548_s3 + $0x9b0] sm:$0xff]  ;;  %v3743_v56 = vpack.c.bf16 %v1401_v9, %v1397_v40  ;;  %v1418_v9 = vmin.f32 %v4235_v63, 0.0  ;;  %v4237_v30 = vld [vmem:[%s4548_s3 + $0xa88] sm:$0xff] }
 0x1b5   : > { %3732 = vmatprep.subr.bf16.mxu1 %v3731_v38  ;;  %v1400_v46 = vmin.f32 %v4216_v18, 0.0  ;;  %v4218_v38 = vld [vmem:[%s4548_s3 + $0x9f8] sm:$0xff]  ;;  %v3521_v16 = vpack.c.bf16 %v1398_v12, %v1394_v58  ;;  %v1427_v12 = vmin.f32 %v4237_v30, 0.0  ;;  %v4239_v36 = vld [vmem:[%s4548_s3 + $0xa50] sm:$0xff] }
 0x1b6   : > { %3510 = vmatpush1.bf16.msra.mxu0 %v3509_v28  ;;  %v1409_v45 = vmin.f32 %v4218_v38, 0.0  ;;  %v4220_v28 = vld [vmem:[%s4548_s3 + $0x9e0] sm:$0xff]  ;;  %v3523_v13 = vpack.c.bf16 %v1407_v55, %v1403_v11  ;;  %v1420_v55 = vmin.f32 %v4239_v36, 0.0  ;;  %v4241_v18 = vld [vmem:[%s4548_s3 + $0xa98] sm:$0xff] }
 0x1b7   : > { %3512 = vmatprep.subr.bf16.mxu0 %v3511_v47  ;;  %v1406_v17 = vmin.f32 %v4220_v28, 0.0  ;;  %v4222_v47 = vld [vmem:[%s4548_s3 + $0xa28] sm:$0xff]  ;;  %v3745_v31 = vpack.c.bf16 %v1400_v46, %v1396_v48  ;;  %v1429_v46 = vmin.f32 %v4241_v18, 0.0  ;;  %v4243_v38 = vld [vmem:[%s4548_s3 + $0xa80] sm:$0xff] }
 0x1b8   : > { %3734 = vmatpush1.bf16.msra.mxu1 %v3733_v21  ;;  %v1415_v54 = vmin.f32 %v4222_v47, 0.0  ;;  %v4224_v21 = vld [vmem:[%s4548_s3 + $0x9f0] sm:$0xff]  ;;  %v3747_v3 = vpack.c.bf16 %v1409_v45, %v1405_v32  ;;  %v1426_v45 = vmin.f32 %v4243_v38, 0.0  ;;  %v4245_v28 = vld [vmem:[%s4548_s3 + $0xac8] sm:$0xff] }
 0x1b9   : > { %3736 = vmatprep.subr.bf16.mxu1 %v3735_v19  ;;  %v1408_v7 = vmin.f32 %v4224_v21, 0.0  ;;  %v4226_v19 = vld [vmem:[%s4548_s3 + $0xa38] sm:$0xff]  ;;  %v3525_v60 = vpack.c.bf16 %v1406_v17, %v1402_v35  ;;  %v1435_v17 = vmin.f32 %v4245_v28, 0.0  ;;  %v4247_v47 = vld [vmem:[%s4548_s3 + $0xa90] sm:$0xff] }
 0x1ba   : > { %3514 = vmatpush1.bf16.msra.mxu0 %v3513_v5  ;;  %v1417_v15 = vmin.f32 %v4226_v19, 0.0  ;;  %v4228_v5 = vld [vmem:[%s4548_s3 + $0xa20] sm:$0xff]  ;;  %v3527_v37 = vpack.c.bf16 %v1415_v54, %v1411_v14  ;;  %v1428_v54 = vmin.f32 %v4247_v47, 0.0  ;;  %v4249_v21 = vld [vmem:[%s4548_s3 + $0xad8] sm:$0xff] }
 0x1bb   : > { %3516 = vmatprep.subr.bf16.mxu0 %v3515_v61  ;;  %v1414_v51 = vmin.f32 %v4228_v5, 0.0  ;;  %v4230_v61 = vld [vmem:[%s4548_s3 + $0xa68] sm:$0xff]  ;;  %v3749_v23 = vpack.c.bf16 %v1408_v7, %v1404_v52  ;;  %v1437_v7 = vmin.f32 %v4249_v21, 0.0  ;;  %v4251_v19 = vld [vmem:[%s4548_s3 + $0xac0] sm:$0xff] }
 0x1bc   : > { %3738 = vmatpush1.bf16.msra.mxu1 %v3737_v6  ;;  %v1423_v29 = vmin.f32 %v4230_v61, 0.0  ;;  %v4232_v6 = vld [vmem:[%s4548_s3 + $0xa30] sm:$0xff]  ;;  %v3751_v34 = vpack.c.bf16 %v1417_v15, %v1413_v27  ;;  %v1434_v15 = vmin.f32 %v4251_v19, 0.0  ;;  %v4253_v5 = vld [vmem:[%s4548_s3 + $0xb08] sm:$0xff] }
 0x1bd   : > { %3740 = vmatprep.subr.bf16.mxu1 %v3739_v26  ;;  %v1416_v49 = vmin.f32 %v4232_v6, 0.0  ;;  %v4234_v26 = vld [vmem:[%s4548_s3 + $0xa78] sm:$0xff]  ;;  %v3529_v40 = vpack.c.bf16 %v1414_v51, %v1410_v2  ;;  %v1443_v51 = vmin.f32 %v4253_v5, 0.0  ;;  %v4255_v61 = vld [vmem:[%s4548_s3 + $0xad0] sm:$0xff] }
 0x1be   : > { %3518 = vmatpush1.bf16.msra.mxu0 %v3517_v42  ;;  %v1425_v62 = vmin.f32 %v4234_v26, 0.0  ;;  %v4236_v42 = vld [vmem:[%s4548_s3 + $0xa60] sm:$0xff]  ;;  %v3531_v58 = vpack.c.bf16 %v1423_v29, %v1419_v59  ;;  %v1436_v29 = vmin.f32 %v4255_v61, 0.0  ;;  %v4257_v6 = vld [vmem:[%s4548_s3 + $0xb18] sm:$0xff] }
 0x1bf   : > { %3520 = vmatprep.subr.bf16.mxu0 %v3519_v57  ;;  %v1422_v10 = vmin.f32 %v4236_v42, 0.0  ;;  %v4238_v57 = vld [vmem:[%s4548_s3 + $0xaa8] sm:$0xff]  ;;  %v3753_v11 = vpack.c.bf16 %v1416_v49, %v1412_v50  ;;  %v1445_v49 = vmin.f32 %v4257_v6, 0.0  ;;  %v4259_v26 = vld [vmem:[%s4548_s3 + $0xb00] sm:$0xff] }
 0x1c0   : > { %3742 = vmatpush1.bf16.msra.mxu1 %v3741_v20  ;;  %v1431_v0 = vmin.f32 %v4238_v57, 0.0  ;;  %v4240_v20 = vld [vmem:[%s4548_s3 + $0xa70] sm:$0xff]  ;;  %v3755_v48 = vpack.c.bf16 %v1425_v62, %v1421_v43  ;;  %v1442_v62 = vmin.f32 %v4259_v26, 0.0  ;;  %v4261_v42 = vld [vmem:[%s4548_s3 + $0xb48] sm:$0xff] }
 0x1c1   : > { %3744 = vmatprep.subr.bf16.mxu1 %v3743_v56  ;;  %v1424_v8 = vmin.f32 %v4240_v20, 0.0  ;;  %v4242_v56 = vld [vmem:[%s4548_s3 + $0xab8] sm:$0xff]  ;;  %v3533_v32 = vpack.c.bf16 %v1422_v10, %v1418_v9  ;;  %v1451_v10 = vmin.f32 %v4261_v42, 0.0  ;;  %v4263_v57 = vld [vmem:[%s4548_s3 + $0xb10] sm:$0xff] }
 0x1c2   : > { %3522 = vmatpush1.bf16.msra.mxu0 %v3521_v16  ;;  %v1433_v25 = vmin.f32 %v4242_v56, 0.0  ;;  %v4244_v16 = vld [vmem:[%s4548_s3 + $0xaa0] sm:$0xff]  ;;  %v3535_v35 = vpack.c.bf16 %v1431_v0, %v1427_v12  ;;  %v1444_v0 = vmin.f32 %v4263_v57, 0.0  ;;  %v4265_v20 = vld [vmem:[%s4548_s3 + $0xb58] sm:$0xff] }
 0x1c3   : > { %3524 = vmatprep.subr.bf16.mxu0 %v3523_v13  ;;  %v1430_v22 = vmin.f32 %v4244_v16, 0.0  ;;  %v4246_v13 = vld [vmem:[%s4548_s3 + $0xae8] sm:$0xff]  ;;  %v3757_v14 = vpack.c.bf16 %v1424_v8, %v1420_v55  ;;  %v1453_v8 = vmin.f32 %v4265_v20, 0.0  ;;  %v4267_v56 = vld [vmem:[%s4548_s3 + $0xb40] sm:$0xff] }
 0x1c4   : > { %3746 = vmatpush1.bf16.msra.mxu1 %v3745_v31  ;;  %v1439_v24 = vmin.f32 %v4246_v13, 0.0  ;;  %v4248_v31 = vld [vmem:[%s4548_s3 + $0xab0] sm:$0xff]  ;;  %v3759_v52 = vpack.c.bf16 %v1433_v25, %v1429_v46  ;;  %v1450_v25 = vmin.f32 %v4267_v56, 0.0  ;;  %v4269_v16 = vld [vmem:[%s4548_s3 + $0xb88] sm:$0xff] }
 0x1c5   : > { %3748 = vmatprep.subr.bf16.mxu1 %v3747_v3  ;;  %v1432_v53 = vmin.f32 %v4248_v31, 0.0  ;;  %v4250_v3 = vld [vmem:[%s4548_s3 + $0xaf8] sm:$0xff]  ;;  %v3537_v27 = vpack.c.bf16 %v1430_v22, %v1426_v45  ;;  %v1459_v22 = vmin.f32 %v4269_v16, 0.0  ;;  %v4271_v13 = vld [vmem:[%s4548_s3 + $0xb50] sm:$0xff] }
 0x1c6   : > { %3526 = vmatpush1.bf16.msra.mxu0 %v3525_v60  ;;  %v1441_v44 = vmin.f32 %v4250_v3, 0.0  ;;  %v4252_v60 = vld [vmem:[%s4548_s3 + $0xae0] sm:$0xff]  ;;  %v3539_v2 = vpack.c.bf16 %v1439_v24, %v1435_v17  ;;  %v1452_v24 = vmin.f32 %v4271_v13, 0.0  ;;  %v4273_v31 = vld [vmem:[%s4548_s3 + $0xb98] sm:$0xff] }
 0x1c7   : > { %3528 = vmatprep.subr.bf16.mxu0 %v3527_v37  ;;  %v1438_v39 = vmin.f32 %v4252_v60, 0.0  ;;  %v4254_v37 = vld [vmem:[%s4548_s3 + $0xb28] sm:$0xff]  ;;  %v3761_v59 = vpack.c.bf16 %v1432_v53, %v1428_v54  ;;  %v1461_v53 = vmin.f32 %v4273_v31, 0.0  ;;  %v4275_v3 = vld [vmem:[%s4548_s3 + $0xb80] sm:$0xff] }
 0x1c8   : > { %3750 = vmatpush1.bf16.msra.mxu1 %v3749_v23  ;;  %v1447_v4 = vmin.f32 %v4254_v37, 0.0  ;;  %v4256_v23 = vld [vmem:[%s4548_s3 + $0xaf0] sm:$0xff]  ;;  %v3763_v50 = vpack.c.bf16 %v1441_v44, %v1437_v7  ;;  %v1458_v44 = vmin.f32 %v4275_v3, 0.0  ;;  %v4277_v60 = vld [vmem:[%s4548_s3 + $0xbc8] sm:$0xff] }
 0x1c9   : > { %3752 = vmatprep.subr.bf16.mxu1 %v3751_v34  ;;  %v1440_v1 = vmin.f32 %v4256_v23, 0.0  ;;  %v4258_v34 = vld [vmem:[%s4548_s3 + $0xb38] sm:$0xff]  ;;  %v3541_v43 = vpack.c.bf16 %v1438_v39, %v1434_v15  ;;  %v1467_v39 = vmin.f32 %v4277_v60, 0.0  ;;  %v4279_v37 = vld [vmem:[%s4548_s3 + $0xb90] sm:$0xff] }
 0x1ca   : > { %3530 = vmatpush1.bf16.msra.mxu0 %v3529_v40  ;;  %v1449_v41 = vmin.f32 %v4258_v34, 0.0  ;;  %v4260_v40 = vld [vmem:[%s4548_s3 + $0xb20] sm:$0xff]  ;;  %v3543_v9 = vpack.c.bf16 %v1447_v4, %v1443_v51  ;;  %v1460_v4 = vmin.f32 %v4279_v37, 0.0  ;;  %v4281_v23 = vld [vmem:[%s4548_s3 + $0xbd8] sm:$0xff] }
 0x1cb   : > { %3532 = vmatprep.subr.bf16.mxu0 %v3531_v58  ;;  %v1446_v63 = vmin.f32 %v4260_v40, 0.0  ;;  %v4262_v58 = vld [vmem:[%s4548_s3 + $0xb68] sm:$0xff]  ;;  %v3765_v12 = vpack.c.bf16 %v1440_v1, %v1436_v29  ;;  %v1469_v1 = vmin.f32 %v4281_v23, 0.0  ;;  %v4283_v34 = vld [vmem:[%s4548_s3 + $0xbc0] sm:$0xff]  ;;  %v4306_v23 = vld [vmem:[%s4548_s3 + $0xcb8] sm:$0xff] }
 0x1cc   : > { %3754 = vmatpush1.bf16.msra.mxu1 %v3753_v11  ;;  %v1455_v30 = vmin.f32 %v4262_v58, 0.0  ;;  %v4264_v11 = vld [vmem:[%s4548_s3 + $0xb30] sm:$0xff]  ;;  %v3767_v55 = vpack.c.bf16 %v1449_v41, %v1445_v49  ;;  %v1466_v41 = vmin.f32 %v4283_v34, 0.0  ;;  %v4285_v40 = vld [vmem:[%s4548_s3 + $0xc08] sm:$0xff]  ;;  %v4308_v34 = vld [vmem:[%s4548_s3 + $0xca0] sm:$0xff] }
 0x1cd   : > { %3756 = vmatprep.subr.bf16.mxu1 %v3755_v48  ;;  %v1448_v36 = vmin.f32 %v4264_v11, 0.0  ;;  %v4266_v48 = vld [vmem:[%s4548_s3 + $0xb78] sm:$0xff]  ;;  %v3545_v46 = vpack.c.bf16 %v1446_v63, %v1442_v62  ;;  %v1475_v63 = vmin.f32 %v4285_v40, 0.0  ;;  %v4287_v58 = vld [vmem:[%s4548_s3 + $0xbd0] sm:$0xff] }
 0x1ce   : > { %3534 = vmatpush1.bf16.msra.mxu0 %v3533_v32  ;;  %v1457_v18 = vmin.f32 %v4266_v48, 0.0  ;;  %v4268_v32 = vld [vmem:[%s4548_s3 + $0xb60] sm:$0xff]  ;;  %v3547_v45 = vpack.c.bf16 %v1455_v30, %v1451_v10  ;;  %v1468_v30 = vmin.f32 %v4287_v58, 0.0  ;;  %v4289_v11 = vld [vmem:[%s4548_s3 + $0xc18] sm:$0xff] }
 0x1cf   : > { %3536 = vmatprep.subr.bf16.mxu0 %v3535_v35  ;;  %v1454_v38 = vmin.f32 %v4268_v32, 0.0  ;;  %v4270_v35 = vld [vmem:[%s4548_s3 + $0xba8] sm:$0xff]  ;;  %v3769_v17 = vpack.c.bf16 %v1448_v36, %v1444_v0  ;;  %v1477_v36 = vmin.f32 %v4289_v11, 0.0  ;;  %v4291_v48 = vld [vmem:[%s4548_s3 + $0xc00] sm:$0xff] }
 0x1d0   : > { %3758 = vmatpush1.bf16.msra.mxu1 %v3757_v14  ;;  %v1463_v28 = vmin.f32 %v4270_v35, 0.0  ;;  %v4272_v14 = vld [vmem:[%s4548_s3 + $0xb70] sm:$0xff]  ;;  %v3771_v54 = vpack.c.bf16 %v1457_v18, %v1453_v8  ;;  %v1474_v18 = vmin.f32 %v4291_v48, 0.0  ;;  %v4293_v32 = vld [vmem:[%s4548_s3 + $0xc48] sm:$0xff] }
 0x1d1   : > { %3760 = vmatprep.subr.bf16.mxu1 %v3759_v52  ;;  %v1456_v47 = vmin.f32 %v4272_v14, 0.0  ;;  %v4274_v52 = vld [vmem:[%s4548_s3 + $0xbb8] sm:$0xff]  ;;  %v3549_v7 = vpack.c.bf16 %v1454_v38, %v1450_v25  ;;  %v1483_v38 = vmin.f32 %v4293_v32, 0.0  ;;  %v4295_v35 = vld [vmem:[%s4548_s3 + $0xc10] sm:$0xff] }
 0x1d2   : > { %3538 = vmatpush1.bf16.msra.mxu0 %v3537_v27  ;;  %v1465_v21 = vmin.f32 %v4274_v52, 0.0  ;;  %v4276_v27 = vld [vmem:[%s4548_s3 + $0xba0] sm:$0xff]  ;;  %v3551_v15 = vpack.c.bf16 %v1463_v28, %v1459_v22  ;;  %v1476_v28 = vmin.f32 %v4295_v35, 0.0  ;;  %v4297_v14 = vld [vmem:[%s4548_s3 + $0xc58] sm:$0xff] }
 0x1d3   : > { %3540 = vmatprep.subr.bf16.mxu0 %v3539_v2  ;;  %v1462_v19 = vmin.f32 %v4276_v27, 0.0  ;;  %v4278_v2 = vld [vmem:[%s4548_s3 + $0xbe8] sm:$0xff]  ;;  %v3773_v51 = vpack.c.bf16 %v1456_v47, %v1452_v24  ;;  %v1485_v47 = vmin.f32 %v4297_v14, 0.0  ;;  %v4299_v52 = vld [vmem:[%s4548_s3 + $0xc40] sm:$0xff] }
 0x1d4   : > { %3762 = vmatpush1.bf16.msra.mxu1 %v3761_v59  ;;  %v1471_v5 = vmin.f32 %v4278_v2, 0.0  ;;  %v4280_v59 = vld [vmem:[%s4548_s3 + $0xbb0] sm:$0xff]  ;;  %v3775_v29 = vpack.c.bf16 %v1465_v21, %v1461_v53  ;;  %v1482_v21 = vmin.f32 %v4299_v52, 0.0  ;;  %v4301_v27 = vld [vmem:[%s4548_s3 + $0xc88] sm:$0xff] }
 0x1d5   : > { %3764 = vmatprep.subr.bf16.mxu1 %v3763_v50  ;;  %v1464_v61 = vmin.f32 %v4280_v59, 0.0  ;;  %v4282_v50 = vld [vmem:[%s4548_s3 + $0xbf8] sm:$0xff]  ;;  %v3553_v49 = vpack.c.bf16 %v1462_v19, %v1458_v44  ;;  %v1491_v19 = vmin.f32 %v4301_v27, 0.0  ;;  %v4303_v2 = vld [vmem:[%s4548_s3 + $0xc50] sm:$0xff] }
 0x1d6   : > { %3542 = vmatpush1.bf16.msra.mxu0 %v3541_v43  ;;  %v1473_v6 = vmin.f32 %v4282_v50, 0.0  ;;  %v4284_v43 = vld [vmem:[%s4548_s3 + $0xbe0] sm:$0xff]  ;;  %v3555_v62 = vpack.c.bf16 %v1471_v5, %v1467_v39  ;;  %v1484_v5 = vmin.f32 %v4303_v2, 0.0 }
 0x1d7   : > { %3544 = vmatprep.subr.bf16.mxu0 %v3543_v9  ;;  %v1470_v26 = vmin.f32 %v4284_v43, 0.0  ;;  %v4286_v9 = vld [vmem:[%s4548_s3 + $0xc28] sm:$0xff]  ;;  %v3777_v10 = vpack.c.bf16 %v1464_v61, %v1460_v4  ;;  %v4305_v61 = vld [vmem:[%s4548_s3 + $0xc98] sm:$0xff]  ;;  %v6250_v43 = vmov 0.0  }
 0x1d8   : > { %3766 = vmatpush1.bf16.msra.mxu1 %v3765_v12  ;;  %v1479_v42 = vmin.f32 %v4286_v9, 0.0  ;;  %v4288_v12 = vld [vmem:[%s4548_s3 + $0xbf0] sm:$0xff]  ;;  %v3779_v0 = vpack.c.bf16 %v1473_v6, %v1469_v1  ;;  %v6249_v4 = vld [vmem:[#allocation32_spill] sm:$0xff]  ;;  %v1497_v1 = vmin.f32 %v4306_v23, 0.0  ;;  %v4307_v6 = vld [vmem:[%s4548_s3 + $0xc80] sm:$0xff] }
 0x1d9   : > { %3768 = vmatprep.subr.bf16.mxu1 %v3767_v55  ;;  %v1472_v57 = vmin.f32 %v4288_v12, 0.0  ;;  %v4290_v55 = vld [vmem:[%s4548_s3 + $0xc38] sm:$0xff]  ;;  %v3557_v8 = vpack.c.bf16 %v1470_v26, %v1466_v41  ;;  %v1494_v41 = vmin.f32 %v4308_v34, 0.0 }
 0x1da   : > { %3546 = vmatpush1.bf16.msra.mxu0 %v3545_v46  ;;  %v1481_v20 = vmin.f32 %v4290_v55, 0.0  ;;  %v4292_v46 = vld [vmem:[%s4548_s3 + $0xc20] sm:$0xff]  ;;  %v3559_v25 = vpack.c.bf16 %v1479_v42, %v1475_v63  ;;  %v4310_v63 = vld [vmem:[%s4548_s3 + $0xce8] sm:$0xff] }
 0x1db   : > { %3548 = vmatprep.subr.bf16.mxu0 %v3547_v45  ;;  %v1478_v56 = vmin.f32 %v4292_v46, 0.0  ;;  %v4294_v45 = vld [vmem:[%s4548_s3 + $0xc68] sm:$0xff]  ;;  %v3781_v22 = vpack.c.bf16 %v1472_v57, %v1468_v30  ;;  %v1503_v9 = vmin.f32 %v4310_v63, 0.0  ;;  %v4312_v30 = vld [vmem:[%s4548_s3 + $0xcb0] sm:$0xff] }
 0x1dc   : > { %3770 = vmatpush1.bf16.msra.mxu1 %v3769_v17  ;;  %v1487_v16 = vmin.f32 %v4294_v45, 0.0  ;;  %v4296_v17 = vld [vmem:[%s4548_s3 + $0xc30] sm:$0xff]  ;;  %v3783_v24 = vpack.c.bf16 %v1481_v20, %v1477_v36  ;;  %v1496_v12 = vmin.f32 %v4312_v30, 0.0  ;;  %v4314_v36 = vld [vmem:[%s4548_s3 + $0xcf8] sm:$0xff] }
 0x1dd   : > { %3772 = vmatprep.subr.bf16.mxu1 %v3771_v54  ;;  %v1480_v13 = vmin.f32 %v4296_v17, 0.0  ;;  %v4298_v54 = vld [vmem:[%s4548_s3 + $0xc78] sm:$0xff]  ;;  %v3561_v53 = vpack.c.bf16 %v1478_v56, %v1474_v18  ;;  %v1505_v55 = vmin.f32 %v4314_v36, 0.0  ;;  %v4316_v18 = vld [vmem:[%s4548_s3 + $0xce0] sm:$0xff]  ;;  %v4335_v63 = vld [vmem:[%s4548_s3 + $0xd50] sm:$0xff] }
 0x1de   : > { %3550 = vmatpush1.bf16.msra.mxu0 %v3549_v7  ;;  %v1489_v31 = vmin.f32 %v4298_v54, 0.0  ;;  %v4300_v7 = vld [vmem:[%s4548_s3 + $0xc60] sm:$0xff]  ;;  %v3563_v44 = vpack.c.bf16 %v1487_v16, %v1483_v38  ;;  %v1502_v46 = vmin.f32 %v4316_v18, 0.0  ;;  %v4318_v38 = vld [vmem:[%s4548_s3 + $0xd28] sm:$0xff]  ;;  %v4337_v30 = vld [vmem:[%s4548_s3 + $0xd98] sm:$0xff] }
 0x1df   : > { %3552 = vmatprep.subr.bf16.mxu0 %v3551_v15  ;;  %v1486_v3 = vmin.f32 %v4300_v7, 0.0  ;;  %v4302_v15 = vld [vmem:[%s4548_s3 + $0xca8] sm:$0xff]  ;;  %v3785_v39 = vpack.c.bf16 %v1480_v13, %v1476_v28  ;;  %v1511_v45 = vmin.f32 %v4318_v38, 0.0  ;;  %v4320_v28 = vld [vmem:[%s4548_s3 + $0xcf0] sm:$0xff]  ;;  %v4339_v36 = vld [vmem:[%s4548_s3 + $0xd80] sm:$0xff] }
 0x1e0   : > { %3774 = vmatpush1.bf16.msra.mxu1 %v3773_v51  ;;  %v1495_v60 = vmin.f32 %v4302_v15, 0.0  ;;  %v4304_v51 = vld [vmem:[%s4548_s3 + $0xc70] sm:$0xff]  ;;  %v3787_v59 = vpack.c.bf16 %v1489_v31, %v1485_v47  ;;  %v1504_v17 = vmin.f32 %v4320_v28, 0.0  ;;  %v4322_v47 = vld [vmem:[%s4548_s3 + $0xd38] sm:$0xff]  ;;  %v4341_v18 = vld [vmem:[%s4548_s3 + $0xdc8] sm:$0xff] }
 0x1e1   : > { %3776 = vmatprep.subr.bf16.mxu1 %v3775_v29  ;;  %v1488_v37 = vmin.f32 %v4304_v51, 0.0  ;;  %v1493_v29 = vmin.f32 %v4305_v61, 0.0  ;;  %v3565_v50 = vpack.c.bf16 %v1486_v3, %v1482_v21  ;;  %v1513_v54 = vmin.f32 %v4322_v47, 0.0  ;;  %v4324_v21 = vld [vmem:[%s4548_s3 + $0xd20] sm:$0xff]  ;;  %v4330_v61 = vld [vmem:[%s4548_s3 + $0xd78] sm:$0xff] }
 0x1e2   : > { %3554 = vmatpush1.bf16.msra.mxu0 %v3553_v49  ;;  %v1490_v49 = vmin.f32 %v4307_v6, 0.0  ;;  %v3567_v26 = vpack.c.bf16 %v1495_v60, %v1491_v19  ;;  %v1510_v7 = vmin.f32 %v4324_v21, 0.0  ;;  %v4326_v19 = vld [vmem:[%s4548_s3 + $0xd68] sm:$0xff]  ;;  %v4332_v6 = vld [vmem:[%s4548_s3 + $0xd60] sm:$0xff] }
 0x1e3   : > { %3556 = vmatprep.subr.bf16.mxu0 %v3555_v62  ;;  %v4309_v62 = vld [vmem:[%s4548_s3 + $0xcc8] sm:$0xff]  ;;  %v3789_v42 = vpack.c.bf16 %v1488_v37, %v1484_v5  ;;  %v3791_v57 = vpack.c.bf16 %v1497_v1, %v1493_v29  ;;  %v1519_v15 = vmin.f32 %v4326_v19, 0.0  ;;  %v4328_v5 = vld [vmem:[%s4548_s3 + $0xd30] sm:$0xff]  ;;  %v1521_v29 = vmin.f32 %v4330_v61, 0.0  ;;  %v4331_v1 = vld [vmem:[%s4548_s3 + $0xd40] sm:$0xff] }
 0x1e4   : > { %3778 = vmatpush1.bf16.msra.mxu1 %v3777_v10  ;;  %v1499_v40 = vmin.f32 %v4309_v62, 0.0  ;;  %v4311_v10 = vld [vmem:[%s4548_s3 + $0xc90] sm:$0xff]  ;;  %v3569_v20 = vpack.c.bf16 %v1494_v41, %v1490_v49  ;;  %v1512_v51 = vmin.f32 %v4328_v5, 0.0  ;;  %v1518_v49 = vmin.f32 %v4332_v6, 0.0  ;;  %v4333_v41 = vld [vmem:[%s4548_s3 + $0xd88] sm:$0xff]  ;;  %v4348_v21 = vld [vmem:[%s4548_s3 + $0xde0] sm:$0xff] }
 0x1e5   : > { %3780 = vmatprep.subr.bf16.mxu1 %v3779_v0  ;;  %v1492_v58 = vmin.f32 %v4311_v10, 0.0  ;;  %v4313_v0 = vld [vmem:[%s4548_s3 + $0xcd8] sm:$0xff]  ;;  %v4349_v19 = vld [vmem:[%s4548_s3 + $0xdd0] sm:$0xff] }
 0x1e6   : > { %3558 = vmatpush1.bf16.msra.mxu0 %v3557_v8  ;;  %v1501_v11 = vmin.f32 %v4313_v0, 0.0  ;;  %v4315_v8 = vld [vmem:[%s4548_s3 + $0xcc0] sm:$0xff]  ;;  %v3571_v56 = vpack.c.bf16 %v1503_v9, %v1499_v40  ;;  %v1516_v9 = vmin.f32 %v4335_v63, 0.0 }
 0x1e7   : > { %3560 = vmatprep.subr.bf16.mxu0 %v3559_v25  ;;  %v1498_v48 = vmin.f32 %v4315_v8, 0.0  ;;  %v4317_v25 = vld [vmem:[%s4548_s3 + $0xd08] sm:$0xff]  ;;  %v3793_v16 = vpack.c.bf16 %v1496_v12, %v1492_v58  ;;  %v1525_v12 = vmin.f32 %v4337_v30, 0.0 }
 0x1e8   : > { %3782 = vmatpush1.bf16.msra.mxu1 %v3781_v22  ;;  %v1507_v32 = vmin.f32 %v4317_v25, 0.0  ;;  %v4319_v22 = vld [vmem:[%s4548_s3 + $0xcd0] sm:$0xff]  ;;  %v3795_v13 = vpack.c.bf16 %v1505_v55, %v1501_v11  ;;  %v1522_v55 = vmin.f32 %v4339_v36, 0.0 }
 0x1e9   : > { %3784 = vmatprep.subr.bf16.mxu1 %v3783_v24  ;;  %2360 = vmatmul.mubr.f32.vlgmr.msra.gmra.mrb[2].mxu0 %v6249_v4  ;;  %v1500_v35 = vmin.f32 %v4319_v22, 0.0  ;;  %v4321_v24 = vld [vmem:[%s4548_s3 + $0xd18] sm:$0xff]  ;;  %v3573_v31 = vpack.c.bf16 %v1502_v46, %v1498_v48  ;;  %v1531_v46 = vmin.f32 %v4341_v18, 0.0  ;;  %v4344_v22 = vld [vmem:[%s4548_s3 + $0xdb0] sm:$0xff] }
 0x1ea   : > { %3562 = vmatpush1.bf16.msra.mxu0 %v3561_v53  ;;  %2430 = vmatprep.mubr.f32.mxu0 %v6250_v43  ;;  %v1509_v14 = vmin.f32 %v4321_v24, 0.0  ;;  %v4323_v53 = vld [vmem:[%s4548_s3 + $0xd00] sm:$0xff]  ;;  %v3575_v3 = vpack.c.bf16 %v1511_v45, %v1507_v32  ;;  %v4343_v45 = vld [vmem:[%s4548_s3 + $0xd90] sm:$0xff] }
 0x1eb   : > { %2644 = vmatmul.mubr.f32.vlgmr.msra.gmra.mrb[2].mxu1 %v6249_v4  ;;  %3564 = vmatprep.subr.bf16.mxu0 %v3563_v44  ;;  %v1506_v52 = vmin.f32 %v4323_v53, 0.0  ;;  %v4325_v44 = vld [vmem:[%s4548_s3 + $0xd48] sm:$0xff]  ;;  %v3797_v60 = vpack.c.bf16 %v1504_v17, %v1500_v35  ;;  %v4329_v4 = vld [vmem:[%s4548_s3 + $0xd58] sm:$0xff]  ;;  %v1528_v35 = vmin.f32 %v4344_v22, 0.0  ;;  %v4347_v53 = vld [vmem:[%s4548_s3 + $0xdc0] sm:$0xff] }
 0x1ec   : > { %3786 = vmatpush1.bf16.msra.mxu1 %v3785_v39  ;;  %2714 = vmatprep.mubr.f32.mxu1 %v6250_v43  ;;  %v1515_v27 = vmin.f32 %v4325_v44, 0.0  ;;  %v4327_v39 = vld [vmem:[%s4548_s3 + $0xd10] sm:$0xff]  ;;  %v3799_v37 = vpack.c.bf16 %v1513_v54, %v1509_v14  ;;  %v1523_v43 = vmin.f32 %v4333_v41, 0.0  ;;  %v4346_v14 = vld [vmem:[%s4548_s3 + $0xdf8] sm:$0xff] }
 0x1ed   : > { %3788 = vmatprep.subr.bf16.mxu1 %v3787_v59  ;;  %v1508_v2 = vmin.f32 %v4327_v39, 0.0  ;;  %v1517_v59 = vmin.f32 %v4329_v4, 0.0  ;;  %v3577_v23 = vpack.c.bf16 %v1510_v7, %v1506_v52  ;;  %v1537_v47 = vmin.f32 %v4346_v14, 0.0 }
 0x1ee   : > { %3566 = vmatpush1.bf16.msra.mxu0 %v3565_v50  ;;  %v1514_v50 = vmin.f32 %v4331_v1, 0.0  ;;  %v3579_v34 = vpack.c.bf16 %v1519_v15, %v1515_v27  ;;  %v1530_v52 = vmin.f32 %v4347_v53, 0.0  ;;  %v1534_v7 = vmin.f32 %v4348_v21, 0.0 }
 0x1ef   : > { %3568 = vmatprep.subr.bf16.mxu0 %v3567_v26  ;;  %v4334_v26 = vld [vmem:[%s4548_s3 + $0xda8] sm:$0xff]  ;;  %v3801_v40 = vpack.c.bf16 %v1512_v51, %v1508_v2  ;;  %v3803_v58 = vpack.c.bf16 %v1521_v29, %v1517_v59  ;;  %v1532_v15 = vmin.f32 %v4349_v19, 0.0 }
 0x1f0   : > { %3790 = vmatpush1.bf16.msra.mxu1 %v3789_v42  ;;  %v1527_v62 = vmin.f32 %v4334_v26, 0.0  ;;  %v4336_v42 = vld [vmem:[%s4548_s3 + $0xd70] sm:$0xff]  ;;  %v3581_v11 = vpack.c.bf16 %v1518_v49, %v1514_v50  ;;  %v3589_v5 = vpack.c.bf16 %v1534_v7, %v1530_v52  ;;  %v6251_v49 = vld [vmem:[#allocation7_spill] sm:$0xff] }
 0x1f1   : > { %3792 = vmatprep.subr.bf16.mxu1 %v3791_v57  ;;  %v1520_v10 = vmin.f32 %v4336_v42, 0.0  ;;  %v4338_v57 = vld [vmem:[%s4548_s3 + $0xdb8] sm:$0xff] }
 0x1f2   : > { %3570 = vmatpush1.bf16.msra.mxu0 %v3569_v20  ;;  %v1529_v0 = vmin.f32 %v4338_v57, 0.0  ;;  %v4340_v20 = vld [vmem:[%s4548_s3 + $0xda0] sm:$0xff]  ;;  %v3583_v48 = vpack.c.bf16 %v1527_v62, %v1523_v43 }
 0x1f3   : > { %3572 = vmatprep.subr.bf16.mxu0 %v3571_v56  ;;  %v1526_v8 = vmin.f32 %v4340_v20, 0.0  ;;  %v4342_v56 = vld [vmem:[%s4548_s3 + $0xde8] sm:$0xff]  ;;  %v3805_v38 = vpack.c.bf16 %v1520_v10, %v1516_v9 }
 0x1f4   : > { %3794 = vmatpush1.bf16.msra.mxu1 %v3793_v16  ;;  %v1535_v25 = vmin.f32 %v4342_v56, 0.0  ;;  %v1524_v16 = vmin.f32 %v4343_v45, 0.0  ;;  %v3807_v17 = vpack.c.bf16 %v1529_v0, %v1525_v12 }
 0x1f5   : > { %3796 = vmatprep.subr.bf16.mxu1 %v3795_v13  ;;  %v4345_v13 = vld [vmem:[%s4548_s3 + $0xdd8] sm:$0xff] }
 0x1f6   : > { %3574 = vmatpush1.bf16.msra.mxu0 %v3573_v31  ;;  %v1533_v24 = vmin.f32 %v4345_v13, 0.0  ;;  %v3585_v31 = vpack.c.bf16 %v1526_v8, %v1522_v55  ;;  %v3587_v44 = vpack.c.bf16 %v1535_v25, %v1531_v46  ;;  %v3809_v27 = vpack.c.bf16 %v1528_v35, %v1524_v16  ;;  %v2721_v25 = vld [vmem:[#allocation2] sm:$0xf] }
 0x1f7   : > { %3576 = vmatprep.subr.bf16.mxu0 %v3575_v3 }
 0x1f8   : > { %3798 = vmatpush1.bf16.msra.mxu1 %v3797_v60  ;;  %v4350_v60 = vld [vmem:[%s4548_s3 + $0xdf0] sm:$0xff]  ;;  %v3811_v2 = vpack.c.bf16 %v1537_v47, %v1533_v24 }
 0x1f9   : > { %3800 = vmatprep.subr.bf16.mxu1 %v3799_v37  ;;  %v1536_v39 = vmin.f32 %v4350_v60, 0.0  ;;  %v4439_v37 = vmov 1966171168  }
 0x1fa   : > { %3578 = vmatpush1.bf16.msra.mxu0 %v3577_v23  ;;  %v2745_v4 = vunpack.c.l.s4 %v4439_v37 }
 0x1fb   : > { %3580 = vmatprep.subr.bf16.mxu0 %v3579_v34  ;;  %v3813_v51 = vpack.c.bf16 %v1536_v39, %v1532_v15 }
 0x1fc   : > { %3802 = vmatpush1.bf16.msra.mxu1 %v3801_v40  ;;  %v1864_v32 = vpop.f32.mrb[0].mxu0  ;;  %v2746_v59 = vunpack.c.0.s8 %v2745_v4 }
 0x1fd   : > { %v1866_v28 = vpop.f32.mrb[1].mxu0  ;;  %3804 = vmatprep.subr.bf16.mxu1 %v3803_v58 }
 0x1fe   : > { %v2148_v54 = vpop.f32.mrb[0].mxu1  ;;  %3582 = vmatpush1.bf16.msra.mxu0 %v3581_v11  ;;  %v2749_v34 = vsub.s32 %v2746_v59, %v6251_v49 }
 0x1ff   : > { %v2150_v3 = vpop.f32.mrb[1].mxu1  ;;  %3584 = vmatprep.subr.bf16.mxu0 %v3583_v48 }
 0x200   : > { %3806 = vmatpush1.bf16.msra.mxu1 %v3805_v38 }
 0x201   : > { %3808 = vmatprep.subr.bf16.mxu1 %v3807_v17 }
 0x202   : > { %3586 = vmatpush1.bf16.msra.mxu0 %v3585_v31 }
 0x203   : > { %3588 = vmatprep.subr.bf16.mxu0 %v3587_v44 }
 0x204   : > { %3810 = vmatpush1.bf16.msra.mxu1 %v3809_v27 }
 0x205   : > { %3812 = vmatprep.subr.bf16.mxu1 %v3811_v2 }
 0x206   : > { %3590 = vmatpush1.bf16.msra.mxu0 %v3589_v5 }
 0x208   : > { %3814 = vmatpush1.bf16.msra.mxu1 %v3813_v51 }
 0x209   : > { %2431 = vmatmul.mubr.f32.vlgmr.msra.gmra.mrb[2].mxu0 %v5558_v33 }
 0x20b   : > { %2715 = vmatmul.mubr.f32.vlgmr.msra.gmra.mrb[2].mxu1 %v5558_v33 }
 0x2dc   : > { %v2432_v61 = vpop.f32.mrb[2].mxu0 }
 0x2dd   : > { %v2726_v29 = vrot.slane %v2432_v61, 1  ;;  %v2774_v23 = vrot.slane %v2432_v61, 7  ;;  %v2434_v1 = vpop.f32.mrb[3].mxu0 }
 0x2de   : > { %v2716_v50 = vpop.f32.mrb[2].mxu1  ;;  %v2727_v6 = vrot.slane %v2434_v1, 1  ;;  %v2775_v41 = vrot.slane %v2434_v1, 7 }
 0x2df   : > { %v2734_v43 = vadd.f32 %v2726_v29, %v1864_v32  ;;  %v2782_v26 = vadd.f32 %v2774_v23, %v1864_v32  ;;  %v2728_v62 = vrot.slane %v2716_v50, 1  ;;  %v2776_v40 = vrot.slane %v2716_v50, 7  ;;  %v2718_v63 = vpop.f32.mrb[3].mxu1  ;;  %v2773_v32 = vld [vmem:[#allocation3] sm:$0xf] }
 0x2e0   : > { %v2735_v9 = vadd.f32 %v2727_v6, %v1866_v28  ;;  %v2783_v33 = vadd.f32 %v2775_v41, %v1866_v28  ;;  %v2729_v42 = vrot.slane %v2718_v63, 1  ;;  %v2777_v10 = vrot.slane %v2718_v63, 7 }
 0x2e1   : > { %v2736_v58 = vadd.f32 %v2728_v62, %v2148_v54  ;;  %v2784_v30 = vadd.f32 %v2776_v40, %v2148_v54 }
 0x2e2   : > { %v2742_v12 = vcombine.low %v2734_v43, %v2735_v9  ;;  %v2790_v57 = vcombine.low %v2782_v26, %v2783_v33  ;;  %v2737_v0 = vadd.f32 %v2729_v42, %v2150_v3  ;;  %v2785_v11 = vadd.f32 %v2777_v10, %v2150_v3 }
 0x2e4   : > { %v2750_v36 = vrot.slane %v2742_v12, %v2749_v34  ;;  %v2798_v55 = vrot.slane %v2790_v57, %v2749_v34  ;;  %v2743_v20 = vcombine.low %v2736_v58, %v2737_v0  ;;  %v2791_v8 = vcombine.low %v2784_v30, %v2785_v11 }
 0x2e6   : > { %v2757_v48 = vrot.slane %v2743_v20, %v2749_v34  ;;  %v2805_v18 = vrot.slane %v2791_v8, %v2749_v34 }
 0x2e8   : > { %v2758_v46 = vcombine.low %v2750_v36, %v2757_v48  ;;  %v2806_v56 = vcombine.high %v2798_v55, %v2805_v18 }
 0x2ea   : > { %v2765_v38 = vrot.slane %v2758_v46, %v2749_v34  ;;  %v2813_v45 = vrot.slane %v2806_v56, %v2749_v34 }
 0x2ec   : > { %v2767_v16 = vadd.f32 %v2765_v38, %v2721_v25  ;;  %v2815_v22 = vadd.f32 %v2813_v45, %v2773_v32 }
 0x2ee   : > { %2772 = vst.msk [vmem:[#allocation2] sm:$0xf] %vm5275_vm0, %v2767_v16  ;;  %2816 = vst.msk [vmem:[#allocation3] sm:$0xf] %vm5275_vm0, %v2815_v22 }
 0x2f5   : > { %v2820_v28 = vld [vmem:[#allocation2] sm:$0xf]  ;;  %v2822_v17 = vld [vmem:[#allocation3] sm:$0xf] }
 0x2f6   : > { %2821 = vst.msk [vmem:[%s182_s6] ss:$2 sm:$0xf] %vm5275_vm0, %v2820_v28  ;;  %2915 = vst.msk [vmem:[%s182_s6 + $0x1] ss:$2 sm:$0xf] %vm5275_vm0, %v2822_v17 }
 0x2f7 PF: > { %s15_s14 = sadd.s32 1, %s4431_s14   ;;  %s6253_s9 = smov %s4415_s10 }
 0x2f8   : > { %p12_p9 = scmp.ge.s32.totalorder %s15_s14, 4   ;;  %s6254_s10 = smov %s4419_s11 }
 0x2f9   : > { %s6255_s11 = smov %s4500_s20  ;;  %s6256_s12 = smov %s4427_s13 }
 0x2fa   : > { %s6257_s13 = smov %s6259_s16  ;;  %14 = sbr.rel (!%p12_p9) target bundleno = 4 (0x4), region = 78 }
 0x301   :  { %2847 = vsyncpa [#allocation5], 1 }
 0x302   :  { %2849 = vsyncpa [#allocation5 + $0x1], 1 }

</bundles_post_ra>
